<compile_context>
chip_gen: v7x
topology: tpu7x:2x2x1
jax: 0.10.0
libtpu: 0.0.40
codegen_flags: <defaults>
</compile_context>

<pallas_src>
import functools

import jax
import jax.numpy as jnp
from jax.experimental import pallas as pl
from jax.experimental.pallas import tpu as pltpu


# ---------------------------------------------------------------------------
# Kernel
# ---------------------------------------------------------------------------
def _mha_kernel(x_ref, wqkv_ref, bqkv_ref, wo_ref, bo_ref, o_ref, acc_ref, *,
                head_dim):
    g = pl.program_id(1)
    num_groups = pl.num_programs(1)

    bt, t, e = x_ref.shape                      # (block_b, T, E)
    hd = wo_ref.shape[0]                        # hs * head_dim (lane width >= 128)
    hs = hd // head_dim                         # heads fused in this step

    x = x_ref[...].reshape(bt * t, e)           # fuse batch elems -> bigger M tile
    dt = x.dtype                                # MXU operand dtype

    @pl.when(g == 0)
    def _init():
        acc_ref[...] = jnp.zeros_like(acc_ref)

    # Fused Q|K|V projection for the hs heads of this group: ONE pass over x,
    # N = 3*hs*Dh.  Query scaling is already folded into the packed weights.
    qkv = jnp.dot(x, wqkv_ref[...], preferred_element_type=jnp.float32)
    qkv = qkv + bqkv_ref[...]
    q = qkv[:, 0 * hd:1 * hd].astype(dt).reshape(bt, t, hd)
    k = qkv[:, 1 * hd:2 * hd].astype(dt).reshape(bt, t, hd)
    v = qkv[:, 2 * hd:3 * hd].astype(dt).reshape(bt, t, hd)

    # Per-head attention, batched over the block's batch elements (leading-batch
    # einsums; only one (bt, T, T) f32 score tile live per head).
    head_outs = []
    for j in range(hs):                         # small static loop (hs is 1-2)
        sl = slice(j * head_dim, (j + 1) * head_dim)
        qh, kh, vh = q[:, :, sl], k[:, :, sl], v[:, :, sl]

        s = jnp.einsum("bqd,bkd->bqk", qh, kh,
                       preferred_element_type=jnp.float32)     # (bt, T, T)
        m = jnp.max(s, axis=-1, keepdims=True)
        p = jnp.exp(s - m)
        p = p * pl.reciprocal(jnp.sum(p, axis=-1, keepdims=True), approx=True)
        # dropout p=0.0 (eval) -> identity.
        head_outs.append(
            jnp.einsum("bqk,bkd->bqd", p.astype(dt), vh,
                       preferred_element_type=jnp.float32).astype(dt))  # (bt,T,Dh)

    attn = head_outs[0] if hs == 1 else jnp.concatenate(head_outs, axis=-1)
    attn = attn.reshape(bt * t, hd)             # (bt*T, hs*Dh), lane-dense

    # Out-projection for this head group, accumulated over groups (K = hs*Dh).
    acc_ref[...] += jnp.dot(attn, wo_ref[...], preferred_element_type=jnp.float32)

    @pl.when(g == num_groups - 1)
    def _finalize():
        out = acc_ref[...] + bo_ref[...]
        o_ref[...] = out.reshape(bt, t, e).astype(o_ref.dtype)


# ---------------------------------------------------------------------------
# Tiling heuristics
# ---------------------------------------------------------------------------
def _pick_heads_per_step(num_heads, head_dim):
    """Heads fused per grid step: lane-aligned width, target >=256 (MXU width)."""
    divisors = [d for d in range(1, num_heads + 1) if num_heads % d == 0]
    aligned = [d for d in divisors if (d * head_dim) % 128 == 0]
    cands = aligned if aligned else divisors
    for target in (256, 128):
        for d in cands:
            if d * head_dim >= target:
                return d
    return cands[-1]


def _vmem_limit_bytes():
    """~75% of physical VMEM, capped at 100 MiB (v5e/v6e: ~96 MiB, v7x: 48 MiB)."""
    try:
        cap = int(getattr(pltpu.get_tpu_info(), "vmem_capacity_bytes", 0))
    except Exception:
        cap = 0
    if cap <= 0:
        cap = 64 * 1024 * 1024                  # conservative fallback (v7x-safe)
    return min((cap * 3) // 4, 100 * 1024 * 1024)


def _vmem_bytes_estimate(d, seq_len, embed_dim, hd, dsize):
    """Rough per-step VMEM footprint for block_b = d."""
    m = d * seq_len
    b = 0
    b += 2 * 2 * m * embed_dim * dsize                  # x + out blocks, 2x buffered
    b += m * embed_dim * 4                              # f32 out-proj accumulator
    b += 2 * (3 * embed_dim * hd + hd * embed_dim) * dsize   # weight blocks, 2x buf
    b += m * 3 * hd * (4 + dsize)                       # fused qkv (f32) + q/k/v casts
    b += 2 * d * seq_len * seq_len * 4                  # score/prob tiles
    b += m * hd * dsize                                 # concatenated head outputs
    return b


def _pick_block_b(batch, seq_len, embed_dim, hd, dsize, vmem_limit):
    """Batch elements fused per step: M tile >= 256 if it fits, grid_b >= 2."""
    budget = (vmem_limit * 7) // 10
    max_d = batch // 2 if batch >= 2 else batch         # keep >=2 batch blocks (v7x 2 TCs)
    divisors = [d for d in range(1, max_d + 1) if batch % d == 0]
    fitting = [d for d in divisors
               if _vmem_bytes_estimate(d, seq_len, embed_dim, hd, dsize) <= budget]
    if not fitting:
        return 1
    for target in (256, 128):
        for d in fitting:
            if d * seq_len >= target:
                return d
    return fitting[-1]


# ---------------------------------------------------------------------------
# Wrapper
# ---------------------------------------------------------------------------
def multi_head_attention(hidden_states, params, *, num_heads, block_b=None):
    """Fused self-attention forward. `params` must come from prepare_params()."""
    B, T, E = hidden_states.shape
    if E % num_heads:
        raise ValueError("embed_dim must be divisible by num_heads")
    head_dim = E // num_heads
    hs = params["heads_per_step"]
    if num_heads % hs:
        raise ValueError("heads_per_step must divide num_heads")
    num_groups = num_heads // hs
    hd = hs * head_dim

    wqkv, bqkv, wo, bo = params["wqkv"], params["bqkv"], params["wo"], params["bo"]
    dtype = hidden_states.dtype
    dsize = jnp.dtype(dtype).itemsize

    vmem_limit = _vmem_limit_bytes()
    if block_b is None:
        block_b = _pick_block_b(B, T, E, hd, dsize, vmem_limit)
    if B % block_b:
        raise ValueError("block_b must divide the batch size")
    grid_b = B // block_b

    # TODO(synk): for very long sequences a flash-style KV-tiled online-softmax
    # variant is needed so the (bt, T, T) score tile stays bounded in VMEM
    # (matters earliest on v7x's 64 MiB VMEM).
    x_spec = pl.BlockSpec((block_b, T, E), lambda i, g: (i, 0, 0))
    wqkv_spec = pl.BlockSpec((E, 3 * hd), lambda i, g: (0, g))   # per-group q|k|v cols
    bqkv_spec = pl.BlockSpec((1, 3 * hd), lambda i, g: (0, g))
    wo_spec = pl.BlockSpec((hd, E), lambda i, g: (g, 0))         # per-group rows
    bo_spec = pl.BlockSpec((1, E), lambda i, g: (0, 0))
    out_spec = pl.BlockSpec((block_b, T, E), lambda i, g: (i, 0, 0))

    cost = pl.CostEstimate(
        flops=int(8 * B * T * E * E + 4 * B * T * T * E),
        transcendentals=int(B * num_heads * T * T),
        bytes_accessed=int((2 * B * T * E + grid_b * 4 * (E * E + E)) * dsize),
    )

    kernel = functools.partial(_mha_kernel, head_dim=head_dim)

    return pl.pallas_call(
        kernel,
        out_shape=jax.ShapeDtypeStruct((B, T, E), dtype),
        grid_spec=pltpu.PrefetchScalarGridSpec(
            num_scalar_prefetch=0,
            grid=(grid_b, num_groups),            # reduction (head-group) axis last
            in_specs=[x_spec, wqkv_spec, bqkv_spec, wo_spec, bo_spec],
            out_specs=out_spec,
            scratch_shapes=[pltpu.VMEM((block_b * T, E), jnp.float32)],
        ),
        compiler_params=pltpu.CompilerParams(
            dimension_semantics=("parallel", "arbitrary"),
            vmem_limit_bytes=vmem_limit,
        ),
        cost_estimate=cost,
    )(hidden_states, wqkv, bqkv, wo, bo)


# ---------------------------------------------------------------------------
# Parameter preparation (one-time, outside the kernel)
# ---------------------------------------------------------------------------
def prepare_params(torch_params, *, num_heads, heads_per_step=None, dtype=None):
    """One-time transform of PyTorch-layout params for the kernel.

    - transposes W (E_out, E_in) -> (E_in, E_out), reshapes biases to (1, E)
    - folds the 1/sqrt(head_dim) query scaling into wq/bq
    - packs wq|wk|wv (and biases) per head-group into a single fused (E, 3*E)
      matrix so each grid step does ONE projection matmul
    - optionally casts everything to `dtype` (pass jnp.bfloat16 for the fast
      bf16 MXU path on v5e/v6e/v7x; softmax/accumulation stay f32 in-kernel).
    """
    (wq, bq), (wk, bk), (wv, bv), (wo, bo) = torch_params
    E = wq.shape[0]
    if E % num_heads:
        raise ValueError("embed_dim must be divisible by num_heads")
    head_dim = E // num_heads
    if heads_per_step is None:
        heads_per_step = _pick_heads_per_step(num_heads, head_dim)
    hs = heads_per_step
    if num_heads % hs:
        raise ValueError("heads_per_step must divide num_heads")
    num_groups = num_heads // hs
    hd = hs * head_dim
    scaling = float(head_dim) ** -0.5
    if dtype is None:
        dtype = wq.dtype

    def prep_w(w, scale=1.0):                    # (E_out, E_in) -> (E_in, E_out)
        return (w.T * scale).astype(dtype)

    def prep_b(b, scale=1.0):
        return (b * scale).reshape(1, -1).astype(dtype)

    wq_t, bq_t = prep_w(wq, scaling), prep_b(bq, scaling)
    wk_t, bk_t = prep_w(wk), prep_b(bk)
    wv_t, bv_t = prep_w(wv), prep_b(bv)
    wo_t, bo_t = prep_w(wo), prep_b(bo)

    # Fused QKV layout: for head-group g, columns [g*3*hd:(g+1)*3*hd] are
    # [Wq_g | Wk_g | Wv_g], each (E, hs*head_dim).
    def group_w(w):                              # (E, E) -> (E, G, hd)
        return w.reshape(E, num_groups, hd)

    def group_b(b):                              # (1, E) -> (G, hd)
        return b.reshape(num_groups, hd)

    wqkv = jnp.stack([group_w(wq_t), group_w(wk_t), group_w(wv_t)], axis=2)
    wqkv = wqkv.reshape(E, 3 * E)
    bqkv = jnp.stack([group_b(bq_t), group_b(bk_t), group_b(bv_t)], axis=1)
    bqkv = bqkv.reshape(1, 3 * E)

    return dict(wqkv=wqkv, bqkv=bqkv, wo=wo_t, bo=bo_t, heads_per_step=hs)


def make_params(key, embed_dim):
    """Synthetic nn.Linear(E, E) params in PyTorch layout: W (E_out, E_in), b (E,)."""
    keys = jax.random.split(key, 8)
    bound = float(embed_dim) ** -0.5

    def lin(kw, kb):
        w = jax.random.uniform(kw, (embed_dim, embed_dim), jnp.float32, -bound, bound)
        b = jax.random.uniform(kb, (embed_dim,), jnp.float32, -bound, bound)
        return w, b

    return (lin(keys[0], keys[1]), lin(keys[2], keys[3]),
            lin(keys[4], keys[5]), lin(keys[6], keys[7]))


def _reference(hidden_states, torch_params, *, num_heads):
    """Pure-JAX reference reproducing the PyTorch forward (mode='self', eval)."""
    (wq, bq), (wk, bk), (wv, bv), (wo, bo) = torch_params
    B, T, E = hidden_states.shape
    Dh = E // num_heads
    scaling = float(Dh) ** -0.5
    x = hidden_states.astype(jnp.float32)

    q = (x @ wq.T + bq) * scaling
    k = x @ wk.T + bk
    v = x @ wv.T + bv

    def shape(t):  # (B, T, E) -> (B, H, T, Dh)
        return t.reshape(B, T, num_heads, Dh).transpose(0, 2, 1, 3)

    q, k, v = shape(q), shape(k), shape(v)
    s = jnp.einsum("bhtd,bhsd->bhts", q, k)
    p = jax.nn.softmax(s, axis=-1)
    o = jnp.einsum("bhts,bhsd->bhtd", p, v)
    o = o.transpose(0, 2, 1, 3).reshape(B, T, E)
    return o @ wo.T + bo


if __name__ == "__main__":
    # Layout-friendly small shapes: E multiple of 128, head_dim = 128 (so the
    # kernel fuses 2 heads/step -> N=K=256 matmuls), T multiple of 8.
    B, T, E, H = 2, 128, 512, 4

    key = jax.random.PRNGKey(0)
    k_x, k_p = jax.random.split(key)
    hidden_states = jax.random.normal(k_x, (B, T, E), jnp.float32)

    torch_params = make_params(k_p, E)                    # PyTorch-layout params
    ref = _reference(hidden_states, torch_params, num_heads=H)

    # f32 path (tight check).
    params_f32 = prepare_params(torch_params, num_heads=H)
    out_f32 = jax.block_until_ready(
        multi_head_attention(hidden_states, params_f32, num_heads=H))
    assert out_f32.shape == (B, T, E)
    assert jnp.allclose(out_f32, ref.astype(out_f32.dtype), atol=2e-3, rtol=2e-3), \
        "f32 kernel mismatch vs reference"

    # bf16 path (fast MXU path on v5e/v6e/v7x; f32 softmax/acc -> loose check).
    params_bf16 = prepare_params(torch_params, num_heads=H, dtype=jnp.bfloat16)
    out_bf16 = jax.block_until_ready(
        multi_head_attention(hidden_states.astype(jnp.bfloat16), params_bf16,
                             num_heads=H))
    assert out_bf16.shape == (B, T, E)
    assert jnp.allclose(out_bf16.astype(jnp.float32), ref, atol=5e-2, rtol=5e-2), \
        "bf16 kernel mismatch vs reference"

    # TODO(synk): 'cross'/'selfdoc' modes only change which tensors feed q/k/v;
    # the same kernel applies with different inputs, so only 'self' is wired up.
    # TODO(synk): dropout with p>0 (training) would need pltpu.prng_* in-kernel;
    # the module defaults to p=0.0, which is an exact no-op here.
    print("KERNEL_OK")
</pallas_src>

<mosaic_0001>
module attributes {stable_mosaic.version = 11 : i64} {
  func.func @_mha_kernel(%arg0: i32, %arg1: i32, %arg2: memref<1x128x512xf32, #tpu.memory_space<vmem>>, %arg3: memref<512x768xf32, #tpu.memory_space<vmem>>, %arg4: memref<1x768xf32, #tpu.memory_space<vmem>>, %arg5: memref<256x512xf32, #tpu.memory_space<vmem>>, %arg6: memref<1x512xf32, #tpu.memory_space<vmem>>, %arg7: memref<1x128x512xf32, #tpu.memory_space<vmem>>, %arg8: memref<128x512xf32, #tpu.memory_space<vmem>>) attributes {dimension_semantics = [#tpu.dimension_semantics<parallel>, #tpu.dimension_semantics<arbitrary>], iteration_bounds = array<i64: 2, 2>, scalar_prefetch = 0 : i64, scratch_operands = 1 : i64, tpu.core_type = #tpu.core_type<tc>, window_params = [{transform_indices = @transform_0, window_bounds = array<i64: 1, 128, 512>}, {transform_indices = @transform_1, window_bounds = array<i64: 512, 768>}, {transform_indices = @transform_2, window_bounds = array<i64: 1, 768>}, {transform_indices = @transform_3, window_bounds = array<i64: 256, 512>}, {pipeline_mode = #tpu.pipeline_mode<synchronous>, transform_indices = @transform_4, window_bounds = array<i64: 1, 512>}, {transform_indices = @transform_5, window_bounds = array<i64: 1, 128, 512>}]} {
    %c0 = arith.constant 0 : index
    %c0_0 = arith.constant 0 : index
    %c0_1 = arith.constant 0 : index
    %0 = vector.load %arg2[%c0, %c0_0, %c0_1] : memref<1x128x512xf32, #tpu.memory_space<vmem>>, vector<1x128x512xf32>
    %1 = vector.shape_cast %0 : vector<1x128x512xf32> to vector<128x512xf32>
    %c0_i32 = arith.constant 0 : i32
    %2 = arith.cmpi eq, %arg1, %c0_i32 : i32
    %3 = arith.extui %2 : i1 to i32
    %c0_i32_2 = arith.constant 0 : i32
    %4 = arith.cmpi ne, %3, %c0_i32_2 : i32
    scf.if %4 {
      %cst_23 = arith.constant 0.000000e+00 : f32
      %56 = vector.broadcast %cst_23 : f32 to vector<128x512xf32>
      %c0_24 = arith.constant 0 : index
      %c0_25 = arith.constant 0 : index
      %57 = vector.load %arg8[%c0_24, %c0_25] : memref<128x512xf32, #tpu.memory_space<vmem>>, vector<128x512xf32>
      tpu.vector_store %arg8[%c0_24, %c0_25], %56 {strides = array<i32>} : memref<128x512xf32, #tpu.memory_space<vmem>>, vector<128x512xf32>,
    } else {
    }
    %c0_3 = arith.constant 0 : index
    %c0_4 = arith.constant 0 : index
    %5 = vector.load %arg3[%c0_3, %c0_4] : memref<512x768xf32, #tpu.memory_space<vmem>>, vector<512x768xf32>
    %cst = arith.constant dense<0.000000e+00> : vector<128x768xf32>
    %6 = tpu.matmul %1, %5, %cst {dimension_numbers = #tpu.dot_dimension_numbers<[1], [0], [0], [1], [0, 0, 1, 1], [], []>} : vector<128x512xf32>, vector<512x768xf32>, vector<128x768xf32> -> vector<128x768xf32>
    %c0_5 = arith.constant 0 : index
    %c0_6 = arith.constant 0 : index
    %7 = vector.load %arg4[%c0_5, %c0_6] : memref<1x768xf32, #tpu.memory_space<vmem>>, vector<1x768xf32>
    %8 = vector.broadcast %7 : vector<1x768xf32> to vector<128x768xf32>
    %9 = arith.addf %6, %8 : vector<128x768xf32>
    %10 = vector.extract_strided_slice %9 {offsets = [0, 0], sizes = [128, 256], strides = [1, 1]} : vector<128x768xf32> to vector<128x256xf32>
    %11 = vector.shape_cast %10 : vector<128x256xf32> to vector<1x128x256xf32>
    %12 = vector.extract_strided_slice %9 {offsets = [0, 256], sizes = [128, 256], strides = [1, 1]} : vector<128x768xf32> to vector<128x256xf32>
    %13 = vector.shape_cast %12 : vector<128x256xf32> to vector<1x128x256xf32>
    %14 = vector.extract_strided_slice %9 {offsets = [0, 512], sizes = [128, 256], strides = [1, 1]} : vector<128x768xf32> to vector<128x256xf32>
    %15 = vector.shape_cast %14 : vector<128x256xf32> to vector<1x128x256xf32>
    %16 = vector.extract_strided_slice %11 {offsets = [0, 0, 0], sizes = [1, 128, 128], strides = [1, 1, 1]} : vector<1x128x256xf32> to vector<1x128x128xf32>
    %17 = vector.extract_strided_slice %13 {offsets = [0, 0, 0], sizes = [1, 128, 128], strides = [1, 1, 1]} : vector<1x128x256xf32> to vector<1x128x128xf32>
    %18 = vector.extract_strided_slice %15 {offsets = [0, 0, 0], sizes = [1, 128, 128], strides = [1, 1, 1]} : vector<1x128x256xf32> to vector<1x128x128xf32>
    "tpu.trace_start"() <{level = 10 : i32, message = "bqd,bkd->bqk"}> : () -> ()
    %cst_7 = arith.constant dense<0.000000e+00> : vector<1x128x128xf32>
    %19 = tpu.matmul %16, %17, %cst_7 {dimension_numbers = #tpu.dot_dimension_numbers<[2], [2], [1], [1], [0, 0, 0, 1, 1, 1], [0], [0]>} : vector<1x128x128xf32>, vector<1x128x128xf32>, vector<1x128x128xf32> -> vector<1x128x128xf32>
    "tpu.trace_stop"() : () -> ()
    %cst_8 = arith.constant dense<0xFF800000> : vector<1x128xf32>
    %20 = vector.multi_reduction <maximumf>, %19, %cst_8 [2] : vector<1x128x128xf32> to vector<1x128xf32>
    %21 = vector.shape_cast %20 : vector<1x128xf32> to vector<1x128x1xf32>
    %22 = vector.broadcast %21 : vector<1x128x1xf32> to vector<1x128x128xf32>
    %23 = arith.subf %19, %22 : vector<1x128x128xf32>
    %24 = math.exp %23 : vector<1x128x128xf32>
    %cst_9 = arith.constant dense<0.000000e+00> : vector<1x128xf32>
    %25 = vector.multi_reduction <add>, %24, %cst_9 [2] : vector<1x128x128xf32> to vector<1x128xf32>
    %26 = vector.shape_cast %25 : vector<1x128xf32> to vector<1x128x1xf32>
    %27 = tpu.reciprocal %26 {approx = true} : vector<1x128x1xf32> -> vector<1x128x1xf32>
    %28 = vector.broadcast %27 : vector<1x128x1xf32> to vector<1x128x128xf32>
    %29 = arith.mulf %24, %28 : vector<1x128x128xf32>
    "tpu.trace_start"() <{level = 10 : i32, message = "bqk,bkd->bqd"}> : () -> ()
    %cst_10 = arith.constant dense<0.000000e+00> : vector<1x128x128xf32>
    %30 = tpu.matmul %29, %18, %cst_10 {dimension_numbers = #tpu.dot_dimension_numbers<[2], [1], [1], [2], [0, 0, 0, 1, 1, 2], [0], [0]>} : vector<1x128x128xf32>, vector<1x128x128xf32>, vector<1x128x128xf32> -> vector<1x128x128xf32>
    "tpu.trace_stop"() : () -> ()
    %31 = vector.extract_strided_slice %11 {offsets = [0, 0, 128], sizes = [1, 128, 128], strides = [1, 1, 1]} : vector<1x128x256xf32> to vector<1x128x128xf32>
    %32 = vector.extract_strided_slice %13 {offsets = [0, 0, 128], sizes = [1, 128, 128], strides = [1, 1, 1]} : vector<1x128x256xf32> to vector<1x128x128xf32>
    %33 = vector.extract_strided_slice %15 {offsets = [0, 0, 128], sizes = [1, 128, 128], strides = [1, 1, 1]} : vector<1x128x256xf32> to vector<1x128x128xf32>
    "tpu.trace_start"() <{level = 10 : i32, message = "bqd,bkd->bqk"}> : () -> ()
    %cst_11 = arith.constant dense<0.000000e+00> : vector<1x128x128xf32>
    %34 = tpu.matmul %31, %32, %cst_11 {dimension_numbers = #tpu.dot_dimension_numbers<[2], [2], [1], [1], [0, 0, 0, 1, 1, 1], [0], [0]>} : vector<1x128x128xf32>, vector<1x128x128xf32>, vector<1x128x128xf32> -> vector<1x128x128xf32>
    "tpu.trace_stop"() : () -> ()
    %cst_12 = arith.constant dense<0xFF800000> : vector<1x128xf32>
    %35 = vector.multi_reduction <maximumf>, %34, %cst_12 [2] : vector<1x128x128xf32> to vector<1x128xf32>
    %36 = vector.shape_cast %35 : vector<1x128xf32> to vector<1x128x1xf32>
    %37 = vector.broadcast %36 : vector<1x128x1xf32> to vector<1x128x128xf32>
    %38 = arith.subf %34, %37 : vector<1x128x128xf32>
    %39 = math.exp %38 : vector<1x128x128xf32>
    %cst_13 = arith.constant dense<0.000000e+00> : vector<1x128xf32>
    %40 = vector.multi_reduction <add>, %39, %cst_13 [2] : vector<1x128x128xf32> to vector<1x128xf32>
    %41 = vector.shape_cast %40 : vector<1x128xf32> to vector<1x128x1xf32>
    %42 = tpu.reciprocal %41 {approx = true} : vector<1x128x1xf32> -> vector<1x128x1xf32>
    %43 = vector.broadcast %42 : vector<1x128x1xf32> to vector<1x128x128xf32>
    %44 = arith.mulf %39, %43 : vector<1x128x128xf32>
    "tpu.trace_start"() <{level = 10 : i32, message = "bqk,bkd->bqd"}> : () -> ()
    %cst_14 = arith.constant dense<0.000000e+00> : vector<1x128x128xf32>
    %45 = tpu.matmul %44, %33, %cst_14 {dimension_numbers = #tpu.dot_dimension_numbers<[2], [1], [1], [2], [0, 0, 0, 1, 1, 2], [0], [0]>} : vector<1x128x128xf32>, vector<1x128x128xf32>, vector<1x128x128xf32> -> vector<1x128x128xf32>
    "tpu.trace_stop"() : () -> ()
    %46 = tpu.concatenate %30, %45 in 2 : vector<1x128x128xf32>, vector<1x128x128xf32> -> vector<1x128x256xf32>
    %47 = vector.shape_cast %46 : vector<1x128x256xf32> to vector<128x256xf32>
    %c0_15 = arith.constant 0 : index
    %c0_16 = arith.constant 0 : index
    %48 = vector.load %arg8[%c0_15, %c0_16] : memref<128x512xf32, #tpu.memory_space<vmem>>, vector<128x512xf32>
    %c0_17 = arith.constant 0 : index
    %c0_18 = arith.constant 0 : index
    %49 = vector.load %arg5[%c0_17, %c0_18] : memref<256x512xf32, #tpu.memory_space<vmem>>, vector<256x512xf32>
    %cst_19 = arith.constant dense<0.000000e+00> : vector<128x512xf32>
    %50 = tpu.matmul %47, %49, %cst_19 {dimension_numbers = #tpu.dot_dimension_numbers<[1], [0], [0], [1], [0, 0, 1, 1], [], []>} : vector<128x256xf32>, vector<256x512xf32>, vector<128x512xf32> -> vector<128x512xf32>
    %51 = arith.addf %48, %50 : vector<128x512xf32>
    %c0_20 = arith.constant 0 : index
    %c0_21 = arith.constant 0 : index
    %52 = vector.load %arg8[%c0_20, %c0_21] : memref<128x512xf32, #tpu.memory_space<vmem>>, vector<128x512xf32>
    tpu.vector_store %arg8[%c0_20, %c0_21], %51 {strides = array<i32>} : memref<128x512xf32, #tpu.memory_space<vmem>>, vector<128x512xf32>,
    %c1_i32 = arith.constant 1 : i32
    %53 = arith.cmpi eq, %arg1, %c1_i32 : i32
    %54 = arith.extui %53 : i1 to i32
    %c0_i32_22 = arith.constant 0 : i32
    %55 = arith.cmpi ne, %54, %c0_i32_22 : i32
    scf.if %55 {
      %c0_23 = arith.constant 0 : index
      %c0_24 = arith.constant 0 : index
      %56 = vector.load %arg8[%c0_23, %c0_24] : memref<128x512xf32, #tpu.memory_space<vmem>>, vector<128x512xf32>
      %c0_25 = arith.constant 0 : index
      %c0_26 = arith.constant 0 : index
      %57 = vector.load %arg6[%c0_25, %c0_26] : memref<1x512xf32, #tpu.memory_space<vmem>>, vector<1x512xf32>
      %58 = vector.broadcast %57 : vector<1x512xf32> to vector<128x512xf32>
      %59 = arith.addf %56, %58 : vector<128x512xf32>
      %60 = vector.shape_cast %59 : vector<128x512xf32> to vector<1x128x512xf32>
      %c0_27 = arith.constant 0 : index
      %c0_28 = arith.constant 0 : index
      %c0_29 = arith.constant 0 : index
      %61 = vector.load %arg7[%c0_27, %c0_28, %c0_29] : memref<1x128x512xf32, #tpu.memory_space<vmem>>, vector<1x128x512xf32>
      tpu.vector_store %arg7[%c0_27, %c0_28, %c0_29], %60 {strides = array<i32>} : memref<1x128x512xf32, #tpu.memory_space<vmem>>, vector<1x128x512xf32>,
    } else {
    }
    return
  }
  func.func @transform_0(%arg0: i32, %arg1: i32) -> (i32, i32, i32) {
    %c0_i32 = arith.constant 0 : i32
    %c0_i32_0 = arith.constant 0 : i32
    %c0_i32_1 = arith.constant 0 : i32
    return %arg0, %c0_i32, %c0_i32_0 : i32, i32, i32
  }
  func.func @transform_1(%arg0: i32, %arg1: i32) -> (i32, i32) {
    %c0_i32 = arith.constant 0 : i32
    %c0_i32_0 = arith.constant 0 : i32
    return %c0_i32, %arg1 : i32, i32
  }
  func.func @transform_2(%arg0: i32, %arg1: i32) -> (i32, i32) {
    %c0_i32 = arith.constant 0 : i32
    %c0_i32_0 = arith.constant 0 : i32
    return %c0_i32, %arg1 : i32, i32
  }
  func.func @transform_3(%arg0: i32, %arg1: i32) -> (i32, i32) {
    %c0_i32 = arith.constant 0 : i32
    %c0_i32_0 = arith.constant 0 : i32
    return %arg1, %c0_i32 : i32, i32
  }
  func.func @transform_4(%arg0: i32, %arg1: i32) -> (i32, i32) {
    %c0_i32 = arith.constant 0 : i32
    %c0_i32_0 = arith.constant 0 : i32
    %c0_i32_1 = arith.constant 0 : i32
    return %c0_i32, %c0_i32_0 : i32, i32
  }
  func.func @transform_5(%arg0: i32, %arg1: i32) -> (i32, i32, i32) {
    %c0_i32 = arith.constant 0 : i32
    %c0_i32_0 = arith.constant 0 : i32
    %c0_i32_1 = arith.constant 0 : i32
    return %arg0, %c0_i32, %c0_i32_0 : i32, i32, i32
  }
}

</mosaic_0001>

<bundles_post_ra>
// kernel: tpu_custom_call.1
= control target key start
LH: loop header
LB: loop body
LE: loop exit
PB: predicated region body
PF: predicated region fallthrough
CT: control target
= control target key end

     0   :  { %s7802_s0 = inlined_call_operand.hbm [shape: f32[2,128,512], index: 0, kind: input, shape index: {}]   ;;  %s7803_s1 = inlined_call_operand.hbm [shape: f32[512,1536], index: 1, kind: input, shape index: {}]   ;;  %s7804_s2 = inlined_call_operand.hbm [shape: f32[1,1536], index: 2, kind: input, shape index: {}]   ;;  %s7805_s3 = inlined_call_operand.hbm [shape: f32[512,512], index: 3, kind: input, shape index: {}]   ;;  %s7806_s4 = inlined_call_operand.hbm [shape: f32[1,512], index: 4, kind: input, shape index: {}]   ;;  %s7807_s5 = inlined_call_operand.hbm [shape: f32[2,128,512], index: 5, kind: output, shape index: {}]  }
   0x1   :  { %7861 = sst [smem:[#allocation50_spill]] %s7802_s0 }
   0x2   :  { %7862 = sst [smem:[#allocation51_spill]] %s7803_s1 }
   0x3   :  { %7863 = sst [smem:[#allocation52_spill]] %s7806_s4 }
   0x4   :  { %7864 = sst [smem:[#allocation53_spill]] %s7807_s5 }
   0x5   :  { %10 = vsyncpa [#allocation4], 0 }
   0x6   :  { %12 = vsyncpa [#allocation4 + $0x1], 0 }
   0x7   :  { %13 = vsyncpa [#allocation7], 0 }
   0x8   :  { %15 = vsyncpa [#allocation7 + $0x1], 0 }
   0x9   :  { %16 = vsyncpa [#allocation10], 0 }
   0xa   :  { %18 = vsyncpa [#allocation10 + $0x1], 0 }
   0xb   :  { %19 = vsyncpa [#allocation5], 0 }
   0xc   :  { %21 = vsyncpa [#allocation5 + $0x1], 0  ;;  %s5645_s18 = smov 0   ;;  %s5647_s19 = smov 0  }
   0xd   :  { %s5649_s20 = smov 0   ;;  %s5651_s21 = smov 0  }
   0xe   :  { %s5653_s22 = smov 0   ;;  %s5655_s23 = smov 0  }
   0xf   :  { %s5657_s24 = smov 0   ;;  %s5659_s25 = smov 0  }
  0x10   :  { %s5661_s26 = smov 0   ;;  %s5663_s27 = smov 0  }
  0x11   :  { %s5665_s28 = smov 0  }
  0x12 LB: > { %7865 = sst [smem:[#allocation18_spill]] %s5563_s19  ;;  %s5699_s29 = sadd.s32 4294967295, %s5599_s28   ;;  %s5599_s28 = sphi %s5665_s28, %s27_s28   ;;  %s5595_s27 = sphi %s5663_s27, %s7972_s27   ;;  %s5591_s26 = sphi %s5661_s26, %s7979_s26   ;;  %s5587_s25 = sphi %s5659_s25, %s7970_s25   ;;  %s5583_s24 = sphi %s5657_s24, %s7978_s24   ;;  %s5579_s23 = sphi %s5655_s23, %s7977_s23   ;;  %s5575_s22 = sphi %s5653_s22, %s7976_s22   ;;  %s5571_s21 = sphi %s5651_s21, %s7975_s21   ;;  %s5567_s20 = sphi %s5649_s20, %s7974_s20   ;;  %s5563_s19 = sphi %s5647_s19, %s7973_s19   ;;  %s5559_s18 = sphi %s5645_s18, %s7969_s18  }
  0x13   : > { %7866 = sst [smem:[#allocation19_spill]] %s5571_s21  ;;  %s3802_s30 = sadd.s32 4294967294, %s5599_s28  }
  0x14   : > { %7867 = sst [smem:[#allocation20_spill]] %s5583_s24  ;;  %p53_p0 = scmp.ne.s32.totalorder %s5579_s23, %s5575_s22 }
  0x15   : > { %7868 = sst [smem:[#allocation21_spill]] %s5587_s25  ;;  %p54_p1 = scmp.eq.s32.totalorder %s5599_s28, 0 }
  0x16   : > { %7869 = sst [smem:[#allocation22_spill]] %s5595_s27  ;;  %p59_p2 = scmp.ne.s32.totalorder %s5575_s22, %s5571_s21 }
  0x17   : > { %p7811_p3 = scmp.eq.s32.totalorder %s5699_s29, 0  ;;  %p5713_p4 = por %p54_p1, %p53_p0 }
  0x18   : > { %p79_p5 = scmp.ne.s32.totalorder %s5567_s20, %s5563_s19  ;;  %p85_p7 = scmp.ne.s32.totalorder %s5563_s19, %s5559_s18 }
  0x19   : > { %s7870_s8 = scalar_select %p5713_p4, 1, 0 }
  0x1a   : > { %p5724_p6 = por %p7811_p3, %p59_p2  ;;  %p5729_p8 = por %p79_p5, %p54_p1 }
  0x1b   : > { %p182_p9 = scmp.eq.s32.totalorder %s5699_s29, 3  ;;  %p5736_p10 = por %p85_p7, %p7811_p3 }
  0x1c   : > { %s7871_s9 = scalar_select %p5724_p6, 1, 0 }
  0x1d   : > { %s7873_s11 = scalar_select %p5736_p10, 1, 0 }
  0x1e   : > { %p188_p11 = scmp.eq.s32.totalorder %s3802_s30, 3  ;;  %p5743_p12 = por %p182_p9, %p53_p0 }
  0x1f   : > { %7874 = sst [smem:[#allocation23_spill]] %s7873_s11  ;;  %p3803_p13 = scmp.ge.s32.totalorder %s5599_s28, 1 }
  0x20   : > { %s7875_s12 = scalar_select %p5743_p12, 1, 0 }
  0x21   : > { %p5751_p1 = por %p188_p11, %p59_p2  ;;  %p195_p5 = scmp.lt.s32.totalorder %s5599_s28, 5 }
  0x22   : > { %7876 = sst [smem:[#allocation24_spill]] %s7875_s12  ;;  %s5601_s15 = smov [#allocation11]  }
  0x23   : > { %s7877_s13 = scalar_select %p5751_p1, 1, 0 }
  0x24   : > { %p5756_p6 = pnand %p3803_p13, %p195_p5  ;;  %s208_s16 = sshll.u32 %s5601_s15, 4  ;;  %s209_s16 = int_to_ptr.vmem [resolvable:$true] %s208_s16 }
  0x25   : > { %7878 = sst [smem:[#allocation25_spill]] %s7877_s13  ;;  %p7813_p7 = scmp.lt.s32.totalorder %s5599_s28, 4 }
  0x26   : > { %s7879_s14 = scalar_select %p5756_p6, 1, 0 }
  0x27   : > { %p5067_p0 = pneg %p5756_p6  ;;  %p5774_p2 = pnand %p7813_p7, %p5729_p8 }
  0x28   : > { %s7882_s4 = sld [smem:[#allocation52_spill]] }
  0x29   : > { %p5766_p9 = pnand %p5067_p0, %p7811_p3 }
  0x2a   : > { %s7881_s30 = scalar_select %p5774_p2, 1, 0 }
  0x2b   : > { %p5319_p13 = pneg %p5766_p9 }
  0x2e   : > { %s5317_s15 = scalar_lea.hbm %s7882_s4, 64 }
  0x2f   : > { %p5318_p11 = scmp.ne.s32.totalorder %s7882_s4, %s5317_s15  ;;  %p5324_p3 = scmp.lt.u32.totalorder %s5317_s15, %s7882_s4 }
  0x31   : > { %p5320_p5 = pnand %p5319_p13, %p5318_p11 }
  0x33   : > { %p5321_p0 = pneg %p5320_p5 }
  0x35   : > { %p5326_p8 = pnand %p5324_p3, %p5321_p0 }
  0x37   : > { %5329 = shalt.err (!%p5326_p8)
}
  0x38   : > { %s5330_s5 = scalar_lea.vmem %s209_s16, 64  ;;  %p5338_p10 = scmp.lt.s32.totalorder %s209_s16, %s209_s16 }
  0x39   : > { %p5331_p7 = scmp.ne.s32.totalorder %s209_s16, %s5330_s5  ;;  %p5339_p6 = scmp.lt.s32.totalorder %s5330_s5, %s5330_s5 }
  0x3b   : > { %p5333_p1 = pnand %p5331_p7, %p5319_p13  ;;  %p5340_p4 = por %p5339_p6, %p5338_p10 }
  0x3d   : > { %p5334_p12 = pneg %p5333_p1 }
  0x3f   : > { %p5341_p2 = pnand %p5340_p4, %p5334_p12 }
  0x41   : > { %5344 = shalt.err (!%p5341_p2)
}
  0x42   : > { %5070 = dma.hbm_to_vmem [thread:$0]  (!%p5766_p9), %s7882_s4, 64, %s209_s16, [#allocation10]  }
  0x43   : > { %s5795_s7 = sand.u32 1, %s5567_s20   ;;  %s3828_s13 = smul.u32 768, %s5591_s26 }
  0x44   : > { %s5049_s17 = smul.u32 3072, %s5795_s7  ;;  %s7883_s1 = sld [smem:[#allocation51_spill]] }
  0x45   : > { %s7884_s6 = sand.u32 1, %s5599_s28   ;;  %p7885_p4 = scmp.ne.s32.totalorder %s7881_s30, 0 }
  0x46   : > { %s244_s18 = scalar_lea.vmem [#allocation6], %s5049_s17  ;;  %s5808_s16 = scalar_lea.sflag [#allocation7], %s7884_s6 }
  0x47   : > { %s251_s21 = sshll.u32 %s244_s18, 4  ;;  %p5814_p6 = pneg %p7885_p4  ;;  %s5804_s21 = int_to_ptr.vmem [resolvable:$true] %s251_s21 }
  0x4a   : > { %s5802_s10 = scalar_lea.hbm %s7883_s1, %s3828_s13  ;;  %s5350_s17 = scalar_lea.hbm %s7883_s1, 98304 }
  0x4b   : > { %s5345_s4 = scalar_lea.hbm %s5802_s10, 49152  ;;  %p5351_p1 = scmp.lt.u32.totalorder %s5802_s10, %s7883_s1 }
  0x4c   : > { %p5346_p3 = scmp.ne.s32.totalorder %s5802_s10, %s5345_s4  ;;  %p5352_p7 = scmp.lt.u32.totalorder %s5350_s17, %s5345_s4 }
  0x4d   : > { %p5354_p2 = scmp.lt.u32.totalorder %s5345_s4, %s5802_s10 }
  0x4e   : > { %p5348_p10 = pnand %p5814_p6, %p5346_p3  ;;  %p5353_p9 = por %p5352_p7, %p5351_p1 }
  0x50   : > { %p5349_p12 = pneg %p5348_p10  ;;  %p5355_p11 = por %p5354_p2, %p5353_p9 }
  0x52   : > { %p5356_p13 = pnand %p5355_p11, %p5349_p12 }
  0x54   : > { %5359 = shalt.err (!%p5356_p13)
}
  0x55   : > { %s5360_s6 = scalar_lea.vmem %s5804_s21, 49152  ;;  %s5602_s13 = smov [#allocation6]  }
  0x56   : > { %p5361_p5 = scmp.ne.s32.totalorder %s5804_s21, %s5360_s6  ;;  %s5365_s15 = sshll.u32 %s5602_s13, 4  ;;  %s5366_s15 = int_to_ptr.vmem [resolvable:$false] %s5365_s15 }
  0x57   : > { %s5367_s5 = scalar_lea.vmem %s5366_s15, 98304  ;;  %p5368_p3 = scmp.lt.s32.totalorder %s5804_s21, %s5366_s15 }
  0x58   : > { %p5363_p0 = pnand %p5361_p5, %p5814_p6  ;;  %p5369_p10 = scmp.lt.s32.totalorder %s5367_s5, %s5360_s6 }
  0x5a   : > { %p5364_p8 = pneg %p5363_p0  ;;  %p5370_p1 = por %p5369_p10, %p5368_p3 }
  0x5c   : > { %p5371_p7 = pnand %p5370_p1, %p5364_p8 }
  0x5e   : > { %5374 = shalt.err (!%p5371_p7)
}
  0x5f   : > { %s5603_s4 = smov 1536   ;;  %s5604_s17 = smov 768  }
  0x60   : > { %s5605_s18 = smov 48   ;;  %s36_s6 = sadd.s32 1, %s5591_s26 }
  0x61   : > { %5077 = dma.hbm_to_vmem [thread:$0]  (!%p7885_p4), %s5802_s10, 49152, %s5804_s21, %s5808_s16, %s5603_s4, %s5604_s17, %s5605_s18  }
  0x62   : > { %s39_s13 = sadd.s32 1, %s5595_s27  ;;  %p37_p12 = scmp.ge.s32.totalorder %s36_s6, 2 }
  0x63   : > { %s219_s15 = sand.u32 1, %s5579_s23   ;;  %s3827_s25 = sshll.u32 %s5595_s27, 13 }
  0x64   : > { %s3806_s5 = sshll.u32 %s219_s15, 9  ;;  %s7981_s6 = smov (%p37_p12, %s36_s6), 0 }
  0x65   : > { %7887 = sst [smem:[#allocation26_spill]] %s7981_s6  ;;  %s7983_s13 = smov (!%p37_p12, %s39_s13), %s5595_s27 }
  0x66   : > { %s69_s1 = ssub.s32 %s5591_s26, %s7981_s6  ;;  %p41_p9 = scmp.ge.s32.totalorder %s7983_s13, 2 }
  0x67   : > { %p70_p2 = scmp.eq.s32.totalorder %s69_s1, 0  ;;  %s223_s24 = scalar_lea.vmem [#allocation3], %s3806_s5 }
  0x68   : > { %s230_s10 = sshll.u32 %s223_s24, 4  ;;  %s7985_s13 = smov (%p41_p9, %s7983_s13), 0  ;;  %s5861_s10 = int_to_ptr.vmem [resolvable:$true] %s230_s10 }
  0x69   : > { %7888 = sst [smem:[#allocation27_spill]] %s7985_s13  ;;  %s7889_s21 = sadd.s32 1, %s5567_s20 }
  0x6a   : > { %s5852_s4 = scalar_select %p70_p2, %s5567_s20, %s7889_s21  }
  0x6b   : > { %s43_s17 = ssub.s32 %s5595_s27, %s7985_s13  ;;  %s7890_s0 = sld [smem:[#allocation50_spill]] }
  0x6c   : > { %p44_p11 = scmp.eq.s32.totalorder %s43_s17, 0  ;;  %p7891_p13 = scmp.ne.s32.totalorder %s7870_s8, 0 }
  0x6d   : > { %p7892_p5 = scmp.lt.s32.totalorder %s5599_s28, 4  ;;  %s7894_s24 = sadd.s32 1, %s5579_s23 }
  0x6e   : > { %s5874_s5 = scalar_select %p44_p11, %s5579_s23, %s7894_s24  }
  0x6f   : > { %p5867_p0 = pnand %p7892_p5, %p7891_p13 }
  0x71   : > { %s5859_s19 = scalar_lea.hbm %s7890_s0, %s3827_s25  ;;  %s5876_s25 = scalar_lea.sflag [#allocation4], %s219_s15 }
  0x72   : > { %s5375_s11 = scalar_lea.hbm %s5859_s19, 8192  ;;  %p5377_p3 = pneg %p5867_p0 }
  0x73   : > { %p5376_p8 = scmp.ne.s32.totalorder %s5859_s19, %s5375_s11  ;;  %s5380_s17 = scalar_lea.hbm %s7890_s0, 16384 }
  0x74   : > { %p5381_p7 = scmp.lt.u32.totalorder %s5859_s19, %s7890_s0  ;;  %p5382_p12 = scmp.lt.u32.totalorder %s5380_s17, %s5375_s11 }
  0x75   : > { %p5378_p10 = pnand %p5377_p3, %p5376_p8  ;;  %p5384_p2 = scmp.lt.u32.totalorder %s5375_s11, %s5859_s19 }
  0x76   : > { %p5383_p9 = por %p5382_p12, %p5381_p7 }
  0x77   : > { %p5379_p1 = pneg %p5378_p10 }
  0x78   : > { %p5385_p11 = por %p5384_p2, %p5383_p9 }
  0x7a   : > { %p5386_p13 = pnand %p5385_p11, %p5379_p1 }
  0x7c   : > { %5389 = shalt.err (!%p5386_p13)
}
  0x7d   : > { %s5390_s15 = scalar_lea.vmem %s5861_s10, 8192  ;;  %s5606_s24 = smov [#allocation3]  }
  0x7e   : > { %p5391_p5 = scmp.ne.s32.totalorder %s5861_s10, %s5390_s15  ;;  %s5395_s8 = sshll.u32 %s5606_s24, 4  ;;  %s5396_s8 = int_to_ptr.vmem [resolvable:$false] %s5395_s8 }
  0x7f   : > { %s5397_s13 = scalar_lea.vmem %s5396_s8, 16384  ;;  %p5398_p4 = scmp.lt.s32.totalorder %s5861_s10, %s5396_s8 }
  0x80   : > { %p5393_p8 = pnand %p5391_p5, %p5377_p3  ;;  %p5399_p7 = scmp.lt.s32.totalorder %s5397_s13, %s5390_s15 }
  0x82   : > { %p5394_p10 = pneg %p5393_p8  ;;  %p5400_p12 = por %p5399_p7, %p5398_p4 }
  0x84   : > { %p5401_p9 = pnand %p5400_p12, %p5394_p10 }
  0x86   : > { %5404 = shalt.err (!%p5401_p9)
}
  0x87   : > { %s5607_s11 = smov 512   ;;  %s5608_s21 = smov 32  }
  0x88   : > { %5074 = dma.hbm_to_vmem [thread:$0]  (!%p5867_p0), %s5859_s19, 8192, %s5861_s10, %s5876_s25, %s5607_s11, %s5607_s11, %s5608_s21  }
  0x89   : > { %s5050_s17 = smul.u32 6, %s5795_s7  ;;  %s3811_s15 = sshll.u32 %s5795_s7, 10 }
  0x8a   : > { %s3829_s18 = smul.u32 96, %s5591_s26  ;;  %s3831_s1 = sshll.u32 %s5591_s26, 14 }
  0x8b   : > { %s265_s0 = scalar_lea.vmem [#allocation8], %s5050_s17  ;;  %s5410_s25 = scalar_lea.hbm %s7804_s2, 192 }
  0x8c   : > { %s5913_s13 = scalar_lea.hbm %s7804_s2, %s3829_s18  ;;  %s273_s6 = sshll.u32 %s265_s0, 4  ;;  %s274_s6 = int_to_ptr.vmem [resolvable:$true] %s273_s6 }
  0x8d   : > { %s5405_s27 = scalar_lea.hbm %s5913_s13, 96  ;;  %p5411_p1 = scmp.lt.u32.totalorder %s5913_s13, %s7804_s2 }
  0x8e   : > { %p5406_p4 = scmp.ne.s32.totalorder %s5913_s13, %s5405_s27  ;;  %p5412_p2 = scmp.lt.u32.totalorder %s5410_s25, %s5405_s27 }
  0x8f   : > { %p5414_p13 = scmp.lt.u32.totalorder %s5405_s27, %s5913_s13 }
  0x90   : > { %p5408_p0 = pnand %p5406_p4, %p5814_p6  ;;  %p5413_p11 = por %p5412_p2, %p5411_p1 }
  0x92   : > { %p5409_p3 = pneg %p5408_p0  ;;  %p5415_p5 = por %p5414_p13, %p5413_p11 }
  0x94   : > { %p5416_p8 = pnand %p5415_p5, %p5409_p3 }
  0x96   : > { %5419 = shalt.err (!%p5416_p8)
}
  0x97   : > { %s5420_s0 = scalar_lea.vmem %s274_s6, 96  ;;  %s5609_s17 = smov [#allocation8]  }
  0x98   : > { %p5421_p10 = scmp.ne.s32.totalorder %s274_s6, %s5420_s0  ;;  %s5425_s8 = sshll.u32 %s5609_s17, 4  ;;  %s5426_s8 = int_to_ptr.vmem [resolvable:$false] %s5425_s8 }
  0x99   : > { %s5427_s19 = scalar_lea.vmem %s5426_s8, 192  ;;  %p5428_p9 = scmp.lt.s32.totalorder %s274_s6, %s5426_s8 }
  0x9a   : > { %p5423_p7 = pnand %p5421_p10, %p5814_p6  ;;  %p5429_p4 = scmp.lt.s32.totalorder %s5427_s19, %s5420_s0 }
  0x9c   : > { %p5424_p12 = pneg %p5423_p7  ;;  %p5430_p0 = por %p5429_p4, %p5428_p9 }
  0x9e   : > { %p5431_p1 = pnand %p5430_p0, %p5424_p12 }
  0xa0   : > { %5434 = shalt.err (!%p5431_p1)
}
  0xa1   : > { %p7895_p2 = scmp.ne.s32.totalorder %s7881_s30, 0  ;;  %s5937_s25 = scalar_lea.hbm %s7805_s3, %s3831_s1 }
  0xa2   : > { %s284_s24 = scalar_lea.vmem [#allocation9], %s3811_s15  ;;  %s7896_s0 = sand.u32 1, %s5599_s28  }
  0xa3   : > { %5080 = dma.hbm_to_vmem [thread:$0]  (!%p7895_p2), %s5913_s13, 96, %s274_s6, %s5808_s16  }
  0xa4   : > { %s292_s18 = sshll.u32 %s284_s24, 4  ;;  %s5945_s17 = scalar_lea.sflag [#allocation10], %s7896_s0  ;;  %s5941_s18 = int_to_ptr.vmem [resolvable:$true] %s292_s18 }
  0xa5   : > { %s5435_s8 = scalar_lea.hbm %s5937_s25, 16384  ;;  %s5440_s7 = scalar_lea.hbm %s7805_s3, 32768 }
  0xa6   : > { %p5436_p3 = scmp.ne.s32.totalorder %s5937_s25, %s5435_s8  ;;  %p5441_p5 = scmp.lt.u32.totalorder %s5937_s25, %s7805_s3 }
  0xa7   : > { %p5442_p8 = scmp.lt.u32.totalorder %s5440_s7, %s5435_s8  ;;  %p5444_p7 = scmp.lt.u32.totalorder %s5435_s8, %s5937_s25 }
  0xa8   : > { %p5438_p11 = pnand %p5436_p3, %p5814_p6 }
  0xa9   : > { %p5443_p10 = por %p5442_p8, %p5441_p5 }
  0xaa   : > { %p5439_p13 = pneg %p5438_p11 }
  0xab   : > { %p5445_p12 = por %p5444_p7, %p5443_p10 }
  0xad   : > { %p5446_p9 = pnand %p5445_p12, %p5439_p13 }
  0xaf   : > { %5449 = shalt.err (!%p5446_p9)
}
  0xb0   : > { %s5450_s15 = scalar_lea.vmem %s5941_s18, 16384  ;;  %s5610_s19 = smov [#allocation9]  }
  0xb1   : > { %p5451_p4 = scmp.ne.s32.totalorder %s5941_s18, %s5450_s15  ;;  %s5455_s27 = sshll.u32 %s5610_s19, 4  ;;  %s5456_s27 = int_to_ptr.vmem [resolvable:$false] %s5455_s27 }
  0xb2   : > { %s5457_s10 = scalar_lea.vmem %s5456_s27, 32768  ;;  %p5458_p3 = scmp.lt.s32.totalorder %s5941_s18, %s5456_s27 }
  0xb3   : > { %p5453_p0 = pnand %p5451_p4, %p5814_p6  ;;  %p5459_p11 = scmp.lt.s32.totalorder %s5457_s10, %s5450_s15 }
  0xb5   : > { %p5454_p1 = pneg %p5453_p0  ;;  %p5460_p5 = por %p5459_p11, %p5458_p3 }
  0xb7   : > { %p5461_p8 = pnand %p5460_p5, %p5454_p1 }
  0xb9   : > { %5464 = shalt.err (!%p5461_p8)
}
  0xba   : > { %5083 = dma.hbm_to_vmem [thread:$0]  (!%p7895_p2), %s5937_s25, 16384, %s5941_s18, %s5945_s17, %s5607_s11, %s5607_s11, %s5608_s21  }
  0xbb   : > { %p7897_p6 = scmp.ne.s32.totalorder %s7879_s14, 0 }
  0xbd   : > { %304 = sbr.rel (%p7897_p6) target bundleno = 2354 (0x932), region = 40 }
  0xc4   : > { %s5975_s12 = sand.u32 1, %s5575_s22   ;;  %p7898_p13 = scmp.ne.s32.totalorder %s7871_s9, 0 }
  0xc5   : > { %s3816_s24 = sshll.u32 %s5975_s12, 9  ;;  %s307_s0 = scalar_lea.sflag [#allocation4], %s5975_s12 }
  0xc6   : > { %s5981_s30 = scalar_lea.vmem [#allocation3], %s3816_s24 }
  0xc7   : > { %5538 = dma.done.wait (%p7898_p13), %s307_s0, 8192  }
  0xc8   : > { %5540 = vsyncadd (%p7898_p13), %s307_s0, 4294959104  ;;  %s7899_s14 = sld [smem:[#allocation18_spill]]  ;;  %s7900_s11 = sld [smem:[#allocation23_spill]] }
  0xc9   : > { %s315_s21 = sand.u32 1, %s5699_s29  }
  0xca   : > { %s316_s17 = scalar_lea.sflag [#allocation7], %s315_s21 }
  0xce   : > { %s317_s25 = sand.u32 1, %s7899_s14   ;;  %p7901_p2 = scmp.ne.s32.totalorder %s7900_s11, 0 }
  0xcf   : > { %s5051_s18 = smul.u32 3072, %s317_s25 }
  0xd1   : > { %s5989_s8 = scalar_lea.vmem [#allocation6], %s5051_s18 }
  0xd2   : > { %5542 = dma.done.wait (%p7901_p2), %s316_s17, 49248  }
  0xd3   : > { %5544 = vsyncadd (%p7901_p2), %s316_s17, 4294918048  ;;  %s5052_s16 = smul.u32 6, %s317_s25  ;;  %s3817_s6 = sshll.u32 %s317_s25, 10 }
  0xd4   : > { %s334_s9 = scalar_lea.sflag [#allocation10], %s315_s21  ;;  %s5997_s13 = scalar_lea.vmem [#allocation9], %s3817_s6 }
  0xd5   : > { %s5995_s7 = scalar_lea.vmem [#allocation8], %s5052_s16 }
  0xd6   : > { %5546 = dma.done.wait (%p7901_p2), %s334_s9, 16384  }
  0xd7   : > { %5548 = vsyncadd (%p7901_p2), %s334_s9, 4294950912  ;;  %p7902_p10 = scmp.eq.s32.totalorder %s5699_s29, 0 }
  0xd9   : > { %5550 = dma.done.wait (%p7902_p10), [#allocation10], 64   ;;  %p7903_p7 = pmov %p7902_p10 }
  0xda   : > { %v6008_v0 = vld [vmem:[%s5981_s30] sm:$0xff]  ;;  %v6011_v1 = vld [vmem:[%s5981_s30 + $0x8] sm:$0xff]  ;;  %v6014_v2 = vld [vmem:[%s5981_s30 + $0x10] sm:$0xff]  ;;  %s6201_s29 = scalar_lea.vmem [#allocation12], %s3816_s24  ;;  %s7926_s1 = sld [smem:[#allocation20_spill]] }
  0xdb   : > { %5552 = vsyncadd (%p7903_p7), [#allocation10], 4294967232  ;;  %7904 = vst [vmem:[#allocation28_spill] sm:$0xff] %v6011_v1  ;;  %v6017_v3 = vld [vmem:[%s5981_s30 + $0x18] sm:$0xff]  ;;  %v6020_v4 = vld [vmem:[%s5981_s30 + $0x20] sm:$0xff] }
  0xdc   : > { %v6023_v5 = vld [vmem:[%s5981_s30 + $0x28] sm:$0xff]  ;;  %v6026_v6 = vld [vmem:[%s5981_s30 + $0x30] sm:$0xff]  ;;  %v6029_v7 = vld [vmem:[%s5981_s30 + $0x38] sm:$0xff] }
  0xdd   : > { %v6032_v8 = vld [vmem:[%s5981_s30 + $0x40] sm:$0xff]  ;;  %v6035_v9 = vld [vmem:[%s5981_s30 + $0x48] sm:$0xff]  ;;  %v6038_v10 = vld [vmem:[%s5981_s30 + $0x50] sm:$0xff] }
  0xde   : > { %v6041_v11 = vld [vmem:[%s5981_s30 + $0x58] sm:$0xff]  ;;  %v6044_v12 = vld [vmem:[%s5981_s30 + $0x60] sm:$0xff]  ;;  %v6047_v13 = vld [vmem:[%s5981_s30 + $0x68] sm:$0xff] }
  0xdf   : > { %v6050_v14 = vld [vmem:[%s5981_s30 + $0x70] sm:$0xff]  ;;  %v6053_v15 = vld [vmem:[%s5981_s30 + $0x78] sm:$0xff]  ;;  %v6056_v16 = vld [vmem:[%s5981_s30 + $0x80] sm:$0xff] }
  0xe0   : > { %v6059_v17 = vld [vmem:[%s5981_s30 + $0x88] sm:$0xff]  ;;  %v6062_v18 = vld [vmem:[%s5981_s30 + $0x90] sm:$0xff]  ;;  %v6065_v19 = vld [vmem:[%s5981_s30 + $0x98] sm:$0xff]  ;;  %p3820_p12 = scmp.ne.s32.totalorder %s7926_s1, 0 }
  0xe1   : > { %v6068_v20 = vld [vmem:[%s5981_s30 + $0xa0] sm:$0xff]  ;;  %v6071_v21 = vld [vmem:[%s5981_s30 + $0xa8] sm:$0xff]  ;;  %v6074_v22 = vld [vmem:[%s5981_s30 + $0xb0] sm:$0xff] }
  0xe2   : > { %7905 = vst [vmem:[#allocation29_spill] sm:$0xff] %v6074_v22  ;;  %v6077_v23 = vld [vmem:[%s5981_s30 + $0xb8] sm:$0xff]  ;;  %v6080_v24 = vld [vmem:[%s5981_s30 + $0xc0] sm:$0xff]  ;;  %v6083_v25 = vld [vmem:[%s5981_s30 + $0xc8] sm:$0xff] }
  0xe3   : > { %v6086_v26 = vld [vmem:[%s5981_s30 + $0xd0] sm:$0xff]  ;;  %v6089_v27 = vld [vmem:[%s5981_s30 + $0xd8] sm:$0xff]  ;;  %v6092_v28 = vld [vmem:[%s5981_s30 + $0xe0] sm:$0xff] }
  0xe4   : > { %7906 = vst [vmem:[#allocation30_spill] sm:$0xff] %v6086_v26  ;;  %7907 = vst [vmem:[#allocation31_spill] sm:$0xff] %v6089_v27  ;;  %v6095_v29 = vld [vmem:[%s5981_s30 + $0xe8] sm:$0xff]  ;;  %v6098_v30 = vld [vmem:[%s5981_s30 + $0xf0] sm:$0xff] }
  0xe5   : > { %7908 = vst [vmem:[#allocation32_spill] sm:$0xff] %v6098_v30  ;;  %v6101_v31 = vld [vmem:[%s5981_s30 + $0xf8] sm:$0xff]  ;;  %v6104_v32 = vld [vmem:[%s5981_s30 + $0x100] sm:$0xff]  ;;  %v6107_v33 = vld [vmem:[%s5981_s30 + $0x108] sm:$0xff] }
  0xe6   : > { %7909 = vst [vmem:[#allocation33_spill] sm:$0xff] %v6101_v31  ;;  %v6110_v34 = vld [vmem:[%s5981_s30 + $0x110] sm:$0xff]  ;;  %v6113_v35 = vld [vmem:[%s5981_s30 + $0x118] sm:$0xff]  ;;  %v6116_v36 = vld [vmem:[%s5981_s30 + $0x120] sm:$0xff] }
  0xe7   : > { %7910 = vst [vmem:[#allocation34_spill] sm:$0xff] %v6110_v34  ;;  %7911 = vst [vmem:[#allocation35_spill] sm:$0xff] %v6113_v35  ;;  %v6119_v37 = vld [vmem:[%s5981_s30 + $0x128] sm:$0xff]  ;;  %v6122_v38 = vld [vmem:[%s5981_s30 + $0x130] sm:$0xff] }
  0xe8   : > { %7912 = vst [vmem:[#allocation36_spill] sm:$0xff] %v6122_v38  ;;  %v6125_v39 = vld [vmem:[%s5981_s30 + $0x138] sm:$0xff]  ;;  %v6128_v40 = vld [vmem:[%s5981_s30 + $0x140] sm:$0xff]  ;;  %v6131_v41 = vld [vmem:[%s5981_s30 + $0x148] sm:$0xff] }
  0xe9   : > { %7913 = vst [vmem:[#allocation37_spill] sm:$0xff] %v6125_v39  ;;  %v6134_v42 = vld [vmem:[%s5981_s30 + $0x150] sm:$0xff]  ;;  %v6137_v43 = vld [vmem:[%s5981_s30 + $0x158] sm:$0xff]  ;;  %v6140_v44 = vld [vmem:[%s5981_s30 + $0x160] sm:$0xff] }
  0xea   : > { %7914 = vst [vmem:[#allocation38_spill] sm:$0xff] %v6134_v42  ;;  %7915 = vst [vmem:[#allocation39_spill] sm:$0xff] %v6137_v43  ;;  %v6143_v45 = vld [vmem:[%s5981_s30 + $0x168] sm:$0xff]  ;;  %v6146_v46 = vld [vmem:[%s5981_s30 + $0x170] sm:$0xff] }
  0xeb   : > { %7916 = vst [vmem:[#allocation40_spill] sm:$0xff] %v6146_v46  ;;  %v6149_v47 = vld [vmem:[%s5981_s30 + $0x178] sm:$0xff]  ;;  %v6152_v48 = vld [vmem:[%s5981_s30 + $0x180] sm:$0xff]  ;;  %v6155_v49 = vld [vmem:[%s5981_s30 + $0x188] sm:$0xff] }
  0xec   : > { %7917 = vst [vmem:[#allocation41_spill] sm:$0xff] %v6149_v47  ;;  %v6158_v50 = vld [vmem:[%s5981_s30 + $0x190] sm:$0xff]  ;;  %v6161_v51 = vld [vmem:[%s5981_s30 + $0x198] sm:$0xff]  ;;  %v6164_v52 = vld [vmem:[%s5981_s30 + $0x1a0] sm:$0xff]  ;;  %453 = sbr.rel (%p3820_p12) target bundleno = 274 (0x112), region = 64 }
  0xed   : > { %7918 = vst [vmem:[#allocation42_spill] sm:$0xff] %v6158_v50  ;;  %7919 = vst [vmem:[#allocation43_spill] sm:$0xff] %v6161_v51  ;;  %v6167_v53 = vld [vmem:[%s5981_s30 + $0x1a8] sm:$0xff]  ;;  %v6170_v54 = vld [vmem:[%s5981_s30 + $0x1b0] sm:$0xff] }
  0xee   : > { %7920 = vst [vmem:[#allocation44_spill] sm:$0xff] %v6170_v54  ;;  %v6173_v55 = vld [vmem:[%s5981_s30 + $0x1b8] sm:$0xff]  ;;  %v6176_v56 = vld [vmem:[%s5981_s30 + $0x1c0] sm:$0xff]  ;;  %v6179_v57 = vld [vmem:[%s5981_s30 + $0x1c8] sm:$0xff]  ;;  %v5611_v54 = vmov (!%p3820_p12), 0.0  }
  0xef   : > { %7921 = vst [vmem:[#allocation45_spill] sm:$0xff] %v6173_v55  ;;  %v6182_v58 = vld [vmem:[%s5981_s30 + $0x1d0] sm:$0xff]  ;;  %v6185_v59 = vld [vmem:[%s5981_s30 + $0x1d8] sm:$0xff]  ;;  %v6188_v60 = vld [vmem:[%s5981_s30 + $0x1e0] sm:$0xff] }
  0xf0   : > { %7922 = vst [vmem:[#allocation46_spill] sm:$0xff] %v6182_v58  ;;  %7923 = vst [vmem:[#allocation47_spill] sm:$0xff] %v6185_v59  ;;  %v6191_v61 = vld [vmem:[%s5981_s30 + $0x1e8] sm:$0xff]  ;;  %v6194_v62 = vld [vmem:[%s5981_s30 + $0x1f0] sm:$0xff] }
  0xf1   : > { %7924 = vst [vmem:[#allocation48_spill] sm:$0xff] %v6194_v62  ;;  %v6197_v63 = vld [vmem:[%s5981_s30 + $0x1f8] sm:$0xff]  ;;  %454 = vst [vmem:[#allocation2] sm:$0xff] (!%p3820_p12), %v5611_v54 }
  0xf2   : > { %7925 = vst [vmem:[#allocation49_spill] sm:$0xff] %v6197_v63  ;;  %455 = vst [vmem:[#allocation2 + $0x8] sm:$0xff] (!%p3820_p12), %v5611_v54 }
  0xf3   : > { %456 = vst [vmem:[#allocation2 + $0x10] sm:$0xff] %v5611_v54  ;;  %457 = vst [vmem:[#allocation2 + $0x18] sm:$0xff] %v5611_v54 }
  0xf4   : > { %458 = vst [vmem:[#allocation2 + $0x20] sm:$0xff] %v5611_v54  ;;  %459 = vst [vmem:[#allocation2 + $0x28] sm:$0xff] %v5611_v54 }
  0xf5   : > { %460 = vst [vmem:[#allocation2 + $0x30] sm:$0xff] %v5611_v54  ;;  %461 = vst [vmem:[#allocation2 + $0x38] sm:$0xff] %v5611_v54 }
  0xf6   : > { %462 = vst [vmem:[#allocation2 + $0x40] sm:$0xff] %v5611_v54  ;;  %463 = vst [vmem:[#allocation2 + $0x48] sm:$0xff] %v5611_v54 }
  0xf7   : > { %464 = vst [vmem:[#allocation2 + $0x50] sm:$0xff] %v5611_v54  ;;  %465 = vst [vmem:[#allocation2 + $0x58] sm:$0xff] %v5611_v54 }
  0xf8   : > { %466 = vst [vmem:[#allocation2 + $0x60] sm:$0xff] %v5611_v54  ;;  %467 = vst [vmem:[#allocation2 + $0x68] sm:$0xff] %v5611_v54 }
  0xf9   : > { %468 = vst [vmem:[#allocation2 + $0x70] sm:$0xff] %v5611_v54  ;;  %469 = vst [vmem:[#allocation2 + $0x78] sm:$0xff] %v5611_v54 }
  0xfa   : > { %470 = vst [vmem:[#allocation2 + $0x80] sm:$0xff] %v5611_v54  ;;  %471 = vst [vmem:[#allocation2 + $0x88] sm:$0xff] %v5611_v54 }
  0xfb   : > { %472 = vst [vmem:[#allocation2 + $0x90] sm:$0xff] %v5611_v54  ;;  %473 = vst [vmem:[#allocation2 + $0x98] sm:$0xff] %v5611_v54 }
  0xfc   : > { %474 = vst [vmem:[#allocation2 + $0xa0] sm:$0xff] %v5611_v54  ;;  %475 = vst [vmem:[#allocation2 + $0xa8] sm:$0xff] %v5611_v54 }
  0xfd   : > { %476 = vst [vmem:[#allocation2 + $0xb0] sm:$0xff] %v5611_v54  ;;  %477 = vst [vmem:[#allocation2 + $0xb8] sm:$0xff] %v5611_v54 }
  0xfe   : > { %478 = vst [vmem:[#allocation2 + $0xc0] sm:$0xff] %v5611_v54  ;;  %479 = vst [vmem:[#allocation2 + $0xc8] sm:$0xff] %v5611_v54 }
  0xff   : > { %480 = vst [vmem:[#allocation2 + $0xd0] sm:$0xff] %v5611_v54  ;;  %481 = vst [vmem:[#allocation2 + $0xd8] sm:$0xff] %v5611_v54 }
 0x100   : > { %482 = vst [vmem:[#allocation2 + $0xe0] sm:$0xff] %v5611_v54  ;;  %483 = vst [vmem:[#allocation2 + $0xe8] sm:$0xff] %v5611_v54 }
 0x101   : > { %484 = vst [vmem:[#allocation2 + $0xf0] sm:$0xff] %v5611_v54  ;;  %485 = vst [vmem:[#allocation2 + $0xf8] sm:$0xff] %v5611_v54 }
 0x102   : > { %486 = vst [vmem:[#allocation2 + $0x100] sm:$0xff] %v5611_v54  ;;  %487 = vst [vmem:[#allocation2 + $0x108] sm:$0xff] %v5611_v54 }
 0x103   : > { %488 = vst [vmem:[#allocation2 + $0x110] sm:$0xff] %v5611_v54  ;;  %489 = vst [vmem:[#allocation2 + $0x118] sm:$0xff] %v5611_v54 }
 0x104   : > { %490 = vst [vmem:[#allocation2 + $0x120] sm:$0xff] %v5611_v54  ;;  %491 = vst [vmem:[#allocation2 + $0x128] sm:$0xff] %v5611_v54 }
 0x105   : > { %492 = vst [vmem:[#allocation2 + $0x130] sm:$0xff] %v5611_v54  ;;  %493 = vst [vmem:[#allocation2 + $0x138] sm:$0xff] %v5611_v54 }
 0x106   : > { %494 = vst [vmem:[#allocation2 + $0x140] sm:$0xff] %v5611_v54  ;;  %495 = vst [vmem:[#allocation2 + $0x148] sm:$0xff] %v5611_v54 }
 0x107   : > { %496 = vst [vmem:[#allocation2 + $0x150] sm:$0xff] %v5611_v54  ;;  %497 = vst [vmem:[#allocation2 + $0x158] sm:$0xff] %v5611_v54 }
 0x108   : > { %498 = vst [vmem:[#allocation2 + $0x160] sm:$0xff] %v5611_v54  ;;  %499 = vst [vmem:[#allocation2 + $0x168] sm:$0xff] %v5611_v54 }
 0x109   : > { %500 = vst [vmem:[#allocation2 + $0x170] sm:$0xff] %v5611_v54  ;;  %501 = vst [vmem:[#allocation2 + $0x178] sm:$0xff] %v5611_v54 }
 0x10a   : > { %502 = vst [vmem:[#allocation2 + $0x180] sm:$0xff] %v5611_v54  ;;  %503 = vst [vmem:[#allocation2 + $0x188] sm:$0xff] %v5611_v54 }
 0x10b   : > { %504 = vst [vmem:[#allocation2 + $0x190] sm:$0xff] %v5611_v54  ;;  %505 = vst [vmem:[#allocation2 + $0x198] sm:$0xff] %v5611_v54 }
 0x10c   : > { %506 = vst [vmem:[#allocation2 + $0x1a0] sm:$0xff] %v5611_v54  ;;  %507 = vst [vmem:[#allocation2 + $0x1a8] sm:$0xff] %v5611_v54 }
 0x10d   : > { %508 = vst [vmem:[#allocation2 + $0x1b0] sm:$0xff] %v5611_v54  ;;  %509 = vst [vmem:[#allocation2 + $0x1b8] sm:$0xff] %v5611_v54 }
 0x10e   : > { %510 = vst [vmem:[#allocation2 + $0x1c0] sm:$0xff] %v5611_v54  ;;  %511 = vst [vmem:[#allocation2 + $0x1c8] sm:$0xff] %v5611_v54 }
 0x10f   : > { %512 = vst [vmem:[#allocation2 + $0x1d0] sm:$0xff] %v5611_v54  ;;  %513 = vst [vmem:[#allocation2 + $0x1d8] sm:$0xff] %v5611_v54 }
 0x110   : > { %514 = vst [vmem:[#allocation2 + $0x1e0] sm:$0xff] %v5611_v54  ;;  %515 = vst [vmem:[#allocation2 + $0x1e8] sm:$0xff] %v5611_v54 }
 0x111   : > { %516 = vst [vmem:[#allocation2 + $0x1f0] sm:$0xff] %v5611_v54  ;;  %517 = vst [vmem:[#allocation2 + $0x1f8] sm:$0xff] %v5611_v54 }
 0x112 PF: > { %v519_v62 = vld [vmem:[%s5989_s8 + $0x8] sm:$0xff]  ;;  %v525_v63 = vld [vmem:[%s5989_s8 + $0x38] sm:$0xff]  ;;  %998 = vmatprep.mubr.f32.mxu0 %v6011_v1  ;;  %1320 = vmatprep.mubr.f32.mxu1 %v6011_v1  ;;  %v518_v55 = vld [vmem:[%s5989_s8] sm:$0xff]  ;;  %s7961_s15 = sld [smem:[#allocation20_spill]] }
 0x113   : > { %v521_v58 = vld [vmem:[%s5989_s8 + $0x18] sm:$0xff]  ;;  %v4185_v54 = vpack.c.bf16 %v525_v63, %v519_v62  ;;  %v527_v59 = vld [vmem:[%s5989_s8 + $0x48] sm:$0xff]  ;;  %v524_v50 = vld [vmem:[%s5989_s8 + $0x30] sm:$0xff] }
 0x114   : > { %v4313_v51 = vpack.c.bf16 %v527_v59, %v521_v58  ;;  %v4187_v46 = vpack.c.bf16 %v524_v50, %v518_v55  ;;  %v520_v47 = vld [vmem:[%s5989_s8 + $0x10] sm:$0xff]  ;;  %v526_v42 = vld [vmem:[%s5989_s8 + $0x40] sm:$0xff]  ;;  %v531_v43 = vld [vmem:[%s5989_s8 + $0x68] sm:$0xff] }
 0x115   : > { %4186 = vmatprep.subr.bf16.mxu0 %v4185_v54  ;;  %v4315_v38 = vpack.c.bf16 %v526_v42, %v520_v47  ;;  %v537_v39 = vld [vmem:[%s5989_s8 + $0x98] sm:$0xff]  ;;  %v539_v1 = vld [vmem:[%s5989_s8 + $0xa8] sm:$0xff]  ;;  %v530_v59 = vld [vmem:[%s5989_s8 + $0x60] sm:$0xff] }
 0x116   : > { %v533_v34 = vld [vmem:[%s5989_s8 + $0x78] sm:$0xff]  ;;  %4314 = vmatprep.subr.bf16.mxu1 %v4313_v51  ;;  %4188 = vmatpush1.bf16.msra.mxu0 %v4187_v46  ;;  %v4189_v62 = vpack.c.bf16 %v537_v39, %v531_v43  ;;  %v536_v50 = vld [vmem:[%s5989_s8 + $0x90] sm:$0xff]  ;;  %v538_v54 = vld [vmem:[%s5989_s8 + $0xa0] sm:$0xff] }
 0x117   : > { %v4317_v58 = vpack.c.bf16 %v539_v1, %v533_v34  ;;  %v532_v55 = vld [vmem:[%s5989_s8 + $0x70] sm:$0xff]  ;;  %4316 = vmatpush1.bf16.msra.mxu1 %v4315_v38  ;;  %v4191_v63 = vpack.c.bf16 %v536_v50, %v530_v59  ;;  %v543_v42 = vld [vmem:[%s5989_s8 + $0xc8] sm:$0xff]  ;;  %v549_v47 = vld [vmem:[%s5989_s8 + $0xf8] sm:$0xff] }
 0x118   : > { %4190 = vmatprep.subr.bf16.mxu0 %v4189_v62  ;;  %v4319_v46 = vpack.c.bf16 %v538_v54, %v532_v55  ;;  %v4193_v39 = vpack.c.bf16 %v549_v47, %v543_v42  ;;  %v545_v43 = vld [vmem:[%s5989_s8 + $0xd8] sm:$0xff]  ;;  %v551_v1 = vld [vmem:[%s5989_s8 + $0x108] sm:$0xff]  ;;  %v542_v34 = vld [vmem:[%s5989_s8 + $0xc0] sm:$0xff]  ;;  %p3821_p9 = scmp.ne.s32.totalorder %s7961_s15, 1 }
 0x119   : > { %4318 = vmatprep.subr.bf16.mxu1 %v4317_v58  ;;  %v4321_v51 = vpack.c.bf16 %v551_v1, %v545_v43  ;;  %v548_v35 = vld [vmem:[%s5989_s8 + $0xf0] sm:$0xff]  ;;  %v550_v59 = vld [vmem:[%s5989_s8 + $0x100] sm:$0xff]  ;;  %v555_v62 = vld [vmem:[%s5989_s8 + $0x128] sm:$0xff] }
 0x11a   : > { %v544_v38 = vld [vmem:[%s5989_s8 + $0xd0] sm:$0xff]  ;;  %4192 = vmatpush1.bf16.msra.mxu0 %v4191_v63  ;;  %v4195_v50 = vpack.c.bf16 %v548_v35, %v542_v34  ;;  %v561_v58 = vld [vmem:[%s5989_s8 + $0x158] sm:$0xff]  ;;  %v563_v47 = vld [vmem:[%s5989_s8 + $0x168] sm:$0xff] }
 0x11b   : > { %v557_v55 = vld [vmem:[%s5989_s8 + $0x138] sm:$0xff]  ;;  %4320 = vmatpush1.bf16.msra.mxu1 %v4319_v46  ;;  %4194 = vmatprep.subr.bf16.mxu0 %v4193_v39  ;;  %v4323_v54 = vpack.c.bf16 %v550_v59, %v544_v38  ;;  %v4197_v42 = vpack.c.bf16 %v561_v58, %v555_v62  ;;  %v554_v43 = vld [vmem:[%s5989_s8 + $0x120] sm:$0xff]  ;;  %v560_v1 = vld [vmem:[%s5989_s8 + $0x150] sm:$0xff] }
 0x11c   : > { %4322 = vmatprep.subr.bf16.mxu1 %v4321_v51  ;;  %v4325_v63 = vpack.c.bf16 %v563_v47, %v557_v55  ;;  %v556_v30 = vld [vmem:[%s5989_s8 + $0x130] sm:$0xff]  ;;  %v562_v35 = vld [vmem:[%s5989_s8 + $0x160] sm:$0xff]  ;;  %v567_v34 = vld [vmem:[%s5989_s8 + $0x188] sm:$0xff]  ;;  %v4199_v39 = vpack.c.bf16 %v560_v1, %v554_v43 }
 0x11d   : > { %v573_v31 = vld [vmem:[%s5989_s8 + $0x1b8] sm:$0xff]  ;;  %v575_v46 = vld [vmem:[%s5989_s8 + $0x1c8] sm:$0xff]  ;;  %v4327_v38 = vpack.c.bf16 %v562_v35, %v556_v30  ;;  %v566_v51 = vld [vmem:[%s5989_s8 + $0x180] sm:$0xff] }
 0x11e   : > { %v569_v26 = vld [vmem:[%s5989_s8 + $0x198] sm:$0xff]  ;;  %4196 = vmatpush1.bf16.msra.mxu0 %v4195_v50  ;;  %v4201_v59 = vpack.c.bf16 %v573_v31, %v567_v34  ;;  %v572_v62 = vld [vmem:[%s5989_s8 + $0x1b0] sm:$0xff]  ;;  %v574_v47 = vld [vmem:[%s5989_s8 + $0x1c0] sm:$0xff] }
 0x11f   : > { %4324 = vmatpush1.bf16.msra.mxu1 %v4323_v54  ;;  %4198 = vmatprep.subr.bf16.mxu0 %v4197_v42  ;;  %v568_v58 = vld [vmem:[%s5989_s8 + $0x190] sm:$0xff]  ;;  %v4329_v55 = vpack.c.bf16 %v575_v46, %v569_v26  ;;  %v579_v27 = vld [vmem:[%s5989_s8 + $0x1e8] sm:$0xff]  ;;  %v585_v22 = vld [vmem:[%s5989_s8 + $0x218] sm:$0xff]  ;;  %v4203_v30 = vpack.c.bf16 %v572_v62, %v566_v51 }
 0x120   : > { %4326 = vmatprep.subr.bf16.mxu1 %v4325_v63  ;;  %v581_v50 = vld [vmem:[%s5989_s8 + $0x1f8] sm:$0xff]  ;;  %v587_v54 = vld [vmem:[%s5989_s8 + $0x228] sm:$0xff]  ;;  %v4331_v31 = vpack.c.bf16 %v574_v47, %v568_v58  ;;  %v4205_v42 = vpack.c.bf16 %v585_v22, %v579_v27  ;;  %v578_v43 = vld [vmem:[%s5989_s8 + $0x1e0] sm:$0xff] }
 0x121   : > { %v584_v1 = vld [vmem:[%s5989_s8 + $0x210] sm:$0xff]  ;;  %v4333_v63 = vpack.c.bf16 %v587_v54, %v581_v50  ;;  %v586_v35 = vld [vmem:[%s5989_s8 + $0x220] sm:$0xff]  ;;  %v591_v34 = vld [vmem:[%s5989_s8 + $0x248] sm:$0xff] }
 0x122   : > { %4200 = vmatpush1.bf16.msra.mxu0 %v4199_v39  ;;  %v580_v26 = vld [vmem:[%s5989_s8 + $0x1f0] sm:$0xff]  ;;  %v597_v46 = vld [vmem:[%s5989_s8 + $0x278] sm:$0xff]  ;;  %v4207_v22 = vpack.c.bf16 %v584_v1, %v578_v43  ;;  %v590_v51 = vld [vmem:[%s5989_s8 + $0x240] sm:$0xff] }
 0x123   : > { %4328 = vmatpush1.bf16.msra.mxu1 %v4327_v38  ;;  %4202 = vmatprep.subr.bf16.mxu0 %v4201_v59  ;;  %v593_v39 = vld [vmem:[%s5989_s8 + $0x258] sm:$0xff]  ;;  %v599_v38 = vld [vmem:[%s5989_s8 + $0x288] sm:$0xff]  ;;  %v4335_v27 = vpack.c.bf16 %v586_v35, %v580_v26  ;;  %v4209_v59 = vpack.c.bf16 %v597_v46, %v591_v34  ;;  %v596_v62 = vld [vmem:[%s5989_s8 + $0x270] sm:$0xff] }
 0x124   : > { %4330 = vmatprep.subr.bf16.mxu1 %v4329_v55  ;;  %v592_v58 = vld [vmem:[%s5989_s8 + $0x250] sm:$0xff]  ;;  %v4337_v55 = vpack.c.bf16 %v599_v38, %v593_v39  ;;  %v598_v47 = vld [vmem:[%s5989_s8 + $0x280] sm:$0xff]  ;;  %v603_v50 = vld [vmem:[%s5989_s8 + $0x2a8] sm:$0xff] }
 0x125   : > { %v609_v54 = vld [vmem:[%s5989_s8 + $0x2d8] sm:$0xff]  ;;  %v4339_v43 = vpack.c.bf16 %v598_v47, %v592_v58  ;;  %v602_v26 = vld [vmem:[%s5989_s8 + $0x2a0] sm:$0xff]  ;;  %v604_v35 = vld [vmem:[%s5989_s8 + $0x2b0] sm:$0xff] }
 0x126   : > { %4204 = vmatpush1.bf16.msra.mxu0 %v4203_v30  ;;  %v605_v30 = vld [vmem:[%s5989_s8 + $0x2b8] sm:$0xff]  ;;  %v4213_v1 = vpack.c.bf16 %v609_v54, %v603_v50  ;;  %v610_v46 = vld [vmem:[%s5989_s8 + $0x2e0] sm:$0xff]  ;;  %v615_v39 = vld [vmem:[%s5989_s8 + $0x308] sm:$0xff] }
 0x127   : > { %4332 = vmatpush1.bf16.msra.mxu1 %v4331_v31  ;;  %4206 = vmatprep.subr.bf16.mxu0 %v4205_v42  ;;  %v611_v31 = vld [vmem:[%s5989_s8 + $0x2e8] sm:$0xff]  ;;  %v4211_v42 = vpack.c.bf16 %v596_v62, %v590_v51  ;;  %v621_v38 = vld [vmem:[%s5989_s8 + $0x338] sm:$0xff]  ;;  %v4343_v51 = vpack.c.bf16 %v610_v46, %v604_v35  ;;  %v614_v58 = vld [vmem:[%s5989_s8 + $0x300] sm:$0xff] }
 0x128   : > { %4334 = vmatprep.subr.bf16.mxu1 %v4333_v63  ;;  %v608_v63 = vld [vmem:[%s5989_s8 + $0x2d0] sm:$0xff]  ;;  %v4341_v34 = vpack.c.bf16 %v611_v31, %v605_v30  ;;  %v4217_v62 = vpack.c.bf16 %v621_v38, %v615_v39  ;;  %v622_v54 = vld [vmem:[%s5989_s8 + $0x340] sm:$0xff]  ;;  %v627_v30 = vld [vmem:[%s5989_s8 + $0x368] sm:$0xff] }
 0x129   : > { %v616_v47 = vld [vmem:[%s5989_s8 + $0x310] sm:$0xff]  ;;  %v633_v31 = vld [vmem:[%s5989_s8 + $0x398] sm:$0xff]  ;;  %v626_v35 = vld [vmem:[%s5989_s8 + $0x360] sm:$0xff] }
 0x12a   : > { %4208 = vmatpush1.bf16.msra.mxu0 %v4207_v22  ;;  %v617_v22 = vld [vmem:[%s5989_s8 + $0x318] sm:$0xff]  ;;  %v628_v46 = vld [vmem:[%s5989_s8 + $0x370] sm:$0xff]  ;;  %v634_v38 = vld [vmem:[%s5989_s8 + $0x3a0] sm:$0xff] }
 0x12b   : > { %4336 = vmatpush1.bf16.msra.mxu1 %v4335_v27  ;;  %4210 = vmatprep.subr.bf16.mxu0 %v4209_v59  ;;  %v623_v27 = vld [vmem:[%s5989_s8 + $0x348] sm:$0xff]  ;;  %v4215_v59 = vpack.c.bf16 %v608_v63, %v602_v26  ;;  %v4347_v26 = vpack.c.bf16 %v622_v54, %v616_v47  ;;  %v4221_v63 = vpack.c.bf16 %v633_v31, %v627_v30  ;;  %v638_v47 = vld [vmem:[%s5989_s8 + $0x3c0] sm:$0xff]  ;;  %v640_v54 = vld [vmem:[%s5989_s8 + $0x3d0] sm:$0xff] }
 0x12c   : > { %4338 = vmatprep.subr.bf16.mxu1 %v4337_v55  ;;  %v620_v55 = vld [vmem:[%s5989_s8 + $0x330] sm:$0xff]  ;;  %v4345_v50 = vpack.c.bf16 %v623_v27, %v617_v22  ;;  %v639_v22 = vld [vmem:[%s5989_s8 + $0x3c8] sm:$0xff]  ;;  %v645_v27 = vld [vmem:[%s5989_s8 + $0x3f8] sm:$0xff] }
 0x12d   : > { %v646_v31 = vld [vmem:[%s5989_s8 + $0x400] sm:$0xff] }
 0x12e   : > { %4212 = vmatpush1.bf16.msra.mxu0 %v4211_v42  ;;  %v629_v42 = vld [vmem:[%s5989_s8 + $0x378] sm:$0xff] }
 0x12f   : > { %4340 = vmatpush1.bf16.msra.mxu1 %v4339_v43  ;;  %4214 = vmatprep.subr.bf16.mxu0 %v4213_v1  ;;  %v635_v43 = vld [vmem:[%s5989_s8 + $0x3a8] sm:$0xff]  ;;  %v4219_v1 = vpack.c.bf16 %v620_v55, %v614_v58  ;;  %v4351_v58 = vpack.c.bf16 %v634_v38, %v628_v46  ;;  %v4225_v55 = vpack.c.bf16 %v645_v27, %v639_v22  ;;  %v650_v46 = vld [vmem:[%s5989_s8 + $0x420] sm:$0xff]  ;;  %v652_v38 = vld [vmem:[%s5989_s8 + $0x430] sm:$0xff] }
 0x130   : > { %4342 = vmatprep.subr.bf16.mxu1 %v4341_v34  ;;  %v632_v34 = vld [vmem:[%s5989_s8 + $0x390] sm:$0xff]  ;;  %v4349_v39 = vpack.c.bf16 %v635_v43, %v629_v42  ;;  %v651_v42 = vld [vmem:[%s5989_s8 + $0x428] sm:$0xff]  ;;  %v657_v43 = vld [vmem:[%s5989_s8 + $0x458] sm:$0xff] }
 0x131   : > { %v658_v27 = vld [vmem:[%s5989_s8 + $0x460] sm:$0xff] }
 0x132   : > { %4216 = vmatpush1.bf16.msra.mxu0 %v4215_v59  ;;  %v641_v59 = vld [vmem:[%s5989_s8 + $0x3d8] sm:$0xff] }
 0x133   : > { %4344 = vmatpush1.bf16.msra.mxu1 %v4343_v51  ;;  %4218 = vmatprep.subr.bf16.mxu0 %v4217_v62  ;;  %v647_v51 = vld [vmem:[%s5989_s8 + $0x408] sm:$0xff]  ;;  %v4223_v62 = vpack.c.bf16 %v632_v34, %v626_v35  ;;  %v4355_v35 = vpack.c.bf16 %v646_v31, %v640_v54  ;;  %v4229_v34 = vpack.c.bf16 %v657_v43, %v651_v42  ;;  %v662_v54 = vld [vmem:[%s5989_s8 + $0x480] sm:$0xff]  ;;  %v664_v31 = vld [vmem:[%s5989_s8 + $0x490] sm:$0xff] }
 0x134   : > { %4346 = vmatprep.subr.bf16.mxu1 %v4345_v50  ;;  %v644_v50 = vld [vmem:[%s5989_s8 + $0x3f0] sm:$0xff]  ;;  %v4353_v30 = vpack.c.bf16 %v647_v51, %v641_v59  ;;  %v663_v59 = vld [vmem:[%s5989_s8 + $0x488] sm:$0xff]  ;;  %v669_v51 = vld [vmem:[%s5989_s8 + $0x4b8] sm:$0xff] }
 0x135   : > { %v670_v43 = vld [vmem:[%s5989_s8 + $0x4c0] sm:$0xff] }
 0x136   : > { %4220 = vmatpush1.bf16.msra.mxu0 %v4219_v1  ;;  %v653_v1 = vld [vmem:[%s5989_s8 + $0x438] sm:$0xff] }
 0x137   : > { %4348 = vmatpush1.bf16.msra.mxu1 %v4347_v26  ;;  %4222 = vmatprep.subr.bf16.mxu0 %v4221_v63  ;;  %v659_v26 = vld [vmem:[%s5989_s8 + $0x468] sm:$0xff]  ;;  %v4227_v63 = vpack.c.bf16 %v644_v50, %v638_v47  ;;  %v4359_v47 = vpack.c.bf16 %v658_v27, %v652_v38  ;;  %v4233_v50 = vpack.c.bf16 %v669_v51, %v663_v59  ;;  %v674_v38 = vld [vmem:[%s5989_s8 + $0x4e0] sm:$0xff]  ;;  %v676_v27 = vld [vmem:[%s5989_s8 + $0x4f0] sm:$0xff] }
 0x138   : > { %4350 = vmatprep.subr.bf16.mxu1 %v4349_v39  ;;  %v656_v39 = vld [vmem:[%s5989_s8 + $0x450] sm:$0xff]  ;;  %v4357_v22 = vpack.c.bf16 %v659_v26, %v653_v1  ;;  %v675_v1 = vld [vmem:[%s5989_s8 + $0x4e8] sm:$0xff]  ;;  %v681_v26 = vld [vmem:[%s5989_s8 + $0x518] sm:$0xff] }
 0x139   : > { %v682_v51 = vld [vmem:[%s5989_s8 + $0x520] sm:$0xff] }
 0x13a   : > { %4224 = vmatpush1.bf16.msra.mxu0 %v4223_v62  ;;  %v665_v62 = vld [vmem:[%s5989_s8 + $0x498] sm:$0xff] }
 0x13b   : > { %4352 = vmatpush1.bf16.msra.mxu1 %v4351_v58  ;;  %4226 = vmatprep.subr.bf16.mxu0 %v4225_v55  ;;  %v671_v58 = vld [vmem:[%s5989_s8 + $0x4c8] sm:$0xff]  ;;  %v4231_v55 = vpack.c.bf16 %v656_v39, %v650_v46  ;;  %v4363_v46 = vpack.c.bf16 %v670_v43, %v664_v31  ;;  %v4237_v39 = vpack.c.bf16 %v681_v26, %v675_v1  ;;  %v686_v31 = vld [vmem:[%s5989_s8 + $0x540] sm:$0xff]  ;;  %v688_v43 = vld [vmem:[%s5989_s8 + $0x550] sm:$0xff] }
 0x13c   : > { %4354 = vmatprep.subr.bf16.mxu1 %v4353_v30  ;;  %v668_v30 = vld [vmem:[%s5989_s8 + $0x4b0] sm:$0xff]  ;;  %v4361_v42 = vpack.c.bf16 %v671_v58, %v665_v62  ;;  %v687_v62 = vld [vmem:[%s5989_s8 + $0x548] sm:$0xff]  ;;  %v693_v58 = vld [vmem:[%s5989_s8 + $0x578] sm:$0xff] }
 0x13d   : > { %v694_v26 = vld [vmem:[%s5989_s8 + $0x580] sm:$0xff] }
 0x13e   : > { %4228 = vmatpush1.bf16.msra.mxu0 %v4227_v63  ;;  %v677_v63 = vld [vmem:[%s5989_s8 + $0x4f8] sm:$0xff] }
 0x13f   : > { %4356 = vmatpush1.bf16.msra.mxu1 %v4355_v35  ;;  %4230 = vmatprep.subr.bf16.mxu0 %v4229_v34  ;;  %v683_v35 = vld [vmem:[%s5989_s8 + $0x528] sm:$0xff]  ;;  %v4235_v34 = vpack.c.bf16 %v668_v30, %v662_v54  ;;  %v4367_v54 = vpack.c.bf16 %v682_v51, %v676_v27  ;;  %v4241_v30 = vpack.c.bf16 %v693_v58, %v687_v62  ;;  %v698_v27 = vld [vmem:[%s5989_s8 + $0x5a0] sm:$0xff]  ;;  %v700_v51 = vld [vmem:[%s5989_s8 + $0x5b0] sm:$0xff] }
 0x140   : > { %4358 = vmatprep.subr.bf16.mxu1 %v4357_v22  ;;  %v680_v22 = vld [vmem:[%s5989_s8 + $0x510] sm:$0xff]  ;;  %v4365_v59 = vpack.c.bf16 %v683_v35, %v677_v63  ;;  %v699_v63 = vld [vmem:[%s5989_s8 + $0x5a8] sm:$0xff]  ;;  %v705_v35 = vld [vmem:[%s5989_s8 + $0x5d8] sm:$0xff] }
 0x141   : > { %v706_v58 = vld [vmem:[%s5989_s8 + $0x5e0] sm:$0xff] }
 0x142   : > { %4232 = vmatpush1.bf16.msra.mxu0 %v4231_v55  ;;  %v689_v55 = vld [vmem:[%s5989_s8 + $0x558] sm:$0xff] }
 0x143   : > { %4360 = vmatpush1.bf16.msra.mxu1 %v4359_v47  ;;  %4234 = vmatprep.subr.bf16.mxu0 %v4233_v50  ;;  %v695_v47 = vld [vmem:[%s5989_s8 + $0x588] sm:$0xff]  ;;  %v4239_v50 = vpack.c.bf16 %v680_v22, %v674_v38  ;;  %v4371_v38 = vpack.c.bf16 %v694_v26, %v688_v43  ;;  %v4245_v22 = vpack.c.bf16 %v705_v35, %v699_v63  ;;  %v710_v43 = vld [vmem:[%s5989_s8 + $0x600] sm:$0xff]  ;;  %v712_v63 = vld [vmem:[%s5989_s8 + $0x610] sm:$0xff] }
 0x144   : > { %4362 = vmatprep.subr.bf16.mxu1 %v4361_v42  ;;  %v692_v42 = vld [vmem:[%s5989_s8 + $0x570] sm:$0xff]  ;;  %v4369_v1 = vpack.c.bf16 %v695_v47, %v689_v55  ;;  %v711_v55 = vld [vmem:[%s5989_s8 + $0x608] sm:$0xff]  ;;  %v717_v47 = vld [vmem:[%s5989_s8 + $0x638] sm:$0xff] }
 0x145   : > { %v718_v35 = vld [vmem:[%s5989_s8 + $0x640] sm:$0xff] }
 0x146   : > { %4236 = vmatpush1.bf16.msra.mxu0 %v4235_v34  ;;  %v701_v34 = vld [vmem:[%s5989_s8 + $0x5b8] sm:$0xff] }
 0x147   : > { %4364 = vmatpush1.bf16.msra.mxu1 %v4363_v46  ;;  %4238 = vmatprep.subr.bf16.mxu0 %v4237_v39  ;;  %v707_v46 = vld [vmem:[%s5989_s8 + $0x5e8] sm:$0xff]  ;;  %v4243_v39 = vpack.c.bf16 %v692_v42, %v686_v31  ;;  %v4249_v42 = vpack.c.bf16 %v717_v47, %v711_v55  ;;  %v730_v55 = vld [vmem:[%s5989_s8 + $0x6a0] sm:$0xff] }
 0x148   : > { %4366 = vmatprep.subr.bf16.mxu1 %v4365_v59  ;;  %v704_v59 = vld [vmem:[%s5989_s8 + $0x5d0] sm:$0xff]  ;;  %v4373_v62 = vpack.c.bf16 %v707_v46, %v701_v34  ;;  %v719_v31 = vld [vmem:[%s5989_s8 + $0x648] sm:$0xff]  ;;  %v729_v46 = vld [vmem:[%s5989_s8 + $0x698] sm:$0xff] }
 0x149   : > { %v723_v34 = vld [vmem:[%s5989_s8 + $0x668] sm:$0xff] }
 0x14a   : > { %4240 = vmatpush1.bf16.msra.mxu0 %v4239_v50  ;;  %v713_v50 = vld [vmem:[%s5989_s8 + $0x618] sm:$0xff] }
 0x14b   : > { %4368 = vmatpush1.bf16.msra.mxu1 %v4367_v54  ;;  %4242 = vmatprep.subr.bf16.mxu0 %v4241_v30  ;;  %v4247_v54 = vpack.c.bf16 %v704_v59, %v698_v27  ;;  %v4375_v30 = vpack.c.bf16 %v706_v58, %v700_v51  ;;  %v4377_v26 = vpack.c.bf16 %v719_v31, %v713_v50  ;;  %v722_v59 = vld [vmem:[%s5989_s8 + $0x660] sm:$0xff]  ;;  %v728_v51 = vld [vmem:[%s5989_s8 + $0x690] sm:$0xff]  ;;  %v735_v50 = vld [vmem:[%s5989_s8 + $0x6c8] sm:$0xff] }
 0x14c   : > { %4370 = vmatprep.subr.bf16.mxu1 %v4369_v1  ;;  %v716_v1 = vld [vmem:[%s5989_s8 + $0x630] sm:$0xff]  ;;  %v4379_v27 = vpack.c.bf16 %v718_v35, %v712_v63  ;;  %v741_v31 = vld [vmem:[%s5989_s8 + $0x6f8] sm:$0xff] }
 0x14d   : > { %v724_v58 = vld [vmem:[%s5989_s8 + $0x670] sm:$0xff]  ;;  %v4257_v63 = vpack.c.bf16 %v741_v31, %v735_v50  ;;  %v754_v50 = vld [vmem:[%s5989_s8 + $0x760] sm:$0xff] }
 0x14e   : > { %4244 = vmatpush1.bf16.msra.mxu0 %v4243_v39  ;;  %v4251_v39 = vpack.c.bf16 %v716_v1, %v710_v43  ;;  %v4383_v43 = vpack.c.bf16 %v730_v55, %v724_v58  ;;  %v734_v1 = vld [vmem:[%s5989_s8 + $0x6c0] sm:$0xff]  ;;  %v736_v35 = vld [vmem:[%s5989_s8 + $0x6d0] sm:$0xff] }
 0x14f   : > { %4372 = vmatpush1.bf16.msra.mxu1 %v4371_v38  ;;  %4246 = vmatprep.subr.bf16.mxu0 %v4245_v22  ;;  %v725_v38 = vld [vmem:[%s5989_s8 + $0x678] sm:$0xff]  ;;  %v731_v22 = vld [vmem:[%s5989_s8 + $0x6a8] sm:$0xff]  ;;  %v752_v58 = vld [vmem:[%s5989_s8 + $0x750] sm:$0xff] }
 0x150   : > { %4374 = vmatprep.subr.bf16.mxu1 %v4373_v62  ;;  %v4253_v62 = vpack.c.bf16 %v729_v46, %v723_v34  ;;  %v4381_v47 = vpack.c.bf16 %v731_v22, %v725_v38  ;;  %v742_v34 = vld [vmem:[%s5989_s8 + $0x700] sm:$0xff]  ;;  %v753_v38 = vld [vmem:[%s5989_s8 + $0x758] sm:$0xff] }
 0x152   : > { %4248 = vmatpush1.bf16.msra.mxu0 %v4247_v54  ;;  %v4255_v54 = vpack.c.bf16 %v728_v51, %v722_v59  ;;  %v755_v59 = vld [vmem:[%s5989_s8 + $0x768] sm:$0xff]  ;;  %v4387_v51 = vpack.c.bf16 %v742_v34, %v736_v35  ;;  %v764_v35 = vld [vmem:[%s5989_s8 + $0x7b0] sm:$0xff] }
 0x153   : > { %4376 = vmatpush1.bf16.msra.mxu1 %v4375_v30  ;;  %4250 = vmatprep.subr.bf16.mxu0 %v4249_v42  ;;  %v737_v30 = vld [vmem:[%s5989_s8 + $0x6d8] sm:$0xff]  ;;  %v743_v42 = vld [vmem:[%s5989_s8 + $0x708] sm:$0xff] }
 0x154   : > { %4378 = vmatprep.subr.bf16.mxu1 %v4377_v26  ;;  %v740_v26 = vld [vmem:[%s5989_s8 + $0x6f0] sm:$0xff]  ;;  %v4385_v46 = vpack.c.bf16 %v743_v42, %v737_v30  ;;  %v765_v30 = vld [vmem:[%s5989_s8 + $0x7b8] sm:$0xff] }
 0x155   : > { %999 = vmatmul.mubr.f32.vlgmr.msra.gmra.mrb[0].mxu0 %v6008_v0  ;;  %v4259_v22 = vpack.c.bf16 %v740_v26, %v734_v1  ;;  %v767_v1 = vld [vmem:[%s5989_s8 + $0x7c8] sm:$0xff] }
 0x156   : > { %1321 = vmatmul.mubr.f32.vlgmr.msra.gmra.mrb[0].mxu1 %v6008_v0  ;;  %4252 = vmatpush1.bf16.msra.mxu0 %v4251_v39  ;;  %v747_v39 = vld [vmem:[%s5989_s8 + $0x728] sm:$0xff] }
 0x157   : > { %4380 = vmatpush1.bf16.msra.mxu1 %v4379_v27  ;;  %1004 = vmatprep.mubr.f32.mxu0 %v6023_v5  ;;  %v749_v27 = vld [vmem:[%s5989_s8 + $0x738] sm:$0xff]  ;;  %v4261_v55 = vpack.c.bf16 %v753_v38, %v747_v39  ;;  %v766_v39 = vld [vmem:[%s5989_s8 + $0x7c0] sm:$0xff] }
 0x158   : > { %1326 = vmatprep.mubr.f32.mxu1 %v6023_v5  ;;  %4254 = vmatprep.subr.bf16.mxu0 %v4253_v62  ;;  %v746_v62 = vld [vmem:[%s5989_s8 + $0x720] sm:$0xff]  ;;  %v4389_v31 = vpack.c.bf16 %v755_v59, %v749_v27  ;;  %v777_v27 = vld [vmem:[%s5989_s8 + $0x818] sm:$0xff] }
 0x159   : > { %1005 = vmatmul.mubr.f32.gmra.mrb[2].mxu0 %v6020_v4  ;;  %4382 = vmatprep.subr.bf16.mxu1 %v4381_v47  ;;  %v748_v47 = vld [vmem:[%s5989_s8 + $0x730] sm:$0xff]  ;;  %v4263_v42 = vpack.c.bf16 %v752_v58, %v746_v62  ;;  %v779_v62 = vld [vmem:[%s5989_s8 + $0x828] sm:$0xff] }
 0x15a   : > { %1327 = vmatmul.mubr.f32.gmra.mrb[2].mxu1 %v6020_v4  ;;  %4256 = vmatpush1.bf16.msra.mxu0 %v4255_v54  ;;  %v759_v54 = vld [vmem:[%s5989_s8 + $0x788] sm:$0xff]  ;;  %v4391_v26 = vpack.c.bf16 %v754_v50, %v748_v47  ;;  %v776_v47 = vld [vmem:[%s5989_s8 + $0x810] sm:$0xff] }
 0x15b   : > { %4384 = vmatpush1.bf16.msra.mxu1 %v4383_v43  ;;  %1010 = vmatprep.mubr.f32.mxu0 %v6035_v9  ;;  %v761_v43 = vld [vmem:[%s5989_s8 + $0x798] sm:$0xff]  ;;  %v4265_v34 = vpack.c.bf16 %v765_v30, %v759_v54  ;;  %v778_v54 = vld [vmem:[%s5989_s8 + $0x820] sm:$0xff] }
 0x15c   : > { %1332 = vmatprep.mubr.f32.mxu1 %v6035_v9  ;;  %4258 = vmatprep.subr.bf16.mxu0 %v4257_v63  ;;  %v758_v63 = vld [vmem:[%s5989_s8 + $0x780] sm:$0xff]  ;;  %v4393_v38 = vpack.c.bf16 %v767_v1, %v761_v43  ;;  %v789_v43 = vld [vmem:[%s5989_s8 + $0x878] sm:$0xff] }
 0x15d   : > { %1011 = vmatmul.mubr.f32.gmra.mrb[4].mxu0 %v6032_v8  ;;  %4386 = vmatprep.subr.bf16.mxu1 %v4385_v46  ;;  %v760_v46 = vld [vmem:[%s5989_s8 + $0x790] sm:$0xff]  ;;  %v4267_v59 = vpack.c.bf16 %v764_v35, %v758_v63  ;;  %v791_v63 = vld [vmem:[%s5989_s8 + $0x888] sm:$0xff] }
 0x15e   : > { %1333 = vmatmul.mubr.f32.gmra.mrb[4].mxu1 %v6032_v8  ;;  %4260 = vmatpush1.bf16.msra.mxu0 %v4259_v22  ;;  %v771_v22 = vld [vmem:[%s5989_s8 + $0x7e8] sm:$0xff]  ;;  %v4395_v58 = vpack.c.bf16 %v766_v39, %v760_v46  ;;  %v788_v46 = vld [vmem:[%s5989_s8 + $0x870] sm:$0xff] }
 0x15f   : > { %4388 = vmatpush1.bf16.msra.mxu1 %v4387_v51  ;;  %1016 = vmatprep.mubr.f32.mxu0 %v6047_v13  ;;  %v773_v51 = vld [vmem:[%s5989_s8 + $0x7f8] sm:$0xff]  ;;  %v4269_v50 = vpack.c.bf16 %v777_v27, %v771_v22  ;;  %v790_v22 = vld [vmem:[%s5989_s8 + $0x880] sm:$0xff] }
 0x160   : > { %1338 = vmatprep.mubr.f32.mxu1 %v6047_v13  ;;  %4262 = vmatprep.subr.bf16.mxu0 %v4261_v55  ;;  %v770_v55 = vld [vmem:[%s5989_s8 + $0x7e0] sm:$0xff]  ;;  %v4397_v30 = vpack.c.bf16 %v779_v62, %v773_v51  ;;  %v801_v51 = vld [vmem:[%s5989_s8 + $0x8d8] sm:$0xff] }
 0x161   : > { %1017 = vmatmul.mubr.f32.gmra.mrb[6].mxu0 %v6044_v12  ;;  %4390 = vmatprep.subr.bf16.mxu1 %v4389_v31  ;;  %v772_v31 = vld [vmem:[%s5989_s8 + $0x7f0] sm:$0xff]  ;;  %v4271_v1 = vpack.c.bf16 %v776_v47, %v770_v55  ;;  %v803_v55 = vld [vmem:[%s5989_s8 + $0x8e8] sm:$0xff] }
 0x162   : > { %1339 = vmatmul.mubr.f32.gmra.mrb[6].mxu1 %v6044_v12  ;;  %4264 = vmatpush1.bf16.msra.mxu0 %v4263_v42  ;;  %v783_v42 = vld [vmem:[%s5989_s8 + $0x848] sm:$0xff]  ;;  %v4399_v35 = vpack.c.bf16 %v778_v54, %v772_v31  ;;  %v800_v31 = vld [vmem:[%s5989_s8 + $0x8d0] sm:$0xff] }
 0x163   : > { %4392 = vmatpush1.bf16.msra.mxu1 %v4391_v26  ;;  %1022 = vmatprep.mubr.f32.mxu0 %v6059_v17  ;;  %v785_v26 = vld [vmem:[%s5989_s8 + $0x858] sm:$0xff]  ;;  %v4273_v39 = vpack.c.bf16 %v789_v43, %v783_v42  ;;  %v802_v42 = vld [vmem:[%s5989_s8 + $0x8e0] sm:$0xff] }
 0x164   : > { %1344 = vmatprep.mubr.f32.mxu1 %v6059_v17  ;;  %4266 = vmatprep.subr.bf16.mxu0 %v4265_v34  ;;  %v782_v34 = vld [vmem:[%s5989_s8 + $0x840] sm:$0xff]  ;;  %v4401_v27 = vpack.c.bf16 %v791_v63, %v785_v26  ;;  %v813_v26 = vld [vmem:[%s5989_s8 + $0x938] sm:$0xff] }
 0x165   : > { %1023 = vmatmul.mubr.f32.gmra.mrb[8].mxu0 %v6056_v16  ;;  %4394 = vmatprep.subr.bf16.mxu1 %v4393_v38  ;;  %v784_v38 = vld [vmem:[%s5989_s8 + $0x850] sm:$0xff]  ;;  %v4275_v62 = vpack.c.bf16 %v788_v46, %v782_v34  ;;  %v815_v34 = vld [vmem:[%s5989_s8 + $0x948] sm:$0xff] }
 0x166   : > { %1345 = vmatmul.mubr.f32.gmra.mrb[8].mxu1 %v6056_v16  ;;  %4268 = vmatpush1.bf16.msra.mxu0 %v4267_v59  ;;  %v795_v59 = vld [vmem:[%s5989_s8 + $0x8a8] sm:$0xff]  ;;  %v4403_v47 = vpack.c.bf16 %v790_v22, %v784_v38  ;;  %v812_v38 = vld [vmem:[%s5989_s8 + $0x930] sm:$0xff] }
 0x167   : > { %4396 = vmatpush1.bf16.msra.mxu1 %v4395_v58  ;;  %1028 = vmatprep.mubr.f32.mxu0 %v6071_v21  ;;  %v797_v58 = vld [vmem:[%s5989_s8 + $0x8b8] sm:$0xff]  ;;  %v4277_v54 = vpack.c.bf16 %v801_v51, %v795_v59  ;;  %v814_v59 = vld [vmem:[%s5989_s8 + $0x940] sm:$0xff] }
 0x168   : > { %1350 = vmatprep.mubr.f32.mxu1 %v6071_v21  ;;  %4270 = vmatprep.subr.bf16.mxu0 %v4269_v50  ;;  %v794_v50 = vld [vmem:[%s5989_s8 + $0x8a0] sm:$0xff]  ;;  %v4405_v43 = vpack.c.bf16 %v803_v55, %v797_v58  ;;  %v825_v58 = vld [vmem:[%s5989_s8 + $0x998] sm:$0xff] }
 0x169   : > { %1029 = vmatmul.mubr.f32.gmra.mrb[10].mxu0 %v6068_v20  ;;  %4398 = vmatprep.subr.bf16.mxu1 %v4397_v30  ;;  %v796_v30 = vld [vmem:[%s5989_s8 + $0x8b0] sm:$0xff]  ;;  %v4279_v63 = vpack.c.bf16 %v800_v31, %v794_v50  ;;  %v827_v50 = vld [vmem:[%s5989_s8 + $0x9a8] sm:$0xff] }
 0x16a   : > { %1351 = vmatmul.mubr.f32.gmra.mrb[10].mxu1 %v6068_v20  ;;  %4272 = vmatpush1.bf16.msra.mxu0 %v4271_v1  ;;  %v807_v1 = vld [vmem:[%s5989_s8 + $0x908] sm:$0xff]  ;;  %v4407_v46 = vpack.c.bf16 %v802_v42, %v796_v30  ;;  %v824_v30 = vld [vmem:[%s5989_s8 + $0x990] sm:$0xff] }
 0x16b   : > { %4400 = vmatpush1.bf16.msra.mxu1 %v4399_v35  ;;  %1034 = vmatprep.mubr.f32.mxu0 %v6083_v25  ;;  %v809_v35 = vld [vmem:[%s5989_s8 + $0x918] sm:$0xff]  ;;  %v4281_v22 = vpack.c.bf16 %v813_v26, %v807_v1  ;;  %v826_v1 = vld [vmem:[%s5989_s8 + $0x9a0] sm:$0xff] }
 0x16c   : > { %1356 = vmatprep.mubr.f32.mxu1 %v6083_v25  ;;  %4274 = vmatprep.subr.bf16.mxu0 %v4273_v39  ;;  %v806_v39 = vld [vmem:[%s5989_s8 + $0x900] sm:$0xff]  ;;  %v4409_v51 = vpack.c.bf16 %v815_v34, %v809_v35  ;;  %v837_v35 = vld [vmem:[%s5989_s8 + $0x9f8] sm:$0xff] }
 0x16d   : > { %1035 = vmatmul.mubr.f32.gmra.mrb[12].mxu0 %v6080_v24  ;;  %4402 = vmatprep.subr.bf16.mxu1 %v4401_v27  ;;  %v808_v27 = vld [vmem:[%s5989_s8 + $0x910] sm:$0xff]  ;;  %v4283_v55 = vpack.c.bf16 %v812_v38, %v806_v39  ;;  %v839_v39 = vld [vmem:[%s5989_s8 + $0xa08] sm:$0xff] }
 0x16e   : > { %1357 = vmatmul.mubr.f32.gmra.mrb[12].mxu1 %v6080_v24  ;;  %4276 = vmatpush1.bf16.msra.mxu0 %v4275_v62  ;;  %v819_v62 = vld [vmem:[%s5989_s8 + $0x968] sm:$0xff]  ;;  %v4411_v31 = vpack.c.bf16 %v814_v59, %v808_v27  ;;  %v836_v27 = vld [vmem:[%s5989_s8 + $0x9f0] sm:$0xff] }
 0x16f   : > { %4404 = vmatpush1.bf16.msra.mxu1 %v4403_v47  ;;  %1040 = vmatprep.mubr.f32.mxu0 %v6095_v29  ;;  %v821_v47 = vld [vmem:[%s5989_s8 + $0x978] sm:$0xff]  ;;  %v4285_v42 = vpack.c.bf16 %v825_v58, %v819_v62  ;;  %v838_v62 = vld [vmem:[%s5989_s8 + $0xa00] sm:$0xff] }
 0x170   : > { %1362 = vmatprep.mubr.f32.mxu1 %v6095_v29  ;;  %4278 = vmatprep.subr.bf16.mxu0 %v4277_v54  ;;  %v818_v54 = vld [vmem:[%s5989_s8 + $0x960] sm:$0xff]  ;;  %v4413_v26 = vpack.c.bf16 %v827_v50, %v821_v47  ;;  %v849_v47 = vld [vmem:[%s5989_s8 + $0xa58] sm:$0xff] }
 0x171   : > { %1041 = vmatmul.mubr.f32.gmra.mrb[14].mxu0 %v6092_v28  ;;  %4406 = vmatprep.subr.bf16.mxu1 %v4405_v43  ;;  %v820_v43 = vld [vmem:[%s5989_s8 + $0x970] sm:$0xff]  ;;  %v4287_v34 = vpack.c.bf16 %v824_v30, %v818_v54  ;;  %v851_v54 = vld [vmem:[%s5989_s8 + $0xa68] sm:$0xff] }
 0x172   : > { %1363 = vmatmul.mubr.f32.gmra.mrb[14].mxu1 %v6092_v28  ;;  %4280 = vmatpush1.bf16.msra.mxu0 %v4279_v63  ;;  %v831_v63 = vld [vmem:[%s5989_s8 + $0x9c8] sm:$0xff]  ;;  %v4415_v38 = vpack.c.bf16 %v826_v1, %v820_v43  ;;  %v848_v43 = vld [vmem:[%s5989_s8 + $0xa50] sm:$0xff] }
 0x173   : > { %4408 = vmatpush1.bf16.msra.mxu1 %v4407_v46  ;;  %1046 = vmatprep.mubr.f32.mxu0 %v6107_v33  ;;  %v833_v46 = vld [vmem:[%s5989_s8 + $0x9d8] sm:$0xff]  ;;  %v4289_v59 = vpack.c.bf16 %v837_v35, %v831_v63  ;;  %v850_v63 = vld [vmem:[%s5989_s8 + $0xa60] sm:$0xff] }
 0x174   : > { %1368 = vmatprep.mubr.f32.mxu1 %v6107_v33  ;;  %4282 = vmatprep.subr.bf16.mxu0 %v4281_v22  ;;  %v830_v22 = vld [vmem:[%s5989_s8 + $0x9c0] sm:$0xff]  ;;  %v4417_v58 = vpack.c.bf16 %v839_v39, %v833_v46  ;;  %v861_v46 = vld [vmem:[%s5989_s8 + $0xab8] sm:$0xff] }
 0x175   : > { %1047 = vmatmul.mubr.f32.gmra.mrb[16].mxu0 %v6104_v32  ;;  %4410 = vmatprep.subr.bf16.mxu1 %v4409_v51  ;;  %v832_v51 = vld [vmem:[%s5989_s8 + $0x9d0] sm:$0xff]  ;;  %v4291_v50 = vpack.c.bf16 %v836_v27, %v830_v22  ;;  %v863_v22 = vld [vmem:[%s5989_s8 + $0xac8] sm:$0xff] }
 0x176   : > { %1369 = vmatmul.mubr.f32.gmra.mrb[16].mxu1 %v6104_v32  ;;  %4284 = vmatpush1.bf16.msra.mxu0 %v4283_v55  ;;  %v843_v55 = vld [vmem:[%s5989_s8 + $0xa28] sm:$0xff]  ;;  %v4419_v30 = vpack.c.bf16 %v838_v62, %v832_v51  ;;  %v860_v51 = vld [vmem:[%s5989_s8 + $0xab0] sm:$0xff] }
 0x177   : > { %4412 = vmatpush1.bf16.msra.mxu1 %v4411_v31  ;;  %1052 = vmatprep.mubr.f32.mxu0 %v6119_v37  ;;  %v845_v31 = vld [vmem:[%s5989_s8 + $0xa38] sm:$0xff]  ;;  %v4293_v1 = vpack.c.bf16 %v849_v47, %v843_v55  ;;  %v862_v55 = vld [vmem:[%s5989_s8 + $0xac0] sm:$0xff] }
 0x178   : > { %1374 = vmatprep.mubr.f32.mxu1 %v6119_v37  ;;  %4286 = vmatprep.subr.bf16.mxu0 %v4285_v42  ;;  %v842_v42 = vld [vmem:[%s5989_s8 + $0xa20] sm:$0xff]  ;;  %v4421_v35 = vpack.c.bf16 %v851_v54, %v845_v31  ;;  %v873_v31 = vld [vmem:[%s5989_s8 + $0xb18] sm:$0xff] }
 0x179   : > { %1053 = vmatmul.mubr.f32.gmra.mrb[18].mxu0 %v6116_v36  ;;  %4414 = vmatprep.subr.bf16.mxu1 %v4413_v26  ;;  %v844_v26 = vld [vmem:[%s5989_s8 + $0xa30] sm:$0xff]  ;;  %v4295_v39 = vpack.c.bf16 %v848_v43, %v842_v42  ;;  %v875_v42 = vld [vmem:[%s5989_s8 + $0xb28] sm:$0xff] }
 0x17a   : > { %1375 = vmatmul.mubr.f32.gmra.mrb[18].mxu1 %v6116_v36  ;;  %4288 = vmatpush1.bf16.msra.mxu0 %v4287_v34  ;;  %v855_v34 = vld [vmem:[%s5989_s8 + $0xa88] sm:$0xff]  ;;  %v4423_v27 = vpack.c.bf16 %v850_v63, %v844_v26  ;;  %v872_v26 = vld [vmem:[%s5989_s8 + $0xb10] sm:$0xff] }
 0x17b   : > { %4416 = vmatpush1.bf16.msra.mxu1 %v4415_v38  ;;  %1058 = vmatprep.mubr.f32.mxu0 %v6131_v41  ;;  %v857_v38 = vld [vmem:[%s5989_s8 + $0xa98] sm:$0xff]  ;;  %v4297_v62 = vpack.c.bf16 %v861_v46, %v855_v34  ;;  %v874_v34 = vld [vmem:[%s5989_s8 + $0xb20] sm:$0xff] }
 0x17c   : > { %1380 = vmatprep.mubr.f32.mxu1 %v6131_v41  ;;  %4290 = vmatprep.subr.bf16.mxu0 %v4289_v59  ;;  %v854_v59 = vld [vmem:[%s5989_s8 + $0xa80] sm:$0xff]  ;;  %v4425_v47 = vpack.c.bf16 %v863_v22, %v857_v38  ;;  %v885_v38 = vld [vmem:[%s5989_s8 + $0xb78] sm:$0xff] }
 0x17d   : > { %1059 = vmatmul.mubr.f32.gmra.mrb[20].mxu0 %v6128_v40  ;;  %4418 = vmatprep.subr.bf16.mxu1 %v4417_v58  ;;  %v856_v58 = vld [vmem:[%s5989_s8 + $0xa90] sm:$0xff]  ;;  %v4299_v54 = vpack.c.bf16 %v860_v51, %v854_v59  ;;  %v887_v59 = vld [vmem:[%s5989_s8 + $0xb88] sm:$0xff] }
 0x17e   : > { %1381 = vmatmul.mubr.f32.gmra.mrb[20].mxu1 %v6128_v40  ;;  %4292 = vmatpush1.bf16.msra.mxu0 %v4291_v50  ;;  %v867_v50 = vld [vmem:[%s5989_s8 + $0xae8] sm:$0xff]  ;;  %v4427_v43 = vpack.c.bf16 %v862_v55, %v856_v58  ;;  %v884_v58 = vld [vmem:[%s5989_s8 + $0xb70] sm:$0xff] }
 0x17f   : > { %4420 = vmatpush1.bf16.msra.mxu1 %v4419_v30  ;;  %1064 = vmatprep.mubr.f32.mxu0 %v6143_v45  ;;  %v869_v30 = vld [vmem:[%s5989_s8 + $0xaf8] sm:$0xff]  ;;  %v4301_v63 = vpack.c.bf16 %v873_v31, %v867_v50  ;;  %v886_v50 = vld [vmem:[%s5989_s8 + $0xb80] sm:$0xff] }
 0x180   : > { %1386 = vmatprep.mubr.f32.mxu1 %v6143_v45  ;;  %4294 = vmatprep.subr.bf16.mxu0 %v4293_v1  ;;  %v866_v1 = vld [vmem:[%s5989_s8 + $0xae0] sm:$0xff]  ;;  %v4429_v46 = vpack.c.bf16 %v875_v42, %v869_v30  ;;  %v897_v30 = vld [vmem:[%s5989_s8 + $0xbd8] sm:$0xff] }
 0x181   : > { %1065 = vmatmul.mubr.f32.gmra.mrb[22].mxu0 %v6140_v44  ;;  %4422 = vmatprep.subr.bf16.mxu1 %v4421_v35  ;;  %v868_v35 = vld [vmem:[%s5989_s8 + $0xaf0] sm:$0xff]  ;;  %v4303_v22 = vpack.c.bf16 %v872_v26, %v866_v1  ;;  %v899_v1 = vld [vmem:[%s5989_s8 + $0xbe8] sm:$0xff] }
 0x182   : > { %1387 = vmatmul.mubr.f32.gmra.mrb[22].mxu1 %v6140_v44  ;;  %4296 = vmatpush1.bf16.msra.mxu0 %v4295_v39  ;;  %v879_v39 = vld [vmem:[%s5989_s8 + $0xb48] sm:$0xff]  ;;  %v4431_v51 = vpack.c.bf16 %v874_v34, %v868_v35  ;;  %v896_v35 = vld [vmem:[%s5989_s8 + $0xbd0] sm:$0xff] }
 0x183   : > { %4424 = vmatpush1.bf16.msra.mxu1 %v4423_v27  ;;  %1070 = vmatprep.mubr.f32.mxu0 %v6155_v49  ;;  %v881_v27 = vld [vmem:[%s5989_s8 + $0xb58] sm:$0xff]  ;;  %v4305_v55 = vpack.c.bf16 %v885_v38, %v879_v39  ;;  %v898_v39 = vld [vmem:[%s5989_s8 + $0xbe0] sm:$0xff] }
 0x184   : > { %1392 = vmatprep.mubr.f32.mxu1 %v6155_v49  ;;  %4298 = vmatprep.subr.bf16.mxu0 %v4297_v62  ;;  %v878_v62 = vld [vmem:[%s5989_s8 + $0xb40] sm:$0xff]  ;;  %v4433_v31 = vpack.c.bf16 %v887_v59, %v881_v27  ;;  %v529_v27 = vld [vmem:[%s5989_s8 + $0x58] sm:$0xff] }
 0x185   : > { %1071 = vmatmul.mubr.f32.gmra.mrb[24].mxu0 %v6152_v48  ;;  %4426 = vmatprep.subr.bf16.mxu1 %v4425_v47  ;;  %v880_v47 = vld [vmem:[%s5989_s8 + $0xb50] sm:$0xff]  ;;  %v4307_v42 = vpack.c.bf16 %v884_v58, %v878_v62  ;;  %v522_v62 = vld [vmem:[%s5989_s8 + $0x20] sm:$0xff] }
 0x186   : > { %1393 = vmatmul.mubr.f32.gmra.mrb[24].mxu1 %v6152_v48  ;;  %4300 = vmatpush1.bf16.msra.mxu0 %v4299_v54  ;;  %v891_v54 = vld [vmem:[%s5989_s8 + $0xba8] sm:$0xff]  ;;  %v4435_v26 = vpack.c.bf16 %v886_v50, %v880_v47  ;;  %v528_v58 = vld [vmem:[%s5989_s8 + $0x50] sm:$0xff]  ;;  %v541_v50 = vld [vmem:[%s5989_s8 + $0xb8] sm:$0xff] }
 0x187   : > { %4428 = vmatpush1.bf16.msra.mxu1 %v4427_v43  ;;  %1076 = vmatprep.mubr.f32.mxu0 %v6167_v53  ;;  %v893_v43 = vld [vmem:[%s5989_s8 + $0xbb8] sm:$0xff]  ;;  %v4309_v34 = vpack.c.bf16 %v897_v30, %v891_v54  ;;  %v535_v47 = vld [vmem:[%s5989_s8 + $0x88] sm:$0xff]  ;;  %v534_v54 = vld [vmem:[%s5989_s8 + $0x80] sm:$0xff] }
 0x188   : > { %1398 = vmatprep.mubr.f32.mxu1 %v6167_v53  ;;  %4302 = vmatprep.subr.bf16.mxu0 %v4301_v63  ;;  %v890_v63 = vld [vmem:[%s5989_s8 + $0xba0] sm:$0xff]  ;;  %v4437_v38 = vpack.c.bf16 %v899_v1, %v893_v43  ;;  %v540_v30 = vld [vmem:[%s5989_s8 + $0xb0] sm:$0xff]  ;;  %v547_v43 = vld [vmem:[%s5989_s8 + $0xe8] sm:$0xff] }
 0x189   : > { %1077 = vmatmul.mubr.f32.gmra.mrb[26].mxu0 %v6164_v52  ;;  %4430 = vmatprep.subr.bf16.mxu1 %v4429_v46  ;;  %v892_v46 = vld [vmem:[%s5989_s8 + $0xbb0] sm:$0xff]  ;;  %v4311_v59 = vpack.c.bf16 %v896_v35, %v890_v63  ;;  %v553_v1 = vld [vmem:[%s5989_s8 + $0x118] sm:$0xff]  ;;  %v546_v63 = vld [vmem:[%s5989_s8 + $0xe0] sm:$0xff] }
 0x18a   : > { %1399 = vmatmul.mubr.f32.gmra.mrb[26].mxu1 %v6164_v52  ;;  %4304 = vmatpush1.bf16.msra.mxu0 %v4303_v22  ;;  %v523_v22 = vld [vmem:[%s5989_s8 + $0x28] sm:$0xff]  ;;  %v552_v35 = vld [vmem:[%s5989_s8 + $0x110] sm:$0xff] }
 0x18b   : > { %4432 = vmatpush1.bf16.msra.mxu1 %v4431_v51  ;;  %1082 = vmatprep.mubr.f32.mxu0 %v6179_v57  ;;  %v4439_v51 = vpack.c.bf16 %v898_v39, %v892_v46  ;;  %v559_v46 = vld [vmem:[%s5989_s8 + $0x148] sm:$0xff]  ;;  %v565_v39 = vld [vmem:[%s5989_s8 + $0x178] sm:$0xff] }
 0x18c   : > { %1404 = vmatprep.mubr.f32.mxu1 %v6179_v57  ;;  %4306 = vmatprep.subr.bf16.mxu0 %v4305_v55  ;;  %v4441_v55 = vpack.c.bf16 %v529_v27, %v523_v22  ;;  %v558_v22 = vld [vmem:[%s5989_s8 + $0x140] sm:$0xff]  ;;  %v564_v27 = vld [vmem:[%s5989_s8 + $0x170] sm:$0xff] }
 0x18d   : > { %1083 = vmatmul.mubr.f32.gmra.mrb[28].mxu0 %v6176_v56  ;;  %4434 = vmatprep.subr.bf16.mxu1 %v4433_v31  ;;  %v4443_v31 = vpack.c.bf16 %v528_v58, %v522_v62  ;;  %v577_v62 = vld [vmem:[%s5989_s8 + $0x1d8] sm:$0xff]  ;;  %v4455_v58 = vpack.c.bf16 %v564_v27, %v558_v22  ;;  %v607_v22 = vld [vmem:[%s5989_s8 + $0x2c8] sm:$0xff] }
 0x18e   : > { %1405 = vmatmul.mubr.f32.gmra.mrb[28].mxu1 %v6176_v56  ;;  %4308 = vmatpush1.bf16.msra.mxu0 %v4307_v42  ;;  %v4445_v42 = vpack.c.bf16 %v541_v50, %v535_v47  ;;  %v576_v47 = vld [vmem:[%s5989_s8 + $0x1d0] sm:$0xff]  ;;  %v613_v27 = vld [vmem:[%s5989_s8 + $0x2f8] sm:$0xff] }
 0x18f   : > { %4436 = vmatpush1.bf16.msra.mxu1 %v4435_v26  ;;  %1088 = vmatprep.mubr.f32.mxu0 %v6191_v61  ;;  %v4447_v26 = vpack.c.bf16 %v540_v30, %v534_v54  ;;  %v589_v54 = vld [vmem:[%s5989_s8 + $0x238] sm:$0xff] }
 0x190   : > { %1410 = vmatprep.mubr.f32.mxu1 %v6191_v61  ;;  %4310 = vmatprep.subr.bf16.mxu0 %v4309_v34  ;;  %v4449_v34 = vpack.c.bf16 %v553_v1, %v547_v43  ;;  %v588_v43 = vld [vmem:[%s5989_s8 + $0x230] sm:$0xff] }
 0x191   : > { %1089 = vmatmul.mubr.f32.gmra.mrb[30].mxu0 %v6188_v60  ;;  %4438 = vmatprep.subr.bf16.mxu1 %v4437_v38  ;;  %v4451_v38 = vpack.c.bf16 %v552_v35, %v546_v63  ;;  %v601_v63 = vld [vmem:[%s5989_s8 + $0x298] sm:$0xff] }
 0x192   : > { %1411 = vmatmul.mubr.f32.gmra.mrb[30].mxu1 %v6188_v60  ;;  %4312 = vmatpush1.bf16.msra.mxu0 %v4311_v59  ;;  %v4453_v59 = vpack.c.bf16 %v565_v39, %v559_v46  ;;  %v600_v46 = vld [vmem:[%s5989_s8 + $0x290] sm:$0xff] }
 0x193   : > { %4440 = vmatpush1.bf16.msra.mxu1 %v4439_v51  ;;  %1159 = vmatprep.mubr.f32.mxu0 %v6017_v3  ;;  %v571_v51 = vld [vmem:[%s5989_s8 + $0x1a8] sm:$0xff] }
 0x194   : > { %1481 = vmatprep.mubr.f32.mxu1 %v6017_v3  ;;  %4442 = vmatprep.subr.bf16.mxu0 %v4441_v55  ;;  %v570_v55 = vld [vmem:[%s5989_s8 + $0x1a0] sm:$0xff]  ;;  %v4457_v50 = vpack.c.bf16 %v577_v62, %v571_v51  ;;  %v7928_v51 = vld [vmem:[#allocation31_spill] sm:$0xff] }
 0x195   : > { %1160 = vmatmul.mubr.f32.vlgmr.msra.gmra.mrb[0].mxu0 %v6014_v2  ;;  %v4459_v30 = vpack.c.bf16 %v576_v47, %v570_v55  ;;  %v606_v62 = vld [vmem:[%s5989_s8 + $0x2c0] sm:$0xff]  ;;  %v4469_v55 = vpack.c.bf16 %v613_v27, %v607_v22  ;;  %v636_v22 = vld [vmem:[%s5989_s8 + $0x3b0] sm:$0xff] }
 0x196   : > { %1482 = vmatmul.mubr.f32.vlgmr.msra.gmra.mrb[0].mxu1 %v6014_v2  ;;  %4444 = vmatpush1.bf16.msra.mxu0 %v4443_v31  ;;  %v583_v31 = vld [vmem:[%s5989_s8 + $0x208] sm:$0xff]  ;;  %v7929_v47 = vld [vmem:[#allocation30_spill] sm:$0xff] }
 0x197   : > { %1165 = vmatprep.mubr.f32.mxu0 %v6029_v7  ;;  %1487 = vmatprep.mubr.f32.mxu1 %v6029_v7  ;;  %v4461_v1 = vpack.c.bf16 %v589_v54, %v583_v31  ;;  %v625_v31 = vld [vmem:[%s5989_s8 + $0x358] sm:$0xff] }
 0x198   : > { %4446 = vmatprep.subr.bf16.mxu0 %v4445_v42  ;;  %v582_v42 = vld [vmem:[%s5989_s8 + $0x200] sm:$0xff] }
 0x199   : > { %1166 = vmatmul.mubr.f32.gmra.mrb[2].mxu0 %v6026_v6  ;;  %v4463_v35 = vpack.c.bf16 %v588_v43, %v582_v42  ;;  %v618_v42 = vld [vmem:[%s5989_s8 + $0x320] sm:$0xff]  ;;  %v624_v43 = vld [vmem:[%s5989_s8 + $0x350] sm:$0xff] }
 0x19a   : > { %1488 = vmatmul.mubr.f32.gmra.mrb[2].mxu1 %v6026_v6  ;;  %4448 = vmatpush1.bf16.msra.mxu0 %v4447_v26  ;;  %v595_v26 = vld [vmem:[%s5989_s8 + $0x268] sm:$0xff] }
 0x19b   : > { %1171 = vmatprep.mubr.f32.mxu0 %v6041_v11  ;;  %1493 = vmatprep.mubr.f32.mxu1 %v6041_v11  ;;  %v4465_v39 = vpack.c.bf16 %v601_v63, %v595_v26  ;;  %v7931_v26 = vld [vmem:[#allocation32_spill] sm:$0xff]  ;;  %v631_v63 = vld [vmem:[%s5989_s8 + $0x388] sm:$0xff] }
 0x19c   : > { %4450 = vmatprep.subr.bf16.mxu0 %v4449_v34  ;;  %v594_v34 = vld [vmem:[%s5989_s8 + $0x260] sm:$0xff] }
 0x19d   : > { %1172 = vmatmul.mubr.f32.gmra.mrb[4].mxu0 %v6038_v10 }
 0x19e   : > { %1494 = vmatmul.mubr.f32.gmra.mrb[4].mxu1 %v6038_v10  ;;  %4452 = vmatpush1.bf16.msra.mxu0 %v4451_v38  ;;  %v7927_v38 = vld [vmem:[#allocation29_spill] sm:$0xff] }
 0x19f   : > { %1177 = vmatprep.mubr.f32.mxu0 %v6053_v15  ;;  %1499 = vmatprep.mubr.f32.mxu1 %v6053_v15 }
 0x1a0   : > { %4454 = vmatprep.subr.bf16.mxu0 %v4453_v59  ;;  %v4467_v59 = vpack.c.bf16 %v600_v46, %v594_v34  ;;  %v4475_v34 = vpack.c.bf16 %v624_v43, %v618_v42  ;;  %v7932_v46 = vld [vmem:[#allocation35_spill] sm:$0xff]  ;;  %v7935_v43 = vld [vmem:[#allocation36_spill] sm:$0xff] }
 0x1a1   : > { %1178 = vmatmul.mubr.f32.gmra.mrb[6].mxu0 %v6050_v14 }
 0x1a2   : > { %1500 = vmatmul.mubr.f32.gmra.mrb[6].mxu1 %v6050_v14  ;;  %4456 = vmatpush1.bf16.msra.mxu0 %v4455_v58  ;;  %v612_v58 = vld [vmem:[%s5989_s8 + $0x2f0] sm:$0xff] }
 0x1a3   : > { %1183 = vmatprep.mubr.f32.mxu0 %v6065_v19  ;;  %1505 = vmatprep.mubr.f32.mxu1 %v6065_v19  ;;  %v4471_v54 = vpack.c.bf16 %v612_v58, %v606_v62  ;;  %v643_v62 = vld [vmem:[%s5989_s8 + $0x3e8] sm:$0xff]  ;;  %v649_v58 = vld [vmem:[%s5989_s8 + $0x418] sm:$0xff] }
 0x1a4   : > { %4458 = vmatprep.subr.bf16.mxu0 %v4457_v50  ;;  %v619_v50 = vld [vmem:[%s5989_s8 + $0x328] sm:$0xff]  ;;  %v4481_v42 = vpack.c.bf16 %v649_v58, %v643_v62  ;;  %v7937_v62 = vld [vmem:[#allocation38_spill] sm:$0xff] }
 0x1a5   : > { %1184 = vmatmul.mubr.f32.gmra.mrb[8].mxu0 %v6062_v18  ;;  %v667_v58 = vld [vmem:[%s5989_s8 + $0x4a8] sm:$0xff] }
 0x1a6   : > { %1506 = vmatmul.mubr.f32.gmra.mrb[8].mxu1 %v6062_v18  ;;  %4460 = vmatpush1.bf16.msra.mxu0 %v4459_v30  ;;  %v7930_v30 = vld [vmem:[#allocation33_spill] sm:$0xff] }
 0x1a7   : > { %1189 = vmatprep.mubr.f32.mxu0 %v6077_v23  ;;  %1511 = vmatprep.mubr.f32.mxu1 %v6077_v23 }
 0x1a8   : > { %4462 = vmatprep.subr.bf16.mxu0 %v4461_v1  ;;  %v4473_v1 = vpack.c.bf16 %v625_v31, %v619_v50  ;;  %v7934_v50 = vld [vmem:[#allocation37_spill] sm:$0xff]  ;;  %v642_v31 = vld [vmem:[%s5989_s8 + $0x3e0] sm:$0xff] }
 0x1a9   : > { %1190 = vmatmul.mubr.f32.gmra.mrb[10].mxu0 %v7927_v38 }
 0x1aa   : > { %1512 = vmatmul.mubr.f32.gmra.mrb[10].mxu1 %v7927_v38  ;;  %4464 = vmatpush1.bf16.msra.mxu0 %v4463_v35  ;;  %v637_v35 = vld [vmem:[%s5989_s8 + $0x3b8] sm:$0xff] }
 0x1ab   : > { %1195 = vmatprep.mubr.f32.mxu0 %v7928_v51  ;;  %1517 = vmatprep.mubr.f32.mxu1 %v7928_v51  ;;  %v4477_v27 = vpack.c.bf16 %v637_v35, %v631_v63  ;;  %v661_v63 = vld [vmem:[%s5989_s8 + $0x478] sm:$0xff] }
 0x1ac   : > { %4466 = vmatprep.subr.bf16.mxu0 %v4465_v39  ;;  %v630_v39 = vld [vmem:[%s5989_s8 + $0x380] sm:$0xff] }
 0x1ad   : > { %1196 = vmatmul.mubr.f32.gmra.mrb[12].mxu0 %v7929_v47 }
 0x1ae   : > { %1518 = vmatmul.mubr.f32.gmra.mrb[12].mxu1 %v7929_v47  ;;  %4468 = vmatpush1.bf16.msra.mxu0 %v4467_v59  ;;  %v7933_v59 = vld [vmem:[#allocation34_spill] sm:$0xff] }
 0x1af   : > { %1201 = vmatprep.mubr.f32.mxu0 %v7930_v30  ;;  %1523 = vmatprep.mubr.f32.mxu1 %v7930_v30 }
 0x1b0   : > { %4470 = vmatprep.subr.bf16.mxu0 %v4469_v55  ;;  %v4479_v55 = vpack.c.bf16 %v636_v22, %v630_v39  ;;  %v654_v39 = vld [vmem:[%s5989_s8 + $0x440] sm:$0xff]  ;;  %v660_v22 = vld [vmem:[%s5989_s8 + $0x470] sm:$0xff] }
 0x1b1   : > { %1202 = vmatmul.mubr.f32.gmra.mrb[14].mxu0 %v7931_v26 }
 0x1b2   : > { %1524 = vmatmul.mubr.f32.gmra.mrb[14].mxu1 %v7931_v26  ;;  %4472 = vmatpush1.bf16.msra.mxu0 %v4471_v54  ;;  %v648_v54 = vld [vmem:[%s5989_s8 + $0x410] sm:$0xff] }
 0x1b3   : > { %1207 = vmatprep.mubr.f32.mxu0 %v7932_v46  ;;  %1529 = vmatprep.mubr.f32.mxu1 %v7932_v46  ;;  %v4483_v35 = vpack.c.bf16 %v648_v54, %v642_v31  ;;  %v7938_v31 = vld [vmem:[#allocation41_spill] sm:$0xff]  ;;  %v666_v54 = vld [vmem:[%s5989_s8 + $0x4a0] sm:$0xff] }
 0x1b4   : > { %4474 = vmatprep.subr.bf16.mxu0 %v4473_v1  ;;  %v655_v1 = vld [vmem:[%s5989_s8 + $0x448] sm:$0xff] }
 0x1b5   : > { %1208 = vmatmul.mubr.f32.gmra.mrb[16].mxu0 %v7933_v59 }
 0x1b6   : > { %1530 = vmatmul.mubr.f32.gmra.mrb[16].mxu1 %v7933_v59  ;;  %4476 = vmatpush1.bf16.msra.mxu0 %v4475_v34  ;;  %v7936_v34 = vld [vmem:[#allocation39_spill] sm:$0xff] }
 0x1b7   : > { %1213 = vmatprep.mubr.f32.mxu0 %v7934_v50  ;;  %1535 = vmatprep.mubr.f32.mxu1 %v7934_v50  ;;  %v673_v50 = vld [vmem:[%s5989_s8 + $0x4d8] sm:$0xff] }
 0x1b8   : > { %4478 = vmatprep.subr.bf16.mxu0 %v4477_v27  ;;  %v4485_v27 = vpack.c.bf16 %v661_v63, %v655_v1  ;;  %v7939_v1 = vld [vmem:[#allocation40_spill] sm:$0xff]  ;;  %v679_v63 = vld [vmem:[%s5989_s8 + $0x508] sm:$0xff] }
 0x1b9   : > { %1214 = vmatmul.mubr.f32.gmra.mrb[18].mxu0 %v7935_v43 }
 0x1ba   : > { %1536 = vmatmul.mubr.f32.gmra.mrb[18].mxu1 %v7935_v43  ;;  %4480 = vmatpush1.bf16.msra.mxu0 %v4479_v55  ;;  %v4487_v55 = vpack.c.bf16 %v660_v22, %v654_v39  ;;  %v685_v43 = vld [vmem:[%s5989_s8 + $0x538] sm:$0xff]  ;;  %v7940_v39 = vld [vmem:[#allocation43_spill] sm:$0xff]  ;;  %v678_v22 = vld [vmem:[%s5989_s8 + $0x500] sm:$0xff] }
 0x1bb   : > { %1219 = vmatprep.mubr.f32.mxu0 %v7936_v34  ;;  %1541 = vmatprep.mubr.f32.mxu1 %v7936_v34  ;;  %v672_v34 = vld [vmem:[%s5989_s8 + $0x4d0] sm:$0xff] }
 0x1bc   : > { %4482 = vmatprep.subr.bf16.mxu0 %v4481_v42  ;;  %v4489_v42 = vpack.c.bf16 %v673_v50, %v667_v58  ;;  %v4493_v50 = vpack.c.bf16 %v685_v43, %v679_v63  ;;  %v691_v58 = vld [vmem:[%s5989_s8 + $0x568] sm:$0xff] }
 0x1bd   : > { %1220 = vmatmul.mubr.f32.gmra.mrb[20].mxu0 %v7937_v62  ;;  %v703_v63 = vld [vmem:[%s5989_s8 + $0x5c8] sm:$0xff] }
 0x1be   : > { %1542 = vmatmul.mubr.f32.gmra.mrb[20].mxu1 %v7937_v62  ;;  %4484 = vmatpush1.bf16.msra.mxu0 %v4483_v35  ;;  %v4491_v35 = vpack.c.bf16 %v672_v34, %v666_v54  ;;  %v697_v62 = vld [vmem:[%s5989_s8 + $0x598] sm:$0xff]  ;;  %v690_v54 = vld [vmem:[%s5989_s8 + $0x560] sm:$0xff] }
 0x1bf   : > { %1225 = vmatprep.mubr.f32.mxu0 %v7938_v31  ;;  %1547 = vmatprep.mubr.f32.mxu1 %v7938_v31  ;;  %v684_v31 = vld [vmem:[%s5989_s8 + $0x530] sm:$0xff]  ;;  %v4497_v43 = vpack.c.bf16 %v697_v62, %v691_v58  ;;  %v721_v58 = vld [vmem:[%s5989_s8 + $0x658] sm:$0xff] }
 0x1c0   : > { %4486 = vmatprep.subr.bf16.mxu0 %v4485_v27  ;;  %v7941_v27 = vld [vmem:[#allocation42_spill] sm:$0xff]  ;;  %v4495_v34 = vpack.c.bf16 %v684_v31, %v678_v22  ;;  %v7944_v31 = vld [vmem:[#allocation47_spill] sm:$0xff] }
 0x1c1   : > { %1226 = vmatmul.mubr.f32.gmra.mrb[22].mxu0 %v7939_v1  ;;  %v702_v22 = vld [vmem:[%s5989_s8 + $0x5c0] sm:$0xff] }
 0x1c2   : > { %1548 = vmatmul.mubr.f32.gmra.mrb[22].mxu1 %v7939_v1  ;;  %4488 = vmatpush1.bf16.msra.mxu0 %v4487_v55  ;;  %v7942_v55 = vld [vmem:[#allocation45_spill] sm:$0xff] }
 0x1c3   : > { %1231 = vmatprep.mubr.f32.mxu0 %v7940_v39  ;;  %1553 = vmatprep.mubr.f32.mxu1 %v7940_v39  ;;  %v696_v39 = vld [vmem:[%s5989_s8 + $0x590] sm:$0xff]  ;;  %v709_v1 = vld [vmem:[%s5989_s8 + $0x5f8] sm:$0xff] }
 0x1c4   : > { %4490 = vmatprep.subr.bf16.mxu0 %v4489_v42  ;;  %v7943_v42 = vld [vmem:[#allocation44_spill] sm:$0xff]  ;;  %v4501_v62 = vpack.c.bf16 %v709_v1, %v703_v63  ;;  %v727_v1 = vld [vmem:[%s5989_s8 + $0x688] sm:$0xff]  ;;  %v733_v63 = vld [vmem:[%s5989_s8 + $0x6b8] sm:$0xff] }
 0x1c5   : > { %1232 = vmatmul.mubr.f32.gmra.mrb[24].mxu0 %v7941_v27 }
 0x1c6   : > { %1554 = vmatmul.mubr.f32.gmra.mrb[24].mxu1 %v7941_v27  ;;  %4492 = vmatpush1.bf16.msra.mxu0 %v4491_v35  ;;  %v4499_v35 = vpack.c.bf16 %v696_v39, %v690_v54  ;;  %v7945_v27 = vld [vmem:[#allocation46_spill] sm:$0xff] }
 0x1c7   : > { %1237 = vmatprep.mubr.f32.mxu0 %v7942_v55  ;;  %1559 = vmatprep.mubr.f32.mxu1 %v7942_v55  ;;  %v708_v55 = vld [vmem:[%s5989_s8 + $0x5f0] sm:$0xff] }
 0x1c8   : > { %4494 = vmatprep.subr.bf16.mxu0 %v4493_v50  ;;  %v715_v50 = vld [vmem:[%s5989_s8 + $0x628] sm:$0xff]  ;;  %v4503_v39 = vpack.c.bf16 %v708_v55, %v702_v22  ;;  %v4509_v22 = vpack.c.bf16 %v733_v63, %v727_v1  ;;  %v757_v1 = vld [vmem:[%s5989_s8 + $0x778] sm:$0xff]  ;;  %v750_v63 = vld [vmem:[%s5989_s8 + $0x740] sm:$0xff] }
 0x1c9   : > { %1238 = vmatmul.mubr.f32.gmra.mrb[26].mxu0 %v7943_v42  ;;  %v4505_v54 = vpack.c.bf16 %v721_v58, %v715_v50  ;;  %v726_v50 = vld [vmem:[%s5989_s8 + $0x680] sm:$0xff]  ;;  %v732_v58 = vld [vmem:[%s5989_s8 + $0x6b0] sm:$0xff] }
 0x1ca   : > { %1560 = vmatmul.mubr.f32.gmra.mrb[26].mxu1 %v7943_v42  ;;  %4496 = vmatpush1.bf16.msra.mxu0 %v4495_v34  ;;  %v7946_v34 = vld [vmem:[#allocation49_spill] sm:$0xff]  ;;  %v7947_v42 = vld [vmem:[#allocation48_spill] sm:$0xff] }
 0x1cb   : > { %1243 = vmatprep.mubr.f32.mxu0 %v7944_v31  ;;  %1565 = vmatprep.mubr.f32.mxu1 %v7944_v31  ;;  %v714_v31 = vld [vmem:[%s5989_s8 + $0x620] sm:$0xff] }
 0x1cc   : > { %4498 = vmatprep.subr.bf16.mxu0 %v4497_v43  ;;  %v720_v43 = vld [vmem:[%s5989_s8 + $0x650] sm:$0xff] }
 0x1cd   : > { %1244 = vmatmul.mubr.f32.gmra.mrb[28].mxu0 %v7945_v27  ;;  %v4507_v55 = vpack.c.bf16 %v720_v43, %v714_v31  ;;  %v738_v43 = vld [vmem:[%s5989_s8 + $0x6e0] sm:$0xff] }
 0x1ce   : > { %1566 = vmatmul.mubr.f32.gmra.mrb[28].mxu1 %v7945_v27  ;;  %4500 = vmatpush1.bf16.msra.mxu0 %v4499_v35  ;;  %v7948_v35 = vld [vmem:[#allocation28_spill] sm:$0xff] }
 0x1cf   : > { %1249 = vmatprep.mubr.f32.mxu0 %v7946_v34  ;;  %1571 = vmatprep.mubr.f32.mxu1 %v7946_v34  ;;  %v739_v34 = vld [vmem:[%s5989_s8 + $0x6e8] sm:$0xff] }
 0x1d0   : > { %4502 = vmatprep.subr.bf16.mxu0 %v4501_v62  ;;  %v745_v62 = vld [vmem:[%s5989_s8 + $0x718] sm:$0xff] }
 0x1d1   : > { %1250 = vmatmul.mubr.f32.gmra.mrb[30].mxu0 %v7947_v42  ;;  %v4513_v31 = vpack.c.bf16 %v745_v62, %v739_v34  ;;  %v769_v34 = vld [vmem:[%s5989_s8 + $0x7d8] sm:$0xff]  ;;  %v775_v62 = vld [vmem:[%s5989_s8 + $0x808] sm:$0xff] }
 0x1d2   : > { %1572 = vmatmul.mubr.f32.gmra.mrb[30].mxu1 %v7947_v42  ;;  %4504 = vmatpush1.bf16.msra.mxu0 %v4503_v39  ;;  %v4511_v39 = vpack.c.bf16 %v732_v58, %v726_v50  ;;  %v762_v50 = vld [vmem:[%s5989_s8 + $0x7a0] sm:$0xff]  ;;  %v768_v58 = vld [vmem:[%s5989_s8 + $0x7d0] sm:$0xff] }
 0x1d3   : > { %1642 = vmatprep.mubr.f32.mxu0 %v7948_v35  ;;  %4506 = vmatprep.subr.bf16.mxu0 %v4505_v54  ;;  %v744_v35 = vld [vmem:[%s5989_s8 + $0x710] sm:$0xff]  ;;  %v751_v54 = vld [vmem:[%s5989_s8 + $0x748] sm:$0xff] }
 0x1d5   : > { %1643 = vmatmul.mubr.f32.vlgmr.msra.gmra.mrb[32].mxu0 %v6008_v0  ;;  %v4515_v0 = vpack.c.bf16 %v744_v35, %v738_v43  ;;  %v780_v43 = vld [vmem:[%s5989_s8 + $0x830] sm:$0xff]  ;;  %v787_v35 = vld [vmem:[%s5989_s8 + $0x868] sm:$0xff] }
 0x1d6   : > { %4508 = vmatpush1.bf16.msra.mxu0 %v4507_v55  ;;  %1648 = vmatprep.mubr.f32.mxu0 %v6023_v5  ;;  %v4517_v5 = vpack.c.bf16 %v757_v1, %v751_v54  ;;  %v756_v55 = vld [vmem:[%s5989_s8 + $0x770] sm:$0xff]  ;;  %v793_v54 = vld [vmem:[%s5989_s8 + $0x898] sm:$0xff]  ;;  %v786_v1 = vld [vmem:[%s5989_s8 + $0x860] sm:$0xff] }
 0x1d7   : > { %4510 = vmatprep.subr.bf16.mxu0 %v4509_v22  ;;  %v763_v22 = vld [vmem:[%s5989_s8 + $0x7a8] sm:$0xff] }
 0x1d9   : > { %1649 = vmatmul.mubr.f32.gmra.mrb[34].mxu0 %v6020_v4  ;;  %v4519_v4 = vpack.c.bf16 %v756_v55, %v750_v63  ;;  %v805_v63 = vld [vmem:[%s5989_s8 + $0x8f8] sm:$0xff]  ;;  %v798_v55 = vld [vmem:[%s5989_s8 + $0x8c0] sm:$0xff] }
 0x1da   : > { %4512 = vmatpush1.bf16.msra.mxu0 %v4511_v39  ;;  %1654 = vmatprep.mubr.f32.mxu0 %v6035_v9  ;;  %v4521_v9 = vpack.c.bf16 %v769_v34, %v763_v22  ;;  %v781_v39 = vld [vmem:[%s5989_s8 + $0x838] sm:$0xff]  ;;  %v804_v22 = vld [vmem:[%s5989_s8 + $0x8f0] sm:$0xff]  ;;  %v811_v34 = vld [vmem:[%s5989_s8 + $0x928] sm:$0xff] }
 0x1db   : > { %4514 = vmatprep.subr.bf16.mxu0 %v4513_v31  ;;  %v774_v31 = vld [vmem:[%s5989_s8 + $0x800] sm:$0xff] }
 0x1dd   : > { %1655 = vmatmul.mubr.f32.gmra.mrb[36].mxu0 %v6032_v8  ;;  %v4523_v8 = vpack.c.bf16 %v768_v58, %v762_v50  ;;  %v816_v50 = vld [vmem:[%s5989_s8 + $0x950] sm:$0xff]  ;;  %v823_v58 = vld [vmem:[%s5989_s8 + $0x988] sm:$0xff] }
 0x1de   : > { %4516 = vmatpush1.bf16.msra.mxu0 %v4515_v0  ;;  %1660 = vmatprep.mubr.f32.mxu0 %v6047_v13  ;;  %v4525_v13 = vpack.c.bf16 %v781_v39, %v775_v62  ;;  %v792_v0 = vld [vmem:[%s5989_s8 + $0x890] sm:$0xff]  ;;  %v829_v62 = vld [vmem:[%s5989_s8 + $0x9b8] sm:$0xff]  ;;  %v822_v39 = vld [vmem:[%s5989_s8 + $0x980] sm:$0xff] }
 0x1df   : > { %4518 = vmatprep.subr.bf16.mxu0 %v4517_v5  ;;  %v799_v5 = vld [vmem:[%s5989_s8 + $0x8c8] sm:$0xff] }
 0x1e1   : > { %1661 = vmatmul.mubr.f32.gmra.mrb[38].mxu0 %v6044_v12  ;;  %v4527_v12 = vpack.c.bf16 %v780_v43, %v774_v31  ;;  %v841_v31 = vld [vmem:[%s5989_s8 + $0xa18] sm:$0xff]  ;;  %v834_v43 = vld [vmem:[%s5989_s8 + $0x9e0] sm:$0xff] }
 0x1e2   : > { %4520 = vmatpush1.bf16.msra.mxu0 %v4519_v4  ;;  %1666 = vmatprep.mubr.f32.mxu0 %v6059_v17  ;;  %v4529_v17 = vpack.c.bf16 %v793_v54, %v787_v35  ;;  %v817_v4 = vld [vmem:[%s5989_s8 + $0x958] sm:$0xff]  ;;  %v840_v35 = vld [vmem:[%s5989_s8 + $0xa10] sm:$0xff]  ;;  %v847_v54 = vld [vmem:[%s5989_s8 + $0xa48] sm:$0xff] }
 0x1e3   : > { %4522 = vmatprep.subr.bf16.mxu0 %v4521_v9  ;;  %v810_v9 = vld [vmem:[%s5989_s8 + $0x920] sm:$0xff] }
 0x1e5   : > { %1667 = vmatmul.mubr.f32.gmra.mrb[40].mxu0 %v6056_v16  ;;  %v4531_v16 = vpack.c.bf16 %v792_v0, %v786_v1  ;;  %v852_v1 = vld [vmem:[%s5989_s8 + $0xa70] sm:$0xff]  ;;  %v859_v0 = vld [vmem:[%s5989_s8 + $0xaa8] sm:$0xff] }
 0x1e6   : > { %4524 = vmatpush1.bf16.msra.mxu0 %v4523_v8  ;;  %1672 = vmatprep.mubr.f32.mxu0 %v6071_v21  ;;  %v4533_v21 = vpack.c.bf16 %v805_v63, %v799_v5  ;;  %v828_v8 = vld [vmem:[%s5989_s8 + $0x9b0] sm:$0xff]  ;;  %v865_v5 = vld [vmem:[%s5989_s8 + $0xad8] sm:$0xff]  ;;  %v858_v63 = vld [vmem:[%s5989_s8 + $0xaa0] sm:$0xff] }
 0x1e7   : > { %4526 = vmatprep.subr.bf16.mxu0 %v4525_v13  ;;  %v835_v13 = vld [vmem:[%s5989_s8 + $0x9e8] sm:$0xff] }
 0x1e9   : > { %1673 = vmatmul.mubr.f32.gmra.mrb[42].mxu0 %v6068_v20  ;;  %v4535_v20 = vpack.c.bf16 %v804_v22, %v798_v55  ;;  %v877_v55 = vld [vmem:[%s5989_s8 + $0xb38] sm:$0xff]  ;;  %v870_v22 = vld [vmem:[%s5989_s8 + $0xb00] sm:$0xff] }
 0x1ea   : > { %4528 = vmatpush1.bf16.msra.mxu0 %v4527_v12  ;;  %1678 = vmatprep.mubr.f32.mxu0 %v6083_v25  ;;  %v4537_v25 = vpack.c.bf16 %v817_v4, %v811_v34  ;;  %v853_v12 = vld [vmem:[%s5989_s8 + $0xa78] sm:$0xff]  ;;  %v876_v34 = vld [vmem:[%s5989_s8 + $0xb30] sm:$0xff]  ;;  %v883_v4 = vld [vmem:[%s5989_s8 + $0xb68] sm:$0xff] }
 0x1eb   : > { %4530 = vmatprep.subr.bf16.mxu0 %v4529_v17  ;;  %v846_v17 = vld [vmem:[%s5989_s8 + $0xa40] sm:$0xff] }
 0x1ed   : > { %1679 = vmatmul.mubr.f32.gmra.mrb[44].mxu0 %v6080_v24  ;;  %v4539_v24 = vpack.c.bf16 %v816_v50, %v810_v9  ;;  %v888_v9 = vld [vmem:[%s5989_s8 + $0xb90] sm:$0xff]  ;;  %v895_v50 = vld [vmem:[%s5989_s8 + $0xbc8] sm:$0xff] }
 0x1ee   : > { %4532 = vmatpush1.bf16.msra.mxu0 %v4531_v16  ;;  %1684 = vmatprep.mubr.f32.mxu0 %v6095_v29  ;;  %v4541_v29 = vpack.c.bf16 %v829_v62, %v823_v58  ;;  %v864_v16 = vld [vmem:[%s5989_s8 + $0xad0] sm:$0xff]  ;;  %v901_v58 = vld [vmem:[%s5989_s8 + $0xbf8] sm:$0xff] }
 0x1ef   : > { %4534 = vmatprep.subr.bf16.mxu0 %v4533_v21  ;;  %v871_v21 = vld [vmem:[%s5989_s8 + $0xb08] sm:$0xff] }
 0x1f1   : > { %1685 = vmatmul.mubr.f32.gmra.mrb[46].mxu0 %v6092_v28  ;;  %v4543_v28 = vpack.c.bf16 %v828_v8, %v822_v39 }
 0x1f2   : > { %4536 = vmatpush1.bf16.msra.mxu0 %v4535_v20  ;;  %1690 = vmatprep.mubr.f32.mxu0 %v6107_v33  ;;  %v4545_v33 = vpack.c.bf16 %v841_v31, %v835_v13  ;;  %v889_v20 = vld [vmem:[%s5989_s8 + $0xb98] sm:$0xff] }
 0x1f3   : > { %4538 = vmatprep.subr.bf16.mxu0 %v4537_v25  ;;  %v4561_v25 = vpack.c.bf16 %v889_v20, %v883_v4 }
 0x1f5   : > { %1691 = vmatmul.mubr.f32.gmra.mrb[48].mxu0 %v6104_v32  ;;  %v4547_v32 = vpack.c.bf16 %v840_v35, %v834_v43 }
 0x1f6   : > { %4540 = vmatpush1.bf16.msra.mxu0 %v4539_v24  ;;  %1696 = vmatprep.mubr.f32.mxu0 %v6119_v37  ;;  %v4549_v37 = vpack.c.bf16 %v853_v12, %v847_v54  ;;  %v894_v24 = vld [vmem:[%s5989_s8 + $0xbc0] sm:$0xff] }
 0x1f7   : > { %4542 = vmatprep.subr.bf16.mxu0 %v4541_v29  ;;  %v900_v29 = vld [vmem:[%s5989_s8 + $0xbf0] sm:$0xff] }
 0x1f9   : > { %1697 = vmatmul.mubr.f32.gmra.mrb[50].mxu0 %v6116_v36  ;;  %v4551_v36 = vpack.c.bf16 %v852_v1, %v846_v17 }
 0x1fa   : > { %4544 = vmatpush1.bf16.msra.mxu0 %v4543_v28  ;;  %1702 = vmatprep.mubr.f32.mxu0 %v6131_v41  ;;  %v4553_v41 = vpack.c.bf16 %v865_v5, %v859_v0 }
 0x1fb   : > { %4546 = vmatprep.subr.bf16.mxu0 %v4545_v33 }
 0x1fd   : > { %1703 = vmatmul.mubr.f32.gmra.mrb[52].mxu0 %v6128_v40  ;;  %v4555_v40 = vpack.c.bf16 %v864_v16, %v858_v63 }
 0x1fe   : > { %4548 = vmatpush1.bf16.msra.mxu0 %v4547_v32  ;;  %1708 = vmatprep.mubr.f32.mxu0 %v6143_v45  ;;  %v4557_v45 = vpack.c.bf16 %v877_v55, %v871_v21 }
 0x1ff   : > { %4550 = vmatprep.subr.bf16.mxu0 %v4549_v37 }
 0x201   : > { %1709 = vmatmul.mubr.f32.gmra.mrb[54].mxu0 %v6140_v44  ;;  %v4559_v44 = vpack.c.bf16 %v876_v34, %v870_v22 }
 0x202   : > { %4552 = vmatpush1.bf16.msra.mxu0 %v4551_v36  ;;  %1714 = vmatprep.mubr.f32.mxu0 %v6155_v49  ;;  %v882_v49 = vld [vmem:[%s5989_s8 + $0xb60] sm:$0xff] }
 0x203   : > { %4554 = vmatprep.subr.bf16.mxu0 %v4553_v41  ;;  %v4563_v62 = vpack.c.bf16 %v888_v9, %v882_v49 }
 0x205   : > { %1715 = vmatmul.mubr.f32.gmra.mrb[56].mxu0 %v6152_v48  ;;  %v4565_v48 = vpack.c.bf16 %v901_v58, %v895_v50 }
 0x206   : > { %4556 = vmatpush1.bf16.msra.mxu0 %v4555_v40  ;;  %1720 = vmatprep.mubr.f32.mxu0 %v6167_v53  ;;  %v4567_v53 = vpack.c.bf16 %v900_v29, %v894_v24 }
 0x207   : > { %4558 = vmatprep.subr.bf16.mxu0 %v4557_v45 }
 0x209   : > { %1721 = vmatmul.mubr.f32.gmra.mrb[58].mxu0 %v6164_v52  ;;  %v7960_v52 = vld [vmem:[#allocation49_spill] sm:$0xff] }
 0x20a   : > { %4560 = vmatpush1.bf16.msra.mxu0 %v4559_v44  ;;  %1726 = vmatprep.mubr.f32.mxu0 %v6179_v57 }
 0x20b   : > { %4562 = vmatprep.subr.bf16.mxu0 %v4561_v25 }
 0x20d   : > { %1727 = vmatmul.mubr.f32.gmra.mrb[60].mxu0 %v6176_v56  ;;  %v904_v56 = vlaneseq }
 0x20e   : > { %4564 = vmatpush1.bf16.msra.mxu0 %v4563_v62  ;;  %1732 = vmatprep.mubr.f32.mxu0 %v6191_v61  ;;  %v6848_v61 = vld [vmem:[%s5995_s7] sm:$0x3f] }
 0x20f   : > { %4566 = vmatprep.subr.bf16.mxu0 %v4565_v48  ;;  %v6844_v57 = vshrl.u32 %v904_v56, 7 }
 0x211   : > { %1733 = vmatmul.mubr.f32.gmra.mrb[62].mxu0 %v6188_v60  ;;  %v906_v60 = vsub.s32 0, %v6844_v57 }
 0x212   : > { %4568 = vmatpush1.bf16.msra.mxu0 %v4567_v53  ;;  %1803 = vmatprep.mubr.f32.mxu0 %v6017_v3  ;;  %v7950_v3 = vld [vmem:[#allocation36_spill] sm:$0xff] }
 0x215   : > { %1804 = vmatmul.mubr.f32.vlgmr.msra.gmra.mrb[32].mxu0 %v6014_v2  ;;  %v7949_v2 = vld [vmem:[#allocation37_spill] sm:$0xff] }
 0x216   : > { %1809 = vmatprep.mubr.f32.mxu0 %v6029_v7  ;;  %v7952_v7 = vld [vmem:[#allocation38_spill] sm:$0xff] }
 0x219   : > { %1810 = vmatmul.mubr.f32.gmra.mrb[34].mxu0 %v6026_v6  ;;  %v7951_v6 = vld [vmem:[#allocation39_spill] sm:$0xff] }
 0x21a   : > { %1815 = vmatprep.mubr.f32.mxu0 %v6041_v11  ;;  %v7954_v11 = vld [vmem:[#allocation40_spill] sm:$0xff] }
 0x21d   : > { %1816 = vmatmul.mubr.f32.gmra.mrb[36].mxu0 %v6038_v10  ;;  %v7953_v10 = vld [vmem:[#allocation41_spill] sm:$0xff] }
 0x21e   : > { %1821 = vmatprep.mubr.f32.mxu0 %v6053_v15  ;;  %v7956_v15 = vld [vmem:[#allocation42_spill] sm:$0xff] }
 0x221   : > { %1822 = vmatmul.mubr.f32.gmra.mrb[38].mxu0 %v6050_v14  ;;  %v7955_v14 = vld [vmem:[#allocation43_spill] sm:$0xff] }
 0x222   : > { %1827 = vmatprep.mubr.f32.mxu0 %v6065_v19  ;;  %v7958_v19 = vld [vmem:[#allocation44_spill] sm:$0xff] }
 0x225   : > { %1828 = vmatmul.mubr.f32.gmra.mrb[40].mxu0 %v6062_v18  ;;  %v7957_v18 = vld [vmem:[#allocation45_spill] sm:$0xff] }
 0x226   : > { %1833 = vmatprep.mubr.f32.mxu0 %v6077_v23  ;;  %v7959_v23 = vld [vmem:[#allocation47_spill] sm:$0xff] }
 0x229   : > { %1834 = vmatmul.mubr.f32.gmra.mrb[42].mxu0 %v7927_v38  ;;  %v6853_v38 = vrot.slane %v6848_v61, %v906_v60 }
 0x22a   : > { %1839 = vmatprep.mubr.f32.mxu0 %v7928_v51  ;;  %v914_v51 = vsub.s32 2, %v6844_v57 }
 0x22d   : > { %1840 = vmatmul.mubr.f32.gmra.mrb[44].mxu0 %v7929_v47  ;;  %v918_v47 = vsub.s32 3, %v6844_v57 }
 0x22e   : > { %1845 = vmatprep.mubr.f32.mxu0 %v7930_v30 }
 0x22f   : > { %v6868_v39 = vrot.slane %v6848_v61, %v918_v47 }
 0x231   : > { %1846 = vmatmul.mubr.f32.gmra.mrb[46].mxu0 %v7931_v26 }
 0x232   : > { %1851 = vmatprep.mubr.f32.mxu0 %v7932_v46 }
 0x235   : > { %1852 = vmatmul.mubr.f32.gmra.mrb[48].mxu0 %v7933_v59 }
 0x236   : > { %1857 = vmatprep.mubr.f32.mxu0 %v7949_v2 }
 0x239   : > { %1858 = vmatmul.mubr.f32.gmra.mrb[50].mxu0 %v7950_v3 }
 0x23a   : > { %1863 = vmatprep.mubr.f32.mxu0 %v7951_v6 }
 0x23d   : > { %1864 = vmatmul.mubr.f32.gmra.mrb[52].mxu0 %v7952_v7 }
 0x23e   : > { %1869 = vmatprep.mubr.f32.mxu0 %v7953_v10 }
 0x241   : > { %1870 = vmatmul.mubr.f32.gmra.mrb[54].mxu0 %v7954_v11 }
 0x242   : > { %1875 = vmatprep.mubr.f32.mxu0 %v7955_v14 }
 0x245   : > { %1876 = vmatmul.mubr.f32.gmra.mrb[56].mxu0 %v7956_v15 }
 0x246   : > { %1881 = vmatprep.mubr.f32.mxu0 %v7957_v18 }
 0x249   : > { %1882 = vmatmul.mubr.f32.gmra.mrb[58].mxu0 %v7958_v19 }
 0x24a   : > { %1887 = vmatprep.mubr.f32.mxu0 %v7959_v23 }
 0x24d   : > { %1888 = vmatmul.mubr.f32.gmra.mrb[60].mxu0 %v7945_v27  ;;  %v6863_v27 = vrot.slane %v6848_v61, %v914_v51 }
 0x24e   : > { %1893 = vmatprep.mubr.f32.mxu0 %v7960_v52 }
 0x251   : > { %1894 = vmatmul.mubr.f32.gmra.mrb[62].mxu0 %v7947_v42 }
 0x268   : > { %v1161_v30 = vpop.f32.mrb[0].mxu0 }
 0x269   : > { %v1483_v26 = vpop.f32.mrb[0].mxu1  ;;  %v4857_v46 = vadd.f32 %v1161_v30, %v6853_v38  ;;  %v6858_v59 = vpop.f32.mrb[1].mxu0 }
 0x26a   : > { %v1485_v42 = vpop.f32.mrb[1].mxu1  ;;  %v4889_v33 = vadd.f32 %v1483_v26, %v6863_v27 }
 0x26b   : > { %3993 = vmatprep.mubr.f32.mxu1 %v4857_v46  ;;  %v4890_v54 = vadd.f32 %v1485_v42, %v6868_v39 }
 0x26c   : > { %v1167_v8 = vpop.f32.mrb[2].mxu0 }
 0x26d   : > { %v1489_v13 = vpop.f32.mrb[2].mxu1  ;;  %v6871_v31 = vadd.f32 %v1167_v8, %v6853_v38  ;;  %v6873_v28 = vpop.f32.mrb[3].mxu0 }
 0x26e   : > { %v4891_v43 = vadd.f32 %v1489_v13, %v6863_v27  ;;  %v1491_v35 = vpop.f32.mrb[3].mxu1 }
 0x26f   : > { %v4892_v12 = vadd.f32 %v1491_v35, %v6868_v39 }
 0x270   : > { %v4569_v32 = vpack.c.bf16 %v4891_v43, %v4889_v33  ;;  %v1173_v37 = vpop.f32.mrb[4].mxu0 }
 0x271   : > { %v6879_v17 = vpack.c.bf16 %v4892_v12, %v4890_v54  ;;  %v1495_v1 = vpop.f32.mrb[4].mxu1  ;;  %v6882_v0 = vadd.f32 %v1173_v37, %v6853_v38  ;;  %v6884_v5 = vpop.f32.mrb[5].mxu0 }
 0x272   : > { %v1497_v36 = vpop.f32.mrb[5].mxu1  ;;  %4570 = vmatprep.subr.bf16.mxu1 %v4569_v32  ;;  %v4893_v40 = vadd.f32 %v1495_v1, %v6863_v27 }
 0x273   : > { %v4894_v41 = vadd.f32 %v1497_v36, %v6868_v39  ;;  %4572 = vmatpush3.bf16.xpose.msra.mxu1 %v4569_v32 }
 0x274   : > { %v1179_v63 = vpop.f32.mrb[6].mxu0 }
 0x275   : > { %v1501_v16 = vpop.f32.mrb[6].mxu1  ;;  %v6888_v21 = vadd.f32 %v1179_v63, %v6853_v38  ;;  %v6890_v55 = vpop.f32.mrb[7].mxu0 }
 0x276   : > { %v4895_v45 = vadd.f32 %v1501_v16, %v6863_v27  ;;  %v1503_v22 = vpop.f32.mrb[7].mxu1 }
 0x277   : > { %v4896_v34 = vadd.f32 %v1503_v22, %v6868_v39 }
 0x278   : > { %v4573_v4 = vpack.c.bf16 %v4895_v45, %v4893_v40  ;;  %v1185_v20 = vpop.f32.mrb[8].mxu0 }
 0x279   : > { %v6895_v44 = vpack.c.bf16 %v4896_v34, %v4894_v41  ;;  %v1507_v25 = vpop.f32.mrb[8].mxu1  ;;  %v6898_v49 = vadd.f32 %v1185_v20, %v6853_v38  ;;  %v6900_v9 = vpop.f32.mrb[9].mxu0 }
 0x27a   : > { %v1509_v50 = vpop.f32.mrb[9].mxu1  ;;  %4574 = vmatprep.subr.bf16.mxu1 %v4573_v4  ;;  %v4897_v53 = vadd.f32 %v1507_v25, %v6863_v27 }
 0x27b   : > { %v4898_v58 = vadd.f32 %v1509_v50, %v6868_v39  ;;  %4576 = vmatpush3.bf16.xpose.msra.mxu1 %v4573_v4 }
 0x27c   : > { %v1191_v62 = vpop.f32.mrb[10].mxu0 }
 0x27d   : > { %v1513_v48 = vpop.f32.mrb[10].mxu1  ;;  %v6904_v24 = vadd.f32 %v1191_v62, %v6853_v38  ;;  %v6906_v29 = vpop.f32.mrb[11].mxu0 }
 0x27e   : > { %v4899_v2 = vadd.f32 %v1513_v48, %v6863_v27  ;;  %v1515_v3 = vpop.f32.mrb[11].mxu1 }
 0x27f   : > { %v4900_v6 = vadd.f32 %v1515_v3, %v6868_v39 }
 0x280   : > { %v4577_v7 = vpack.c.bf16 %v4899_v2, %v4897_v53  ;;  %v1197_v10 = vpop.f32.mrb[12].mxu0 }
 0x281   : > { %v6911_v11 = vpack.c.bf16 %v4900_v6, %v4898_v58  ;;  %v1519_v14 = vpop.f32.mrb[12].mxu1  ;;  %v6914_v15 = vadd.f32 %v1197_v10, %v6853_v38  ;;  %v6916_v18 = vpop.f32.mrb[13].mxu0 }
 0x282   : > { %v1521_v19 = vpop.f32.mrb[13].mxu1  ;;  %4578 = vmatprep.subr.bf16.mxu1 %v4577_v7  ;;  %v4901_v46 = vadd.f32 %v1519_v14, %v6863_v27 }
 0x283   : > { %v4902_v23 = vadd.f32 %v1521_v19, %v6868_v39  ;;  %4580 = vmatpush3.bf16.xpose.msra.mxu1 %v4577_v7 }
 0x284   : > { %v1203_v52 = vpop.f32.mrb[14].mxu0 }
 0x285   : > { %v1525_v56 = vpop.f32.mrb[14].mxu1  ;;  %v6920_v30 = vadd.f32 %v1203_v52, %v6853_v38  ;;  %v6922_v26 = vpop.f32.mrb[15].mxu0 }
 0x286   : > { %v4903_v42 = vadd.f32 %v1525_v56, %v6863_v27  ;;  %v1527_v8 = vpop.f32.mrb[15].mxu1 }
 0x287   : > { %v4904_v13 = vadd.f32 %v1527_v8, %v6868_v39 }
 0x288   : > { %v4581_v33 = vpack.c.bf16 %v4903_v42, %v4901_v46  ;;  %v1209_v43 = vpop.f32.mrb[16].mxu0 }
 0x289   : > { %v6927_v35 = vpack.c.bf16 %v4904_v13, %v4902_v23  ;;  %v1531_v54 = vpop.f32.mrb[16].mxu1  ;;  %v6930_v12 = vadd.f32 %v1209_v43, %v6853_v38  ;;  %v6932_v32 = vpop.f32.mrb[17].mxu0 }
 0x28a   : > { %v1533_v37 = vpop.f32.mrb[17].mxu1  ;;  %4582 = vmatprep.subr.bf16.mxu1 %v4581_v33  ;;  %v4905_v40 = vadd.f32 %v1531_v54, %v6863_v27 }
 0x28b   : > { %v4906_v1 = vadd.f32 %v1533_v37, %v6868_v39  ;;  %4584 = vmatpush3.bf16.xpose.msra.mxu1 %v4581_v33 }
 0x28c   : > { %v1215_v36 = vpop.f32.mrb[18].mxu0 }
 0x28d   : > { %v1537_v41 = vpop.f32.mrb[18].mxu1  ;;  %v6936_v63 = vadd.f32 %v1215_v36, %v6853_v38  ;;  %v6938_v16 = vpop.f32.mrb[19].mxu0 }
 0x28e   : > { %v4907_v45 = vadd.f32 %v1537_v41, %v6863_v27  ;;  %v1539_v22 = vpop.f32.mrb[19].mxu1 }
 0x28f   : > { %v4908_v34 = vadd.f32 %v1539_v22, %v6868_v39 }
 0x290   : > { %v4585_v4 = vpack.c.bf16 %v4907_v45, %v4905_v40  ;;  %v1221_v20 = vpop.f32.mrb[20].mxu0 }
 0x291   : > { %v6943_v25 = vpack.c.bf16 %v4908_v34, %v4906_v1  ;;  %v1543_v50 = vpop.f32.mrb[20].mxu1  ;;  %v6946_v58 = vadd.f32 %v1221_v20, %v6853_v38  ;;  %v6948_v62 = vpop.f32.mrb[21].mxu0  ;;  %v910_v34 = vsub.s32 1, %v6844_v57 }
 0x292   : > { %v1545_v48 = vpop.f32.mrb[21].mxu1  ;;  %4586 = vmatprep.subr.bf16.mxu1 %v4585_v4  ;;  %v4909_v10 = vadd.f32 %v1543_v50, %v6863_v27 }
 0x293   : > { %v4910_v53 = vadd.f32 %v1545_v48, %v6868_v39  ;;  %4588 = vmatpush3.bf16.xpose.msra.mxu1 %v4585_v4 }
 0x294   : > { %v1227_v2 = vpop.f32.mrb[22].mxu0 }
 0x295   : > { %v1549_v3 = vpop.f32.mrb[22].mxu1  ;;  %v4879_v6 = vadd.f32 %v1227_v2, %v6853_v38  ;;  %v6952_v7 = vpop.f32.mrb[23].mxu0 }
 0x296   : > { %v4911_v14 = vadd.f32 %v1549_v3, %v6863_v27  ;;  %v1551_v19 = vpop.f32.mrb[23].mxu1 }
 0x297   : > { %v4912_v23 = vadd.f32 %v1551_v19, %v6868_v39 }
 0x298   : > { %v4589_v52 = vpack.c.bf16 %v4911_v14, %v4909_v10  ;;  %v1233_v56 = vpop.f32.mrb[24].mxu0  ;;  %v6979_v14 = vrot.slane %v6848_v61, %v910_v34 }
 0x299   : > { %v6957_v46 = vpack.c.bf16 %v4912_v23, %v4910_v53  ;;  %v1555_v42 = vpop.f32.mrb[24].mxu1  ;;  %v4881_v8 = vadd.f32 %v1233_v56, %v6853_v38  ;;  %v6960_v13 = vpop.f32.mrb[25].mxu0 }
 0x29a   : > { %v1557_v33 = vpop.f32.mrb[25].mxu1  ;;  %4590 = vmatprep.subr.bf16.mxu1 %v4589_v52  ;;  %v4913_v41 = vadd.f32 %v1555_v42, %v6863_v27 }
 0x29b   : > { %v4914_v43 = vadd.f32 %v1557_v33, %v6868_v39  ;;  %4592 = vmatpush3.bf16.xpose.msra.mxu1 %v4589_v52 }
 0x29c   : > { %v1239_v54 = vpop.f32.mrb[26].mxu0 }
 0x29d   : > { %v1561_v37 = vpop.f32.mrb[26].mxu1  ;;  %v4883_v1 = vadd.f32 %v1239_v54, %v6853_v38  ;;  %v6964_v36 = vpop.f32.mrb[27].mxu0 }
 0x29e   : > { %v4915_v40 = vadd.f32 %v1561_v37, %v6863_v27  ;;  %v1563_v45 = vpop.f32.mrb[27].mxu1 }
 0x29f   : > { %v4916_v22 = vadd.f32 %v1563_v45, %v6868_v39 }
 0x2a0   : > { %v4593_v4 = vpack.c.bf16 %v4915_v40, %v4913_v41  ;;  %v1245_v20 = vpop.f32.mrb[28].mxu0 }
 0x2a1   : > { %v6970_v50 = vpack.c.bf16 %v4916_v22, %v4914_v43  ;;  %v1567_v48 = vpop.f32.mrb[28].mxu1  ;;  %v4885_v53 = vadd.f32 %v1245_v20, %v6853_v38  ;;  %v6973_v2 = vpop.f32.mrb[29].mxu0 }
 0x2a2   : > { %v1569_v3 = vpop.f32.mrb[29].mxu1  ;;  %4594 = vmatprep.subr.bf16.mxu1 %v4593_v4  ;;  %v4917_v42 = vadd.f32 %v1567_v48, %v6863_v27 }
 0x2a3   : > { %v4918_v10 = vadd.f32 %v1569_v3, %v6868_v39  ;;  %4596 = vmatpush3.bf16.xpose.msra.mxu1 %v4593_v4 }
 0x2a4   : > { %v1251_v19 = vpop.f32.mrb[30].mxu0 }
 0x2a5   : > { %v1573_v23 = vpop.f32.mrb[30].mxu1  ;;  %v4887_v52 = vadd.f32 %v1251_v19, %v6853_v38  ;;  %v1253_v56 = vpop.f32.mrb[31].mxu0  ;;  %v922_v38 = vsub.s32 4, %v6844_v57 }
 0x2a6   : > { %v4919_v33 = vadd.f32 %v1573_v23, %v6863_v27  ;;  %v1575_v43 = vpop.f32.mrb[31].mxu1  ;;  %v6985_v54 = vadd.f32 %v1253_v56, %v6979_v14  ;;  %v926_v27 = vsub.s32 5, %v6844_v57 }
 0x2a7   : > { %v4920_v37 = vadd.f32 %v1575_v43, %v6868_v39  ;;  %v7003_v39 = vrot.slane %v6848_v61, %v922_v38 }
 0x2a8   : > { %v4597_v41 = vpack.c.bf16 %v4919_v33, %v4917_v42 }
 0x2a9   : > { %v6988_v40 = vpack.c.bf16 %v4920_v37, %v4918_v10 }
 0x2aa   : > { %4598 = vmatprep.subr.bf16.mxu1 %v4597_v41 }
 0x2ab   : > { %4600 = vmatpush3.bf16.xpose.msra.mxu1 %v4597_v41 }
 0x2b2   : > { %3994 = vmatmul.mubr.f32.vlgmr.msra.gmra.mrb[32].mxu1 %v6871_v31 }
 0x2b3   : > { %3996 = vmatprep.mubr.f32.mxu1 %v6882_v0  ;;  %v7006_v0 = vrot.slane %v6848_v61, %v926_v27 }
 0x2b6   : > { %3997 = vmatmul.mubr.f32.gmra.mrb[34].mxu1 %v6888_v21 }
 0x2b7   : > { %3999 = vmatprep.mubr.f32.mxu1 %v6898_v49 }
 0x2ba   : > { %4000 = vmatmul.mubr.f32.gmra.mrb[36].mxu1 %v6904_v24 }
 0x2bb   : > { %4002 = vmatprep.mubr.f32.mxu1 %v6914_v15 }
 0x2be   : > { %4003 = vmatmul.mubr.f32.gmra.mrb[38].mxu1 %v6920_v30 }
 0x2bf   : > { %4005 = vmatprep.mubr.f32.mxu1 %v6930_v12 }
 0x2c2   : > { %4006 = vmatmul.mubr.f32.gmra.mrb[40].mxu1 %v6936_v63 }
 0x2c3   : > { %4008 = vmatprep.mubr.f32.mxu1 %v6946_v58 }
 0x2c6   : > { %4009 = vmatmul.mubr.f32.gmra.mrb[42].mxu1 %v4879_v6 }
 0x2c7   : > { %4011 = vmatprep.mubr.f32.mxu1 %v4881_v8 }
 0x2ca   : > { %4012 = vmatmul.mubr.f32.gmra.mrb[44].mxu1 %v4883_v1 }
 0x2cb   : > { %4014 = vmatprep.mubr.f32.mxu1 %v4885_v53 }
 0x2ce   : > { %4015 = vmatmul.mubr.f32.gmra.mrb[46].mxu1 %v4887_v52 }
 0x2e8   : > { %v1805_v31 = vpop.f32.mrb[32].mxu0 }
 0x2e9   : > { %v1807_v21 = vpop.f32.mrb[33].mxu0  ;;  %v4921_v49 = vadd.f32 %v1805_v31, %v7003_v39 }
 0x2ea   : > { %v4922_v24 = vadd.f32 %v1807_v21, %v7006_v0 }
 0x2ec   : > { %v1811_v15 = vpop.f32.mrb[34].mxu0 }
 0x2ed   : > { %v4923_v30 = vadd.f32 %v1811_v15, %v7003_v39  ;;  %v1813_v12 = vpop.f32.mrb[35].mxu0 }
 0x2ee   : > { %v4924_v63 = vadd.f32 %v1813_v12, %v7006_v0 }
 0x2ef   : > { %v4601_v58 = vpack.c.bf16 %v4923_v30, %v4921_v49 }
 0x2f0   : > { %v4665_v6 = vpack.c.bf16 %v4924_v63, %v4922_v24  ;;  %v1817_v8 = vpop.f32.mrb[36].mxu0 }
 0x2f1   : > { %v1819_v1 = vpop.f32.mrb[37].mxu0  ;;  %4602 = vmatprep.subr.bf16.mxu1 %v4601_v58  ;;  %v4925_v61 = vadd.f32 %v1817_v8, %v7003_v39 }
 0x2f2   : > { %4604 = vmatpush3.bf16.msra.mxu1 %v4601_v58  ;;  %4666 = vmatprep.subr.bf16.mxu0 %v4665_v6  ;;  %v4926_v45 = vadd.f32 %v1819_v1, %v7006_v0 }
 0x2f3   : > { %4668 = vmatpush3.bf16.msra.mxu0 %v4665_v6 }
 0x2f4   : > { %v1823_v22 = vpop.f32.mrb[38].mxu0 }
 0x2f5   : > { %v4927_v4 = vadd.f32 %v1823_v22, %v7003_v39  ;;  %v1825_v20 = vpop.f32.mrb[39].mxu0 }
 0x2f6   : > { %v4928_v48 = vadd.f32 %v1825_v20, %v7006_v0 }
 0x2f7   : > { %v4605_v53 = vpack.c.bf16 %v4927_v4, %v4925_v61 }
 0x2f8   : > { %v4669_v3 = vpack.c.bf16 %v4928_v48, %v4926_v45  ;;  %v1829_v10 = vpop.f32.mrb[40].mxu0 }
 0x2f9   : > { %v1831_v19 = vpop.f32.mrb[41].mxu0  ;;  %4606 = vmatprep.subr.bf16.mxu1 %v4605_v53  ;;  %v4929_v23 = vadd.f32 %v1829_v10, %v7003_v39 }
 0x2fa   : > { %4608 = vmatpush3.bf16.msra.mxu1 %v4605_v53  ;;  %4670 = vmatprep.subr.bf16.mxu0 %v4669_v3  ;;  %v4930_v52 = vadd.f32 %v1831_v19, %v7006_v0 }
 0x2fb   : > { %4672 = vmatpush3.bf16.msra.mxu0 %v4669_v3 }
 0x2fc   : > { %v1835_v56 = vpop.f32.mrb[42].mxu0 }
 0x2fd   : > { %v4931_v42 = vadd.f32 %v1835_v56, %v7003_v39  ;;  %v1837_v33 = vpop.f32.mrb[43].mxu0 }
 0x2fe   : > { %v4932_v43 = vadd.f32 %v1837_v33, %v7006_v0 }
 0x2ff   : > { %v4609_v37 = vpack.c.bf16 %v4931_v42, %v4929_v23 }
 0x300   : > { %v4673_v41 = vpack.c.bf16 %v4932_v43, %v4930_v52  ;;  %v1841_v38 = vpop.f32.mrb[44].mxu0 }
 0x301   : > { %v1843_v27 = vpop.f32.mrb[45].mxu0  ;;  %4610 = vmatprep.subr.bf16.mxu1 %v4609_v37  ;;  %v4933_v31 = vadd.f32 %v1841_v38, %v7003_v39 }
 0x302   : > { %4612 = vmatpush3.bf16.msra.mxu1 %v4609_v37  ;;  %4674 = vmatprep.subr.bf16.mxu0 %v4673_v41  ;;  %v4934_v21 = vadd.f32 %v1843_v27, %v7006_v0 }
 0x303   : > { %4676 = vmatpush3.bf16.msra.mxu0 %v4673_v41 }
 0x304   : > { %v1847_v49 = vpop.f32.mrb[46].mxu0 }
 0x305   : > { %v4935_v24 = vadd.f32 %v1847_v49, %v7003_v39  ;;  %v1849_v15 = vpop.f32.mrb[47].mxu0 }
 0x306   : > { %v4936_v30 = vadd.f32 %v1849_v15, %v7006_v0 }
 0x307   : > { %v4613_v12 = vpack.c.bf16 %v4935_v24, %v4933_v31 }
 0x308   : > { %v4677_v63 = vpack.c.bf16 %v4936_v30, %v4934_v21  ;;  %v1853_v58 = vpop.f32.mrb[48].mxu0 }
 0x309   : > { %v1855_v6 = vpop.f32.mrb[49].mxu0  ;;  %4614 = vmatprep.subr.bf16.mxu1 %v4613_v12  ;;  %v4937_v8 = vadd.f32 %v1853_v58, %v7003_v39 }
 0x30a   : > { %4616 = vmatpush3.bf16.msra.mxu1 %v4613_v12  ;;  %4678 = vmatprep.subr.bf16.mxu0 %v4677_v63  ;;  %v4938_v1 = vadd.f32 %v1855_v6, %v7006_v0 }
 0x30b   : > { %4680 = vmatpush3.bf16.msra.mxu0 %v4677_v63 }
 0x30c   : > { %v1859_v61 = vpop.f32.mrb[50].mxu0 }
 0x30d   : > { %v4939_v45 = vadd.f32 %v1859_v61, %v7003_v39  ;;  %v1861_v22 = vpop.f32.mrb[51].mxu0 }
 0x30e   : > { %v4940_v4 = vadd.f32 %v1861_v22, %v7006_v0 }
 0x30f   : > { %v4617_v20 = vpack.c.bf16 %v4939_v45, %v4937_v8 }
 0x310   : > { %v4681_v48 = vpack.c.bf16 %v4940_v4, %v4938_v1  ;;  %v1865_v53 = vpop.f32.mrb[52].mxu0 }
 0x311   : > { %v1867_v3 = vpop.f32.mrb[53].mxu0  ;;  %4618 = vmatprep.subr.bf16.mxu1 %v4617_v20  ;;  %v4941_v10 = vadd.f32 %v1865_v53, %v7003_v39 }
 0x312   : > { %4620 = vmatpush3.bf16.msra.mxu1 %v4617_v20  ;;  %4682 = vmatprep.subr.bf16.mxu0 %v4681_v48  ;;  %v4942_v19 = vadd.f32 %v1867_v3, %v7006_v0 }
 0x313   : > { %4684 = vmatpush3.bf16.msra.mxu0 %v4681_v48 }
 0x314   : > { %v1871_v23 = vpop.f32.mrb[54].mxu0 }
 0x315   : > { %v4943_v52 = vadd.f32 %v1871_v23, %v7003_v39  ;;  %v1873_v56 = vpop.f32.mrb[55].mxu0 }
 0x316   : > { %v4944_v42 = vadd.f32 %v1873_v56, %v7006_v0 }
 0x317   : > { %v4621_v33 = vpack.c.bf16 %v4943_v52, %v4941_v10 }
 0x318   : > { %v4685_v43 = vpack.c.bf16 %v4944_v42, %v4942_v19  ;;  %v1877_v37 = vpop.f32.mrb[56].mxu0 }
 0x319   : > { %v1879_v41 = vpop.f32.mrb[57].mxu0  ;;  %4622 = vmatprep.subr.bf16.mxu1 %v4621_v33  ;;  %v4945_v38 = vadd.f32 %v1877_v37, %v7003_v39 }
 0x31a   : > { %4624 = vmatpush3.bf16.msra.mxu1 %v4621_v33  ;;  %4686 = vmatprep.subr.bf16.mxu0 %v4685_v43  ;;  %v4946_v27 = vadd.f32 %v1879_v41, %v7006_v0 }
 0x31b   : > { %4688 = vmatpush3.bf16.msra.mxu0 %v4685_v43 }
 0x31c   : > { %v1883_v31 = vpop.f32.mrb[58].mxu0 }
 0x31d   : > { %v4947_v21 = vadd.f32 %v1883_v31, %v7003_v39  ;;  %v1885_v49 = vpop.f32.mrb[59].mxu0 }
 0x31e   : > { %v4948_v24 = vadd.f32 %v1885_v49, %v7006_v0 }
 0x31f   : > { %v4625_v15 = vpack.c.bf16 %v4947_v21, %v4945_v38 }
 0x320   : > { %v4689_v30 = vpack.c.bf16 %v4948_v24, %v4946_v27  ;;  %v1889_v12 = vpop.f32.mrb[60].mxu0 }
 0x321   : > { %v1891_v63 = vpop.f32.mrb[61].mxu0  ;;  %4626 = vmatprep.subr.bf16.mxu1 %v4625_v15  ;;  %v4949_v58 = vadd.f32 %v1889_v12, %v7003_v39 }
 0x322   : > { %4628 = vmatpush3.bf16.msra.mxu1 %v4625_v15  ;;  %4690 = vmatprep.subr.bf16.mxu0 %v4689_v30  ;;  %v4950_v43 = vadd.f32 %v1891_v63, %v7006_v0 }
 0x323   : > { %4692 = vmatpush3.bf16.msra.mxu0 %v4689_v30 }
 0x324   : > { %v1895_v6 = vpop.f32.mrb[62].mxu0 }
 0x325   : > { %v4951_v8 = vadd.f32 %v1895_v6, %v7003_v39  ;;  %v1897_v37 = vpop.f32.mrb[63].mxu0 }
 0x326   : > { %v4952_v41 = vadd.f32 %v1897_v37, %v7006_v0 }
 0x327   : > { %v4629_v1 = vpack.c.bf16 %v4951_v8, %v4949_v58 }
 0x328   : > { %v4693_v38 = vpack.c.bf16 %v4952_v41, %v4950_v43 }
 0x329   : > { %4630 = vmatprep.subr.bf16.mxu1 %v4629_v1 }
 0x32a   : > { %4632 = vmatpush3.bf16.msra.mxu1 %v4629_v1  ;;  %4694 = vmatprep.subr.bf16.mxu0 %v4693_v38 }
 0x32b   : > { %4634 = vmatprep.subr.bf16.mxu1 %v6879_v17  ;;  %4696 = vmatpush3.bf16.msra.mxu0 %v4693_v38 }
 0x385   : > { %v3995_v61 = vpop.f32.mrb[32].mxu1 }
 0x386   : > { %v1966_v45 = vpop.f32.mrb[33].mxu1 }
 0x387   : > { %2045 = vmax.xlane.f32.xlu0 %v1966_v45 }
 0x389   : > { %v3998_v22 = vpop.f32.mrb[34].mxu1 }
 0x38a   : > { %v1976_v4 = vpop.f32.mrb[35].mxu1 }
 0x38b   : > { %2047 = vmax.xlane.f32.xlu0 %v3995_v61  ;;  %2049 = vmax.xlane.f32.xlu1 %v1976_v4 }
 0x38d   : > { %v4001_v20 = vpop.f32.mrb[36].mxu1 }
 0x38e   : > { %v1986_v48 = vpop.f32.mrb[37].mxu1 }
 0x38f   : > { %2051 = vmax.xlane.f32.xlu1 %v3998_v22  ;;  %2053 = vmax.xlane.f32.xlu0 %v1986_v48 }
 0x391   : > { %v4004_v53 = vpop.f32.mrb[38].mxu1 }
 0x392   : > { %v1996_v3 = vpop.f32.mrb[39].mxu1 }
 0x393   : > { %2055 = vmax.xlane.f32.xlu1 %v4001_v20  ;;  %2057 = vmax.xlane.f32.xlu0 %v1996_v3 }
 0x395   : > { %v7039_v39 = vpop.f32.mrb[40].mxu1 }
 0x396   : > { %v2006_v10 = vpop.f32.mrb[41].mxu1 }
 0x397   : > { %2059 = vmax.xlane.f32.xlu1 %v4004_v53  ;;  %2061 = vmax.xlane.f32.xlu0 %v2006_v10 }
 0x399   : > { %v7041_v19 = vpop.f32.mrb[42].mxu1 }
 0x39a   : > { %v7043_v23 = vpop.f32.mrb[43].mxu1 }
 0x39b   : > { %2063 = vmax.xlane.f32.xlu1 %v7039_v39  ;;  %2065 = vmax.xlane.f32.xlu0 %v7043_v23 }
 0x39d   : > { %v7047_v52 = vpop.f32.mrb[44].mxu1 }
 0x39e   : > { %v7049_v56 = vpop.f32.mrb[45].mxu1 }
 0x39f   : > { %2067 = vmax.xlane.f32.xlu1 %v7041_v19  ;;  %2069 = vmax.xlane.f32.xlu0 %v7049_v56 }
 0x3a1   : > { %v7053_v42 = vpop.f32.mrb[46].mxu1 }
 0x3a2   : > { %v7055_v33 = vpop.f32.mrb[47].mxu1 }
 0x3a3   : > { %2071 = vmax.xlane.f32.xlu1 %v7047_v52  ;;  %2073 = vmax.xlane.f32.xlu0 %v7055_v33 }
 0x3a7   : > { %2075 = vmax.xlane.f32.xlu1 %v7053_v42 }
 0x414   : > { %v2046_v27 = vpop.xlane.xlu0 %2045 }
 0x415   : > { %v2077_v31 = vsub.f32 %v1966_v45, %v2046_v27 }
 0x417   : > { %v2093_v21 = vmul.f32 1.442695, %v2077_v31 }
 0x418   : > { %v2048_v49 = vpop.xlane.xlu0 %2047  ;;  %v2050_v24 = vpop.xlane.xlu1 %2049 }
 0x419   : > { %5189 = vpow2.f32 %v2093_v21  ;;  %v2078_v15 = vsub.f32 %v3995_v61, %v2048_v49  ;;  %v2079_v30 = vsub.f32 %v1976_v4, %v2050_v24 }
 0x41b   : > { %v2095_v12 = vmul.f32 1.442695, %v2078_v15  ;;  %v2097_v58 = vmul.f32 1.442695, %v2079_v30 }
 0x41c   : > { %v2052_v6 = vpop.xlane.xlu1 %2051  ;;  %v2054_v8 = vpop.xlane.xlu0 %2053 }
 0x41d   : > { %5191 = vpow2.f32 %v2095_v12  ;;  %v2080_v63 = vsub.f32 %v3998_v22, %v2052_v6  ;;  %v2081_v1 = vsub.f32 %v1986_v48, %v2054_v8 }
 0x41e   : > { %5193 = vpow2.f32 %v2097_v58 }
 0x41f   : > { %v2099_v0 = vmul.f32 1.442695, %v2080_v63  ;;  %v2101_v43 = vmul.f32 1.442695, %v2081_v1 }
 0x420   : > { %v2056_v37 = vpop.xlane.xlu1 %2055  ;;  %v2058_v41 = vpop.xlane.xlu0 %2057 }
 0x421   : > { %5195 = vpow2.f32 %v2099_v0  ;;  %v2082_v45 = vsub.f32 %v4001_v20, %v2056_v37  ;;  %v2083_v38 = vsub.f32 %v1996_v3, %v2058_v41 }
 0x422   : > { %5197 = vpow2.f32 %v2101_v43 }
 0x423   : > { %v7062_v27 = vpop.eup %5189  ;;  %v2103_v61 = vmul.f32 1.442695, %v2082_v45  ;;  %v2105_v4 = vmul.f32 1.442695, %v2083_v38 }
 0x424   : > { %v2060_v31 = vpop.xlane.xlu1 %2059  ;;  %v2062_v21 = vpop.xlane.xlu0 %2061  ;;  %2125 = vadd.xlane.f32.xlu0 %v7062_v27 }
 0x425   : > { %5199 = vpow2.f32 %v2103_v61  ;;  %v2084_v22 = vsub.f32 %v4004_v53, %v2060_v31  ;;  %v2085_v48 = vsub.f32 %v2006_v10, %v2062_v21 }
 0x426   : > { %5201 = vpow2.f32 %v2105_v4 }
 0x427   : > { %v7065_v49 = vpop.eup %5191  ;;  %v2107_v24 = vmul.f32 1.442695, %v2084_v22  ;;  %v2109_v15 = vmul.f32 1.442695, %v2085_v48 }
 0x428   : > { %v7067_v30 = vpop.eup %5193  ;;  %v2064_v20 = vpop.xlane.xlu1 %2063  ;;  %2127 = vadd.xlane.f32.xlu1 %v7065_v49 }
 0x429   : > { %v2066_v3 = vpop.xlane.xlu0 %2065  ;;  %5203 = vpow2.f32 %v2107_v24  ;;  %v2086_v12 = vsub.f32 %v7039_v39, %v2064_v20  ;;  %2129 = vadd.xlane.f32.xlu0 %v7067_v30 }
 0x42a   : > { %v2087_v58 = vsub.f32 %v7043_v23, %v2066_v3  ;;  %5205 = vpow2.f32 %v2109_v15 }
 0x42b   : > { %v7073_v53 = vpop.eup %5195  ;;  %v2111_v10 = vmul.f32 1.442695, %v2086_v12 }
 0x42c   : > { %v2113_v6 = vmul.f32 1.442695, %v2087_v58  ;;  %v7075_v8 = vpop.eup %5197  ;;  %v2068_v63 = vpop.xlane.xlu1 %2067  ;;  %2131 = vadd.xlane.f32.xlu1 %v7073_v53 }
 0x42d   : > { %v2070_v1 = vpop.xlane.xlu0 %2069  ;;  %5207 = vpow2.f32 %v2111_v10  ;;  %v2088_v0 = vsub.f32 %v7041_v19, %v2068_v63  ;;  %2133 = vadd.xlane.f32.xlu0 %v7075_v8 }
 0x42e   : > { %v2089_v39 = vsub.f32 %v7049_v56, %v2070_v1  ;;  %5209 = vpow2.f32 %v2113_v6 }
 0x42f   : > { %v7081_v23 = vpop.eup %5199  ;;  %v2115_v43 = vmul.f32 1.442695, %v2088_v0 }
 0x430   : > { %v2117_v37 = vmul.f32 1.442695, %v2089_v39  ;;  %v7083_v41 = vpop.eup %5201  ;;  %v2072_v45 = vpop.xlane.xlu1 %2071  ;;  %2135 = vadd.xlane.f32.xlu1 %v7081_v23 }
 0x431   : > { %v2074_v38 = vpop.xlane.xlu0 %2073  ;;  %5211 = vpow2.f32 %v2115_v43  ;;  %v2090_v61 = vsub.f32 %v7047_v52, %v2072_v45  ;;  %2137 = vadd.xlane.f32.xlu0 %v7083_v41 }
 0x432   : > { %v2091_v19 = vsub.f32 %v7055_v33, %v2074_v38  ;;  %5213 = vpow2.f32 %v2117_v37 }
 0x433   : > { %v7089_v56 = vpop.eup %5203  ;;  %v2119_v4 = vmul.f32 1.442695, %v2090_v61 }
 0x434   : > { %v2121_v31 = vmul.f32 1.442695, %v2091_v19  ;;  %v7091_v21 = vpop.eup %5205  ;;  %2139 = vadd.xlane.f32.xlu1 %v7089_v56  ;;  %v2076_v22 = vpop.xlane.xlu1 %2075 }
 0x435   : > { %5215 = vpow2.f32 %v2119_v4  ;;  %v2092_v48 = vsub.f32 %v7053_v42, %v2076_v22  ;;  %2141 = vadd.xlane.f32.xlu0 %v7091_v21 }
 0x436   : > { %5217 = vpow2.f32 %v2121_v31 }
 0x437   : > { %v7096_v52 = vpop.eup %5207  ;;  %v2123_v24 = vmul.f32 1.442695, %v2092_v48 }
 0x438   : > { %v7098_v33 = vpop.eup %5209  ;;  %2143 = vadd.xlane.f32.xlu1 %v7096_v52 }
 0x439   : > { %5219 = vpow2.f32 %v2123_v24  ;;  %2145 = vadd.xlane.f32.xlu0 %v7098_v33 }
 0x43b   : > { %v7102_v15 = vpop.eup %5211 }
 0x43c   : > { %v7104_v20 = vpop.eup %5213  ;;  %2147 = vadd.xlane.f32.xlu1 %v7102_v15 }
 0x43d   : > { %2149 = vadd.xlane.f32.xlu0 %v7104_v20 }
 0x43f   : > { %v7108_v42 = vpop.eup %5215 }
 0x440   : > { %v7110_v3 = vpop.eup %5217  ;;  %2151 = vadd.xlane.f32.xlu1 %v7108_v42 }
 0x441   : > { %2153 = vadd.xlane.f32.xlu0 %v7110_v3 }
 0x443   : > { %v7114_v12 = vpop.eup %5219 }
 0x444   : > { %2155 = vadd.xlane.f32.xlu1 %v7114_v12 }
 0x4b1   : > { %v2126_v58 = vpop.xlane.xlu0 %2125 }
 0x4b2   : > { %5221 = vrcp.f32 %v2126_v58 }
 0x4b5   : > { %v2128_v10 = vpop.xlane.xlu1 %2127 }
 0x4b6   : > { %5223 = vrcp.f32 %v2128_v10  ;;  %v2130_v6 = vpop.xlane.xlu0 %2129 }
 0x4b7   : > { %5225 = vrcp.f32 %v2130_v6 }
 0x4b9   : > { %v2132_v63 = vpop.xlane.xlu1 %2131 }
 0x4ba   : > { %5227 = vrcp.f32 %v2132_v63  ;;  %v2134_v1 = vpop.xlane.xlu0 %2133 }
 0x4bb   : > { %5229 = vrcp.f32 %v2134_v1 }
 0x4bc   : > { %v5222_v0 = vpop.eup %5221 }
 0x4bd   : > { %v2136_v39 = vpop.xlane.xlu1 %2135  ;;  %v2173_v43 = vmul.f32 %v5222_v0, %v7062_v27 }
 0x4be   : > { %5231 = vrcp.f32 %v2136_v39  ;;  %v2138_v37 = vpop.xlane.xlu0 %2137 }
 0x4bf   : > { %5233 = vrcp.f32 %v2138_v37  ;;  %4049 = vmatprep.mubr.f32.mxu1 %v2173_v43 }
 0x4c0   : > { %v5224_v45 = vpop.eup %5223 }
 0x4c1   : > { %v5226_v38 = vpop.eup %5225  ;;  %v2174_v61 = vmul.f32 %v5224_v45, %v7065_v49  ;;  %v2140_v19 = vpop.xlane.xlu1 %2139 }
 0x4c2   : > { %5235 = vrcp.f32 %v2140_v19  ;;  %v2142_v4 = vpop.xlane.xlu0 %2141  ;;  %v2175_v31 = vmul.f32 %v5226_v38, %v7067_v30 }
 0x4c3   : > { %5237 = vrcp.f32 %v2142_v4  ;;  %4050 = vmatmul.mubr.f32.vlgmr.msra.gmra.mrb[48].mxu1 %v2174_v61 }
 0x4c4   : > { %v5228_v22 = vpop.eup %5227  ;;  %4636 = vmatpush3.bf16.xpose.msra.mxu1 %v6879_v17  ;;  %4052 = vmatprep.mubr.f32.mxu1 %v2175_v31 }
 0x4c5   : > { %v5230_v27 = vpop.eup %5229  ;;  %4638 = vmatprep.subr.bf16.mxu1 %v6895_v44  ;;  %v2144_v48 = vpop.xlane.xlu1 %2143  ;;  %v2176_v24 = vmul.f32 %v5228_v22, %v7073_v53 }
 0x4c6   : > { %5239 = vrcp.f32 %v2144_v48  ;;  %v2146_v58 = vpop.xlane.xlu0 %2145  ;;  %v2177_v49 = vmul.f32 %v5230_v27, %v7075_v8 }
 0x4c7   : > { %5241 = vrcp.f32 %v2146_v58  ;;  %4053 = vmatmul.mubr.f32.gmra.mrb[50].mxu1 %v2176_v24 }
 0x4c8   : > { %v5232_v10 = vpop.eup %5231  ;;  %4055 = vmatprep.mubr.f32.mxu1 %v2177_v49 }
 0x4c9   : > { %v5234_v30 = vpop.eup %5233  ;;  %v2148_v6 = vpop.xlane.xlu1 %2147  ;;  %v2178_v63 = vmul.f32 %v5232_v10, %v7081_v23 }
 0x4ca   : > { %5243 = vrcp.f32 %v2148_v6  ;;  %v2150_v17 = vpop.xlane.xlu0 %2149  ;;  %v2179_v1 = vmul.f32 %v5234_v30, %v7083_v41 }
 0x4cb   : > { %5245 = vrcp.f32 %v2150_v17  ;;  %4056 = vmatmul.mubr.f32.gmra.mrb[52].mxu1 %v2178_v63 }
 0x4cc   : > { %v5236_v0 = vpop.eup %5235  ;;  %4640 = vmatpush3.bf16.xpose.msra.mxu1 %v6895_v44  ;;  %4058 = vmatprep.mubr.f32.mxu1 %v2179_v1 }
 0x4cd   : > { %v5238_v53 = vpop.eup %5237  ;;  %4642 = vmatprep.subr.bf16.mxu1 %v6911_v11  ;;  %v2152_v8 = vpop.xlane.xlu1 %2151  ;;  %v2180_v39 = vmul.f32 %v5236_v0, %v7089_v56 }
 0x4ce   : > { %5247 = vrcp.f32 %v2152_v8  ;;  %v2154_v43 = vpop.xlane.xlu0 %2153  ;;  %v2181_v23 = vmul.f32 %v5238_v53, %v7091_v21 }
 0x4cf   : > { %5249 = vrcp.f32 %v2154_v43  ;;  %4059 = vmatmul.mubr.f32.gmra.mrb[54].mxu1 %v2180_v39 }
 0x4d0   : > { %v5240_v37 = vpop.eup %5239  ;;  %4061 = vmatprep.mubr.f32.mxu1 %v2181_v23 }
 0x4d1   : > { %v5242_v41 = vpop.eup %5241  ;;  %v2156_v45 = vpop.xlane.xlu1 %2155  ;;  %v2182_v38 = vmul.f32 %v5240_v37, %v7096_v52 }
 0x4d2   : > { %5251 = vrcp.f32 %v2156_v45  ;;  %v2183_v44 = vmul.f32 %v5242_v41, %v7098_v33 }
 0x4d3   : > { %4062 = vmatmul.mubr.f32.gmra.mrb[56].mxu1 %v2182_v38 }
 0x4d4   : > { %v5244_v61 = vpop.eup %5243  ;;  %4644 = vmatpush3.bf16.xpose.msra.mxu1 %v6911_v11  ;;  %4064 = vmatprep.mubr.f32.mxu1 %v2183_v44 }
 0x4d5   : > { %v5246_v56 = vpop.eup %5245  ;;  %4646 = vmatprep.subr.bf16.mxu1 %v6927_v35  ;;  %v2184_v21 = vmul.f32 %v5244_v61, %v7102_v15  ;;  %v4858_v15 = vadd.f32 %v6858_v59, %v6979_v14  ;;  %v4862_v59 = vadd.f32 %v6884_v5, %v6979_v14  ;;  %v4874_v5 = vadd.f32 %v6932_v32, %v6979_v14 }
 0x4d6   : > { %v2185_v19 = vmul.f32 %v5246_v56, %v7104_v20  ;;  %v4886_v32 = vadd.f32 %v6973_v2, %v6979_v14 }
 0x4d7   : > { %4065 = vmatmul.mubr.f32.gmra.mrb[58].mxu1 %v2184_v21 }
 0x4d8   : > { %v5248_v4 = vpop.eup %5247  ;;  %4067 = vmatprep.mubr.f32.mxu1 %v2185_v19 }
 0x4d9   : > { %v5250_v31 = vpop.eup %5249  ;;  %v2186_v52 = vmul.f32 %v5248_v4, %v7108_v42 }
 0x4da   : > { %v2187_v33 = vmul.f32 %v5250_v31, %v7110_v3 }
 0x4db   : > { %4068 = vmatmul.mubr.f32.gmra.mrb[60].mxu1 %v2186_v52 }
 0x4dc   : > { %v5252_v22 = vpop.eup %5251  ;;  %4648 = vmatpush3.bf16.xpose.msra.mxu1 %v6927_v35  ;;  %4070 = vmatprep.mubr.f32.mxu1 %v2187_v33  ;;  %v4860_v35 = vadd.f32 %v6873_v28, %v6979_v14  ;;  %v4872_v28 = vadd.f32 %v6922_v26, %v6979_v14  ;;  %v4884_v26 = vadd.f32 %v6964_v36, %v6979_v14 }
 0x4dd   : > { %4650 = vmatprep.subr.bf16.mxu1 %v6943_v25  ;;  %v2188_v11 = vmul.f32 %v5252_v22, %v7114_v12 }
 0x4df   : > { %4071 = vmatmul.mubr.f32.gmra.mrb[62].mxu1 %v2188_v11 }
 0x4e0   : > { %4105 = vmatprep.mubr.f32.mxu1 %v4858_v15 }
 0x4e4   : > { %4652 = vmatpush3.bf16.xpose.msra.mxu1 %v6943_v25  ;;  %v4864_v25 = vadd.f32 %v6890_v55, %v6979_v14  ;;  %v4876_v55 = vadd.f32 %v6938_v16, %v6979_v14 }
 0x4e5   : > { %4654 = vmatprep.subr.bf16.mxu1 %v6957_v46 }
 0x4ec   : > { %4656 = vmatpush3.bf16.xpose.msra.mxu1 %v6957_v46  ;;  %v4866_v46 = vadd.f32 %v6900_v9, %v6979_v14  ;;  %v4878_v9 = vadd.f32 %v6948_v62, %v6979_v14 }
 0x4ed   : > { %4658 = vmatprep.subr.bf16.mxu1 %v6970_v50 }
 0x4f4   : > { %4660 = vmatpush3.bf16.xpose.msra.mxu1 %v6970_v50  ;;  %v4868_v50 = vadd.f32 %v6906_v29, %v6979_v14  ;;  %v4880_v29 = vadd.f32 %v6952_v7, %v6979_v14 }
 0x4f5   : > { %4662 = vmatprep.subr.bf16.mxu1 %v6988_v40 }
 0x4fc   : > { %4664 = vmatpush3.bf16.xpose.msra.mxu1 %v6988_v40  ;;  %v4870_v40 = vadd.f32 %v6916_v18, %v6979_v14  ;;  %v4882_v18 = vadd.f32 %v6960_v13, %v6979_v14 }
 0x503   : > { %4106 = vmatmul.mubr.f32.vlgmr.msra.gmra.mrb[64].mxu1 %v4860_v35 }
 0x504   : > { %4108 = vmatprep.mubr.f32.mxu1 %v4862_v59 }
 0x507   : > { %4109 = vmatmul.mubr.f32.gmra.mrb[66].mxu1 %v4864_v25 }
 0x508   : > { %4111 = vmatprep.mubr.f32.mxu1 %v4866_v46 }
 0x50b   : > { %4112 = vmatmul.mubr.f32.gmra.mrb[68].mxu1 %v4868_v50 }
 0x50c   : > { %4114 = vmatprep.mubr.f32.mxu1 %v4870_v40 }
 0x50f   : > { %4115 = vmatmul.mubr.f32.gmra.mrb[70].mxu1 %v4872_v28 }
 0x510   : > { %4117 = vmatprep.mubr.f32.mxu1 %v4874_v5 }
 0x513   : > { %4118 = vmatmul.mubr.f32.gmra.mrb[72].mxu1 %v4876_v55 }
 0x514   : > { %4120 = vmatprep.mubr.f32.mxu1 %v4878_v9 }
 0x517   : > { %4121 = vmatmul.mubr.f32.gmra.mrb[74].mxu1 %v4880_v29 }
 0x518   : > { %4123 = vmatprep.mubr.f32.mxu1 %v4882_v18 }
 0x51b   : > { %4124 = vmatmul.mubr.f32.gmra.mrb[76].mxu1 %v4884_v26 }
 0x51c   : > { %4126 = vmatprep.mubr.f32.mxu1 %v4886_v32 }
 0x51f   : > { %4127 = vmatmul.mubr.f32.gmra.mrb[78].mxu1 %v6985_v54 }
 0x596   : > { %v7179_v16 = vpop.f32.mrb[48].mxu1 }
 0x597   : > { %v7181_v62 = vpop.f32.mrb[49].mxu1 }
 0x59a   : > { %v7183_v7 = vpop.f32.mrb[50].mxu1 }
 0x59b   : > { %v7185_v20 = vpop.f32.mrb[51].mxu1 }
 0x59e   : > { %v7187_v13 = vpop.f32.mrb[52].mxu1 }
 0x59f   : > { %v7189_v42 = vpop.f32.mrb[53].mxu1 }
 0x5a2   : > { %v7191_v36 = vpop.f32.mrb[54].mxu1 }
 0x5a3   : > { %v7193_v3 = vpop.f32.mrb[55].mxu1 }
 0x5a6   : > { %v7195_v2 = vpop.f32.mrb[56].mxu1 }
 0x5a7   : > { %v7197_v14 = vpop.f32.mrb[57].mxu1 }
 0x5aa   : > { %v7199_v54 = vpop.f32.mrb[58].mxu1 }
 0x5ab   : > { %v7201_v12 = vpop.f32.mrb[59].mxu1 }
 0x5ae   : > { %v7203_v27 = vpop.f32.mrb[60].mxu1 }
 0x5af   : > { %v7205_v48 = vpop.f32.mrb[61].mxu1 }
 0x5b2   : > { %v7207_v24 = vpop.f32.mrb[62].mxu1 }
 0x5b3   : > { %v7209_v58 = vpop.f32.mrb[63].mxu1 }
 0x5d6   : > { %v4107_v49 = vpop.f32.mrb[64].mxu1 }
 0x5d7   : > { %2481 = vmax.xlane.f32.xlu1 %v4107_v49  ;;  %v2400_v10 = vpop.f32.mrb[65].mxu1 }
 0x5d8   : > { %2479 = vmax.xlane.f32.xlu0 %v2400_v10 }
 0x5da   : > { %v4110_v30 = vpop.f32.mrb[66].mxu1 }
 0x5db   : > { %2485 = vmax.xlane.f32.xlu1 %v4110_v30  ;;  %v2410_v6 = vpop.f32.mrb[67].mxu1 }
 0x5dc   : > { %2483 = vmax.xlane.f32.xlu0 %v2410_v6 }
 0x5de   : > { %v4113_v63 = vpop.f32.mrb[68].mxu1 }
 0x5df   : > { %2489 = vmax.xlane.f32.xlu1 %v4113_v63  ;;  %v2420_v17 = vpop.f32.mrb[69].mxu1 }
 0x5e0   : > { %2487 = vmax.xlane.f32.xlu0 %v2420_v17 }
 0x5e2   : > { %v4116_v1 = vpop.f32.mrb[70].mxu1 }
 0x5e3   : > { %2493 = vmax.xlane.f32.xlu1 %v4116_v1  ;;  %v2430_v0 = vpop.f32.mrb[71].mxu1 }
 0x5e4   : > { %2491 = vmax.xlane.f32.xlu0 %v2430_v0 }
 0x5e6   : > { %v4119_v53 = vpop.f32.mrb[72].mxu1 }
 0x5e7   : > { %2497 = vmax.xlane.f32.xlu1 %v4119_v53  ;;  %v2440_v8 = vpop.f32.mrb[73].mxu1 }
 0x5e8   : > { %2495 = vmax.xlane.f32.xlu0 %v2440_v8 }
 0x5ea   : > { %v7211_v39 = vpop.f32.mrb[74].mxu1 }
 0x5eb   : > { %2501 = vmax.xlane.f32.xlu1 %v7211_v39  ;;  %v7214_v43 = vpop.f32.mrb[75].mxu1 }
 0x5ec   : > { %2499 = vmax.xlane.f32.xlu0 %v7214_v43 }
 0x5ee   : > { %v7217_v23 = vpop.f32.mrb[76].mxu1 }
 0x5ef   : > { %2505 = vmax.xlane.f32.xlu1 %v7217_v23  ;;  %v7220_v37 = vpop.f32.mrb[77].mxu1 }
 0x5f0   : > { %2503 = vmax.xlane.f32.xlu0 %v7220_v37 }
 0x5f2   : > { %v7223_v41 = vpop.f32.mrb[78].mxu1 }
 0x5f3   : > { %2509 = vmax.xlane.f32.xlu1 %v7223_v41  ;;  %v7226_v45 = vpop.f32.mrb[79].mxu1 }
 0x5f4   : > { %2507 = vmax.xlane.f32.xlu0 %v7226_v45 }
 0x664   : > { %v2482_v38 = vpop.xlane.xlu1 %2481 }
 0x665   : > { %v2512_v44 = vsub.f32 %v4107_v49, %v2482_v38  ;;  %v2480_v61 = vpop.xlane.xlu0 %2479 }
 0x666   : > { %v2511_v56 = vsub.f32 %v2400_v10, %v2480_v61 }
 0x667   : > { %v2529_v21 = vmul.f32 1.442695, %v2512_v44 }
 0x668   : > { %v2527_v19 = vmul.f32 1.442695, %v2511_v56  ;;  %v2486_v4 = vpop.xlane.xlu1 %2485 }
 0x669   : > { %5253 = vpow2.f32 %v2529_v21  ;;  %v2514_v31 = vsub.f32 %v4110_v30, %v2486_v4  ;;  %v2484_v52 = vpop.xlane.xlu0 %2483 }
 0x66a   : > { %5255 = vpow2.f32 %v2527_v19  ;;  %v2513_v33 = vsub.f32 %v2410_v6, %v2484_v52 }
 0x66b   : > { %v2533_v22 = vmul.f32 1.442695, %v2514_v31 }
 0x66c   : > { %v2531_v11 = vmul.f32 1.442695, %v2513_v33  ;;  %v2490_v15 = vpop.xlane.xlu1 %2489 }
 0x66d   : > { %5257 = vpow2.f32 %v2533_v22  ;;  %v2516_v35 = vsub.f32 %v4113_v63, %v2490_v15  ;;  %v2488_v59 = vpop.xlane.xlu0 %2487 }
 0x66e   : > { %5259 = vpow2.f32 %v2531_v11  ;;  %v2515_v25 = vsub.f32 %v2420_v17, %v2488_v59 }
 0x66f   : > { %v2537_v46 = vmul.f32 1.442695, %v2516_v35 }
 0x670   : > { %v2535_v50 = vmul.f32 1.442695, %v2515_v25  ;;  %v2494_v40 = vpop.xlane.xlu1 %2493 }
 0x671   : > { %5261 = vpow2.f32 %v2537_v46  ;;  %v2518_v28 = vsub.f32 %v4116_v1, %v2494_v40  ;;  %v2492_v5 = vpop.xlane.xlu0 %2491 }
 0x672   : > { %5263 = vpow2.f32 %v2535_v50  ;;  %v2517_v55 = vsub.f32 %v2430_v0, %v2492_v5 }
 0x673   : > { %v7229_v9 = vpop.eup %5253  ;;  %v2541_v29 = vmul.f32 1.442695, %v2518_v28 }
 0x674   : > { %v7231_v18 = vpop.eup %5255  ;;  %v2539_v26 = vmul.f32 1.442695, %v2517_v55  ;;  %v2498_v32 = vpop.xlane.xlu1 %2497  ;;  %2561 = vadd.xlane.f32.xlu1 %v7229_v9  ;;  %v2833_v55 = vld [vmem:[%s5997_s13 + $0x8] sm:$0xff] }
 0x675   : > { %5265 = vpow2.f32 %v2541_v29  ;;  %v2520_v49 = vsub.f32 %v4119_v53, %v2498_v32  ;;  %v2496_v10 = vpop.xlane.xlu0 %2495  ;;  %2559 = vadd.xlane.f32.xlu0 %v7231_v18  ;;  %v2837_v29 = vld [vmem:[%s5997_s13 + $0x28] sm:$0xff] }
 0x676   : > { %5267 = vpow2.f32 %v2539_v26  ;;  %v2519_v30 = vsub.f32 %v2440_v8, %v2496_v10  ;;  %v2835_v26 = vld [vmem:[%s5997_s13 + $0x18] sm:$0xff]  ;;  %v4697_v32 = vpack.c.bf16 %v2837_v29, %v2833_v55  ;;  %v2832_v10 = vld [vmem:[%s5997_s13] sm:$0xff]  ;;  %v2869_v55 = vld [vmem:[%s5997_s13 + $0x128] sm:$0xff] }
 0x677   : > { %v7235_v6 = vpop.eup %5257  ;;  %v2545_v63 = vmul.f32 1.442695, %v2520_v49  ;;  %v2839_v49 = vld [vmem:[%s5997_s13 + $0x38] sm:$0xff] }
 0x678   : > { %v7237_v17 = vpop.eup %5259  ;;  %v2543_v1 = vmul.f32 1.442695, %v2519_v30  ;;  %v2502_v0 = vpop.xlane.xlu1 %2501  ;;  %2565 = vadd.xlane.f32.xlu1 %v7235_v6  ;;  %v2836_v30 = vld [vmem:[%s5997_s13 + $0x20] sm:$0xff]  ;;  %4698 = vmatprep.subr.bf16.mxu1 %v4697_v32 }
 0x679   : > { %5269 = vpow2.f32 %v2545_v63  ;;  %v2522_v38 = vsub.f32 %v7211_v39, %v2502_v0  ;;  %v2500_v44 = vpop.xlane.xlu0 %2499  ;;  %2563 = vadd.xlane.f32.xlu0 %v7237_v17  ;;  %v7289_v63 = vpack.c.bf16 %v2839_v49, %v2835_v26  ;;  %v2841_v0 = vld [vmem:[%s5997_s13 + $0x48] sm:$0xff]  ;;  %v2864_v32 = vld [vmem:[%s5997_s13 + $0x100] sm:$0xff] }
 0x67a   : > { %5271 = vpow2.f32 %v2543_v1  ;;  %v2521_v53 = vsub.f32 %v7214_v43, %v2500_v44  ;;  %v4699_v1 = vpack.c.bf16 %v2836_v30, %v2832_v10  ;;  %v2868_v49 = vld [vmem:[%s5997_s13 + $0x120] sm:$0xff]  ;;  %v2873_v10 = vld [vmem:[%s5997_s13 + $0x148] sm:$0xff] }
 0x67b   : > { %v7243_v61 = vpop.eup %5261  ;;  %v2549_v8 = vmul.f32 1.442695, %v2522_v38  ;;  %v2845_v38 = vld [vmem:[%s5997_s13 + $0x68] sm:$0xff]  ;;  %4762 = vmatprep.subr.bf16.mxu0 %v7289_v63 }
 0x67c   : > { %v7245_v56 = vpop.eup %5263  ;;  %v2547_v21 = vmul.f32 1.442695, %v2521_v53  ;;  %v2506_v19 = vpop.xlane.xlu1 %2505  ;;  %2569 = vadd.xlane.f32.xlu1 %v7243_v61  ;;  %4700 = vmatpush1.bf16.msra.mxu1 %v4699_v1  ;;  %v4701_v44 = vpack.c.bf16 %v2845_v38, %v2841_v0  ;;  %v2840_v53 = vld [vmem:[%s5997_s13 + $0x40] sm:$0xff]  ;;  %v2877_v30 = vld [vmem:[%s5997_s13 + $0x168] sm:$0xff]  ;;  %v4715_v1 = vpack.c.bf16 %v2868_v49, %v2864_v32 }
 0x67d   : > { %5273 = vpow2.f32 %v2549_v8  ;;  %v2524_v4 = vsub.f32 %v7217_v23, %v2506_v19  ;;  %v2504_v31 = vpop.xlane.xlu0 %2503  ;;  %2567 = vadd.xlane.f32.xlu0 %v7245_v56  ;;  %v2844_v8 = vld [vmem:[%s5997_s13 + $0x60] sm:$0xff]  ;;  %v2849_v19 = vld [vmem:[%s5997_s13 + $0x88] sm:$0xff]  ;;  %v4717_v0 = vpack.c.bf16 %v2877_v30, %v2873_v10 }
 0x67e   : > { %5275 = vpow2.f32 %v2547_v21  ;;  %v2523_v39 = vsub.f32 %v7220_v37, %v2504_v31  ;;  %v4703_v21 = vpack.c.bf16 %v2844_v8, %v2840_v53  ;;  %4702 = vmatprep.subr.bf16.mxu1 %v4701_v44  ;;  %v2872_v38 = vld [vmem:[%s5997_s13 + $0x140] sm:$0xff]  ;;  %v2881_v53 = vld [vmem:[%s5997_s13 + $0x188] sm:$0xff] }
 0x67f   : > { %v7251_v52 = vpop.eup %5265  ;;  %v2553_v43 = vmul.f32 1.442695, %v2524_v4  ;;  %v2853_v4 = vld [vmem:[%s5997_s13 + $0xa8] sm:$0xff]  ;;  %v2876_v44 = vld [vmem:[%s5997_s13 + $0x160] sm:$0xff] }
 0x680   : > { %v7253_v33 = vpop.eup %5267  ;;  %v2551_v22 = vmul.f32 1.442695, %v2523_v39  ;;  %2573 = vadd.xlane.f32.xlu1 %v7251_v52  ;;  %v2510_v11 = vpop.xlane.xlu1 %2509  ;;  %v4705_v31 = vpack.c.bf16 %v2853_v4, %v2849_v19  ;;  %v2848_v39 = vld [vmem:[%s5997_s13 + $0x80] sm:$0xff]  ;;  %4704 = vmatpush1.bf16.msra.mxu1 %v4703_v21  ;;  %v2885_v8 = vld [vmem:[%s5997_s13 + $0x1a8] sm:$0xff]  ;;  %v4719_v21 = vpack.c.bf16 %v2876_v44, %v2872_v38 }
 0x681   : > { %5277 = vpow2.f32 %v2553_v43  ;;  %v2526_v15 = vsub.f32 %v7223_v41, %v2510_v11  ;;  %2571 = vadd.xlane.f32.xlu0 %v7253_v33  ;;  %v2508_v23 = vpop.xlane.xlu0 %2507  ;;  %v2852_v43 = vld [vmem:[%s5997_s13 + $0xa0] sm:$0xff]  ;;  %v2857_v11 = vld [vmem:[%s5997_s13 + $0xc8] sm:$0xff]  ;;  %v4721_v19 = vpack.c.bf16 %v2885_v8, %v2881_v53 }
 0x682   : > { %5279 = vpow2.f32 %v2551_v22  ;;  %v2525_v35 = vsub.f32 %v7226_v45, %v2508_v23  ;;  %v4707_v22 = vpack.c.bf16 %v2852_v43, %v2848_v39  ;;  %4706 = vmatprep.subr.bf16.mxu1 %v4705_v31  ;;  %v2880_v4 = vld [vmem:[%s5997_s13 + $0x180] sm:$0xff]  ;;  %v2889_v39 = vld [vmem:[%s5997_s13 + $0x1c8] sm:$0xff] }
 0x683   : > { %v7259_v59 = vpop.eup %5269  ;;  %v2557_v37 = vmul.f32 1.442695, %v2526_v15  ;;  %v2861_v15 = vld [vmem:[%s5997_s13 + $0xe8] sm:$0xff]  ;;  %v2884_v31 = vld [vmem:[%s5997_s13 + $0x1a0] sm:$0xff] }
 0x684   : > { %v7261_v25 = vpop.eup %5271  ;;  %v2555_v46 = vmul.f32 1.442695, %v2525_v35  ;;  %2577 = vadd.xlane.f32.xlu1 %v7259_v59  ;;  %v4709_v23 = vpack.c.bf16 %v2861_v15, %v2857_v11  ;;  %v2856_v35 = vld [vmem:[%s5997_s13 + $0xc0] sm:$0xff]  ;;  %4708 = vmatpush1.bf16.msra.mxu1 %v4707_v22  ;;  %v2893_v43 = vld [vmem:[%s5997_s13 + $0x1e8] sm:$0xff]  ;;  %v4723_v22 = vpack.c.bf16 %v2884_v31, %v2880_v4 }
 0x685   : > { %5281 = vpow2.f32 %v2557_v37  ;;  %2575 = vadd.xlane.f32.xlu0 %v7261_v25  ;;  %v2860_v37 = vld [vmem:[%s5997_s13 + $0xe0] sm:$0xff]  ;;  %v4725_v11 = vpack.c.bf16 %v2893_v43, %v2889_v39  ;;  %v2905_v32 = vld [vmem:[%s5997_s13 + $0x248] sm:$0xff] }
 0x686   : > { %5283 = vpow2.f32 %v2555_v46  ;;  %v2865_v46 = vld [vmem:[%s5997_s13 + $0x108] sm:$0xff]  ;;  %v4711_v29 = vpack.c.bf16 %v2860_v37, %v2856_v35  ;;  %4710 = vmatprep.subr.bf16.mxu1 %v4709_v23  ;;  %v2888_v15 = vld [vmem:[%s5997_s13 + $0x1c0] sm:$0xff] }
 0x687   : > { %v7265_v41 = vpop.eup %5273  ;;  %v4713_v26 = vpack.c.bf16 %v2869_v55, %v2865_v46  ;;  %v2892_v23 = vld [vmem:[%s5997_s13 + $0x1e0] sm:$0xff]  ;;  %v2897_v35 = vld [vmem:[%s5997_s13 + $0x208] sm:$0xff] }
 0x688   : > { %v7267_v50 = vpop.eup %5275  ;;  %2581 = vadd.xlane.f32.xlu1 %v7265_v41  ;;  %4712 = vmatpush1.bf16.msra.mxu1 %v4711_v29  ;;  %v2901_v37 = vld [vmem:[%s5997_s13 + $0x228] sm:$0xff]  ;;  %v4727_v46 = vpack.c.bf16 %v2892_v23, %v2888_v15  ;;  %v2896_v29 = vld [vmem:[%s5997_s13 + $0x200] sm:$0xff] }
 0x689   : > { %2579 = vadd.xlane.f32.xlu0 %v7267_v50  ;;  %4714 = vmatprep.subr.bf16.mxu1 %v4713_v26  ;;  %v4729_v55 = vpack.c.bf16 %v2901_v37, %v2897_v35  ;;  %v2900_v26 = vld [vmem:[%s5997_s13 + $0x220] sm:$0xff]  ;;  %v2909_v49 = vld [vmem:[%s5997_s13 + $0x268] sm:$0xff] }
 0x68a   : > { %v4731_v10 = vpack.c.bf16 %v2900_v26, %v2896_v29  ;;  %v4733_v30 = vpack.c.bf16 %v2909_v49, %v2905_v32  ;;  %v2913_v38 = vld [vmem:[%s5997_s13 + $0x288] sm:$0xff] }
 0x68b   : > { %v7271_v45 = vpop.eup %5277  ;;  %v2917_v44 = vld [vmem:[%s5997_s13 + $0x2a8] sm:$0xff] }
 0x68c   : > { %v7273_v40 = vpop.eup %5279  ;;  %2585 = vadd.xlane.f32.xlu1 %v7271_v45  ;;  %4716 = vmatpush1.bf16.msra.mxu1 %v4715_v1  ;;  %v2904_v1 = vld [vmem:[%s5997_s13 + $0x240] sm:$0xff]  ;;  %v4737_v8 = vpack.c.bf16 %v2917_v44, %v2913_v38  ;;  %v2921_v4 = vld [vmem:[%s5997_s13 + $0x2c8] sm:$0xff] }
 0x68d   : > { %2583 = vadd.xlane.f32.xlu0 %v7273_v40  ;;  %4718 = vmatprep.subr.bf16.mxu1 %v4717_v0  ;;  %v2908_v0 = vld [vmem:[%s5997_s13 + $0x260] sm:$0xff]  ;;  %v2925_v31 = vld [vmem:[%s5997_s13 + $0x2e8] sm:$0xff] }
 0x68e   : > { %v4735_v53 = vpack.c.bf16 %v2908_v0, %v2904_v1  ;;  %v4741_v43 = vpack.c.bf16 %v2925_v31, %v2921_v4  ;;  %v2929_v15 = vld [vmem:[%s5997_s13 + $0x308] sm:$0xff] }
 0x68f   : > { %v7277_v28 = vpop.eup %5281  ;;  %v2933_v23 = vld [vmem:[%s5997_s13 + $0x328] sm:$0xff] }
 0x690   : > { %v7279_v5 = vpop.eup %5283  ;;  %2589 = vadd.xlane.f32.xlu1 %v7277_v28  ;;  %4720 = vmatpush1.bf16.msra.mxu1 %v4719_v21  ;;  %v2912_v21 = vld [vmem:[%s5997_s13 + $0x280] sm:$0xff]  ;;  %v4745_v37 = vpack.c.bf16 %v2933_v23, %v2929_v15  ;;  %v2937_v29 = vld [vmem:[%s5997_s13 + $0x348] sm:$0xff] }
 0x691   : > { %2587 = vadd.xlane.f32.xlu0 %v7279_v5  ;;  %4722 = vmatprep.subr.bf16.mxu1 %v4721_v19  ;;  %v2916_v19 = vld [vmem:[%s5997_s13 + $0x2a0] sm:$0xff]  ;;  %v2941_v26 = vld [vmem:[%s5997_s13 + $0x368] sm:$0xff] }
 0x692   : > { %v4739_v39 = vpack.c.bf16 %v2916_v19, %v2912_v21  ;;  %v4749_v49 = vpack.c.bf16 %v2941_v26, %v2937_v29  ;;  %v2945_v1 = vld [vmem:[%s5997_s13 + $0x388] sm:$0xff]  ;;  %v2847_v29 = vld [vmem:[%s5997_s13 + $0x78] sm:$0xff] }
 0x693   : > { %v2949_v0 = vld [vmem:[%s5997_s13 + $0x3a8] sm:$0xff] }
 0x694   : > { %4724 = vmatpush1.bf16.msra.mxu1 %v4723_v22  ;;  %v2920_v22 = vld [vmem:[%s5997_s13 + $0x2c0] sm:$0xff]  ;;  %v4753_v44 = vpack.c.bf16 %v2949_v0, %v2945_v1  ;;  %v2953_v21 = vld [vmem:[%s5997_s13 + $0x3c8] sm:$0xff] }
 0x695   : > { %4726 = vmatprep.subr.bf16.mxu1 %v4725_v11  ;;  %v2924_v11 = vld [vmem:[%s5997_s13 + $0x2e0] sm:$0xff]  ;;  %v2957_v19 = vld [vmem:[%s5997_s13 + $0x3e8] sm:$0xff] }
 0x696   : > { %v4743_v35 = vpack.c.bf16 %v2924_v11, %v2920_v22  ;;  %v4757_v31 = vpack.c.bf16 %v2957_v19, %v2953_v21  ;;  %v2855_v21 = vld [vmem:[%s5997_s13 + $0xb8] sm:$0xff] }
 0x698   : > { %4728 = vmatpush1.bf16.msra.mxu1 %v4727_v46  ;;  %v2928_v46 = vld [vmem:[%s5997_s13 + $0x300] sm:$0xff] }
 0x699   : > { %4730 = vmatprep.subr.bf16.mxu1 %v4729_v55  ;;  %v2932_v55 = vld [vmem:[%s5997_s13 + $0x320] sm:$0xff] }
 0x69a   : > { %v4747_v32 = vpack.c.bf16 %v2932_v55, %v2928_v46  ;;  %v2843_v55 = vld [vmem:[%s5997_s13 + $0x58] sm:$0xff] }
 0x69b   : > { %v7358_v0 = vpack.c.bf16 %v2847_v29, %v2843_v55 }
 0x69c   : > { %4732 = vmatpush1.bf16.msra.mxu1 %v4731_v10  ;;  %v2936_v10 = vld [vmem:[%s5997_s13 + $0x340] sm:$0xff] }
 0x69d   : > { %4734 = vmatprep.subr.bf16.mxu1 %v4733_v30  ;;  %v2940_v30 = vld [vmem:[%s5997_s13 + $0x360] sm:$0xff] }
 0x69e   : > { %v4751_v38 = vpack.c.bf16 %v2940_v30, %v2936_v10 }
 0x6a0   : > { %4736 = vmatpush1.bf16.msra.mxu1 %v4735_v53  ;;  %v2944_v53 = vld [vmem:[%s5997_s13 + $0x380] sm:$0xff] }
 0x6a1   : > { %4738 = vmatprep.subr.bf16.mxu1 %v4737_v8  ;;  %v2948_v8 = vld [vmem:[%s5997_s13 + $0x3a0] sm:$0xff] }
 0x6a2   : > { %v4755_v4 = vpack.c.bf16 %v2948_v8, %v2944_v53  ;;  %v2851_v8 = vld [vmem:[%s5997_s13 + $0x98] sm:$0xff] }
 0x6a4   : > { %4740 = vmatpush1.bf16.msra.mxu1 %v4739_v39 }
 0x6a5   : > { %4742 = vmatprep.subr.bf16.mxu1 %v4741_v43 }
 0x6a8   : > { %4744 = vmatpush1.bf16.msra.mxu1 %v4743_v35  ;;  %v2834_v35 = vld [vmem:[%s5997_s13 + $0x10] sm:$0xff] }
 0x6a9   : > { %4746 = vmatprep.subr.bf16.mxu1 %v4745_v37  ;;  %v2838_v37 = vld [vmem:[%s5997_s13 + $0x30] sm:$0xff] }
 0x6aa   : > { %v7355_v30 = vpack.c.bf16 %v2838_v37, %v2834_v35  ;;  %v2863_v35 = vld [vmem:[%s5997_s13 + $0xf8] sm:$0xff] }
 0x6ac   : > { %4748 = vmatpush1.bf16.msra.mxu1 %v4747_v32 }
 0x6ad   : > { %4750 = vmatprep.subr.bf16.mxu1 %v4749_v49 }
 0x6b0   : > { %4752 = vmatpush1.bf16.msra.mxu1 %v4751_v38  ;;  %v2842_v38 = vld [vmem:[%s5997_s13 + $0x50] sm:$0xff] }
 0x6b1   : > { %4754 = vmatprep.subr.bf16.mxu1 %v4753_v44  ;;  %v2846_v44 = vld [vmem:[%s5997_s13 + $0x70] sm:$0xff] }
 0x6b4   : > { %4756 = vmatpush1.bf16.msra.mxu1 %v4755_v4 }
 0x6b5   : > { %4758 = vmatprep.subr.bf16.mxu1 %v4757_v31  ;;  %v7366_v31 = vpack.c.bf16 %v2846_v44, %v2842_v38  ;;  %v2871_v38 = vld [vmem:[%s5997_s13 + $0x138] sm:$0xff] }
 0x701   : > { %v2562_v39 = vpop.xlane.xlu1 %2561 }
 0x702   : > { %5285 = vrcp.f32 %v2562_v39  ;;  %v2560_v43 = vpop.xlane.xlu0 %2559 }
 0x703   : > { %5287 = vrcp.f32 %v2560_v43  ;;  %v7370_v43 = vpack.c.bf16 %v2855_v21, %v2851_v8 }
 0x705   : > { %v2566_v22 = vpop.xlane.xlu1 %2565 }
 0x706   : > { %5289 = vrcp.f32 %v2566_v22  ;;  %v2564_v11 = vpop.xlane.xlu0 %2563  ;;  %v2850_v22 = vld [vmem:[%s5997_s13 + $0x90] sm:$0xff] }
 0x707   : > { %5291 = vrcp.f32 %v2564_v11  ;;  %v2854_v11 = vld [vmem:[%s5997_s13 + $0xb0] sm:$0xff] }
 0x708   : > { %v7378_v55 = vpack.c.bf16 %v2854_v11, %v2850_v22  ;;  %v2879_v22 = vld [vmem:[%s5997_s13 + $0x178] sm:$0xff] }
 0x709   : > { %v2570_v15 = vpop.xlane.xlu1 %2569 }
 0x70a   : > { %5293 = vrcp.f32 %v2570_v15  ;;  %v2568_v23 = vpop.xlane.xlu0 %2567 }
 0x70b   : > { %5295 = vrcp.f32 %v2568_v23  ;;  %v2859_v23 = vld [vmem:[%s5997_s13 + $0xd8] sm:$0xff] }
 0x70c   : > { %v5286_v46 = vpop.eup %5285 }
 0x70d   : > { %v5288_v26 = vpop.eup %5287  ;;  %v2574_v32 = vpop.xlane.xlu1 %2573  ;;  %v2608_v1 = vmul.f32 %v5286_v46, %v7229_v9 }
 0x70e   : > { %5297 = vrcp.f32 %v2574_v32  ;;  %v2572_v49 = vpop.xlane.xlu0 %2571  ;;  %v2607_v10 = vmul.f32 %v5288_v26, %v7231_v18  ;;  %v7382_v26 = vpack.c.bf16 %v2863_v35, %v2859_v23  ;;  %v2858_v32 = vld [vmem:[%s5997_s13 + $0xd0] sm:$0xff] }
 0x70f   : > { %5299 = vrcp.f32 %v2572_v49  ;;  %v2862_v49 = vld [vmem:[%s5997_s13 + $0xf0] sm:$0xff] }
 0x710   : > { %v5290_v53 = vpop.eup %5289  ;;  %4161 = vmatprep.mubr.f32.mxu0 %v2607_v10  ;;  %v7390_v8 = vpack.c.bf16 %v2862_v49, %v2858_v32 }
 0x711   : > { %v5292_v19 = vpop.eup %5291  ;;  %v2578_v4 = vpop.xlane.xlu1 %2577  ;;  %4162 = vmatmul.mubr.f32.vlgmr.msra.gmra.mrb[64].mxu0 %v2608_v1  ;;  %v2610_v39 = vmul.f32 %v5290_v53, %v7235_v6  ;;  %v2867_v1 = vld [vmem:[%s5997_s13 + $0x118] sm:$0xff] }
 0x712   : > { %5301 = vrcp.f32 %v2578_v4  ;;  %v2576_v18 = vpop.xlane.xlu0 %2575  ;;  %v2609_v9 = vmul.f32 %v5292_v19, %v7237_v17  ;;  %4764 = vmatpush1.bf16.msra.mxu0 %v7355_v30  ;;  %v7394_v19 = vpack.c.bf16 %v2871_v38, %v2867_v1  ;;  %v2866_v4 = vld [vmem:[%s5997_s13 + $0x110] sm:$0xff] }
 0x713   : > { %5303 = vrcp.f32 %v2576_v18  ;;  %4766 = vmatprep.subr.bf16.mxu0 %v7358_v0  ;;  %v2870_v18 = vld [vmem:[%s5997_s13 + $0x130] sm:$0xff] }
 0x714   : > { %v5294_v15 = vpop.eup %5293  ;;  %4164 = vmatprep.mubr.f32.mxu0 %v2609_v9  ;;  %v7402_v23 = vpack.c.bf16 %v2870_v18, %v2866_v4  ;;  %v2882_v38 = vld [vmem:[%s5997_s13 + $0x190] sm:$0xff] }
 0x715   : > { %v5296_v17 = vpop.eup %5295  ;;  %v2582_v37 = vpop.xlane.xlu1 %2581  ;;  %4165 = vmatmul.mubr.f32.gmra.mrb[66].mxu0 %v2610_v39  ;;  %v2612_v29 = vmul.f32 %v5294_v15, %v7243_v61  ;;  %v2875_v39 = vld [vmem:[%s5997_s13 + $0x158] sm:$0xff] }
 0x716   : > { %5305 = vrcp.f32 %v2582_v37  ;;  %v2580_v46 = vpop.xlane.xlu0 %2579  ;;  %v2611_v6 = vmul.f32 %v5296_v17, %v7245_v56  ;;  %4768 = vmatpush1.bf16.msra.mxu0 %v7366_v31  ;;  %v7406_v17 = vpack.c.bf16 %v2879_v22, %v2875_v39  ;;  %v2874_v37 = vld [vmem:[%s5997_s13 + $0x150] sm:$0xff] }
 0x717   : > { %5307 = vrcp.f32 %v2580_v46  ;;  %4770 = vmatprep.subr.bf16.mxu0 %v7370_v43  ;;  %v2878_v46 = vld [vmem:[%s5997_s13 + $0x170] sm:$0xff] }
 0x718   : > { %v5298_v10 = vpop.eup %5297  ;;  %4167 = vmatprep.mubr.f32.mxu0 %v2611_v6  ;;  %v2894_v39 = vld [vmem:[%s5997_s13 + $0x1f0] sm:$0xff] }
 0x719   : > { %v5300_v56 = vpop.eup %5299  ;;  %v2586_v44 = vpop.xlane.xlu1 %2585  ;;  %4168 = vmatmul.mubr.f32.gmra.mrb[68].mxu0 %v2612_v29  ;;  %v2614_v21 = vmul.f32 %v5298_v10, %v7251_v52  ;;  %v2887_v29 = vld [vmem:[%s5997_s13 + $0x1b8] sm:$0xff] }
 0x71a   : > { %5309 = vrcp.f32 %v2586_v44  ;;  %v2584_v53 = vpop.xlane.xlu0 %2583  ;;  %v2613_v61 = vmul.f32 %v5300_v56, %v7253_v33  ;;  %4772 = vmatpush1.bf16.msra.mxu0 %v7378_v55  ;;  %v2886_v56 = vld [vmem:[%s5997_s13 + $0x1b0] sm:$0xff] }
 0x71b   : > { %5311 = vrcp.f32 %v2584_v53  ;;  %4774 = vmatprep.subr.bf16.mxu0 %v7382_v26  ;;  %v2891_v53 = vld [vmem:[%s5997_s13 + $0x1d8] sm:$0xff] }
 0x71c   : > { %v5302_v9 = vpop.eup %5301  ;;  %4170 = vmatprep.mubr.f32.mxu0 %v2613_v61 }
 0x71d   : > { %v5304_v33 = vpop.eup %5303  ;;  %v2590_v11 = vpop.xlane.xlu1 %2589  ;;  %4171 = vmatmul.mubr.f32.gmra.mrb[70].mxu0 %v2614_v21  ;;  %v2616_v35 = vmul.f32 %v5302_v9, %v7259_v59  ;;  %v7414_v59 = vpack.c.bf16 %v2878_v46, %v2874_v37  ;;  %v2890_v9 = vld [vmem:[%s5997_s13 + $0x1d0] sm:$0xff] }
 0x71e   : > { %5313 = vrcp.f32 %v2590_v11  ;;  %v2588_v15 = vpop.xlane.xlu0 %2587  ;;  %v2615_v52 = vmul.f32 %v5304_v33, %v7261_v25  ;;  %4776 = vmatpush1.bf16.msra.mxu0 %v7390_v8  ;;  %v2883_v25 = vld [vmem:[%s5997_s13 + $0x198] sm:$0xff]  ;;  %v2898_v37 = vld [vmem:[%s5997_s13 + $0x210] sm:$0xff] }
 0x71f   : > { %5315 = vrcp.f32 %v2588_v15  ;;  %4778 = vmatprep.subr.bf16.mxu0 %v7394_v19  ;;  %v7418_v1 = vpack.c.bf16 %v2887_v29, %v2883_v25  ;;  %v2899_v33 = vld [vmem:[%s5997_s13 + $0x218] sm:$0xff]  ;;  %v2902_v46 = vld [vmem:[%s5997_s13 + $0x230] sm:$0xff] }
 0x720   : > { %v5306_v6 = vpop.eup %5305  ;;  %4173 = vmatprep.mubr.f32.mxu0 %v2615_v52  ;;  %v7449_v25 = vpack.c.bf16 %v2902_v46, %v2898_v37  ;;  %v2906_v29 = vld [vmem:[%s5997_s13 + $0x250] sm:$0xff]  ;;  %v2939_v37 = vld [vmem:[%s5997_s13 + $0x358] sm:$0xff] }
 0x721   : > { %v5308_v32 = vpop.eup %5307  ;;  %4174 = vmatmul.mubr.f32.gmra.mrb[72].mxu0 %v2616_v35  ;;  %v2618_v10 = vmul.f32 %v5306_v6, %v7265_v41  ;;  %v7426_v41 = vpack.c.bf16 %v2886_v56, %v2882_v38  ;;  %v2907_v6 = vld [vmem:[%s5997_s13 + $0x258] sm:$0xff] }
 0x722   : > { %v2617_v49 = vmul.f32 %v5308_v32, %v7267_v50  ;;  %4780 = vmatpush1.bf16.msra.mxu0 %v7402_v23  ;;  %v2895_v50 = vld [vmem:[%s5997_s13 + $0x1f8] sm:$0xff]  ;;  %v2910_v32 = vld [vmem:[%s5997_s13 + $0x270] sm:$0xff] }
 0x723   : > { %4782 = vmatprep.subr.bf16.mxu0 %v7406_v17  ;;  %v7430_v18 = vpack.c.bf16 %v2895_v50, %v2891_v53  ;;  %v7459_v38 = vpack.c.bf16 %v2910_v32, %v2906_v29  ;;  %v2918_v53 = vld [vmem:[%s5997_s13 + $0x2b0] sm:$0xff]  ;;  %v2923_v50 = vld [vmem:[%s5997_s13 + $0x2d8] sm:$0xff] }
 0x724   : > { %v5310_v44 = vpop.eup %5309  ;;  %4176 = vmatprep.mubr.f32.mxu0 %v2617_v49  ;;  %v2915_v49 = vld [vmem:[%s5997_s13 + $0x298] sm:$0xff]  ;;  %v2938_v29 = vld [vmem:[%s5997_s13 + $0x350] sm:$0xff] }
 0x725   : > { %v5312_v61 = vpop.eup %5311  ;;  %4177 = vmatmul.mubr.f32.gmra.mrb[74].mxu0 %v2618_v10  ;;  %v2620_v4 = vmul.f32 %v5310_v44, %v7271_v45  ;;  %v7438_v45 = vpack.c.bf16 %v2894_v39, %v2890_v9  ;;  %v2919_v10 = vld [vmem:[%s5997_s13 + $0x2b8] sm:$0xff]  ;;  %v2914_v44 = vld [vmem:[%s5997_s13 + $0x290] sm:$0xff] }
 0x726   : > { %v2619_v21 = vmul.f32 %v5312_v61, %v7273_v40  ;;  %4784 = vmatpush1.bf16.msra.mxu0 %v7414_v59  ;;  %v2903_v40 = vld [vmem:[%s5997_s13 + $0x238] sm:$0xff]  ;;  %v7462_v56 = vpack.c.bf16 %v2919_v10, %v2915_v49  ;;  %v2922_v9 = vld [vmem:[%s5997_s13 + $0x2d0] sm:$0xff] }
 0x727   : > { %4786 = vmatprep.subr.bf16.mxu0 %v7418_v1  ;;  %v7442_v35 = vpack.c.bf16 %v2903_v40, %v2899_v33  ;;  %v2927_v61 = vld [vmem:[%s5997_s13 + $0x2f8] sm:$0xff]  ;;  %v2926_v39 = vld [vmem:[%s5997_s13 + $0x2f0] sm:$0xff] }
 0x728   : > { %v5314_v22 = vpop.eup %5313  ;;  %4179 = vmatprep.mubr.f32.mxu0 %v2619_v21  ;;  %v7469_v21 = vpack.c.bf16 %v2918_v53, %v2914_v44  ;;  %v2935_v33 = vld [vmem:[%s5997_s13 + $0x338] sm:$0xff]  ;;  %v7479_v40 = vpack.c.bf16 %v2926_v39, %v2922_v9  ;;  %v2942_v32 = vld [vmem:[%s5997_s13 + $0x370] sm:$0xff] }
 0x729   : > { %v5316_v11 = vpop.eup %5315  ;;  %4180 = vmatmul.mubr.f32.gmra.mrb[76].mxu0 %v2620_v4  ;;  %v2622_v52 = vmul.f32 %v5314_v22, %v7277_v28  ;;  %v7472_v4 = vpack.c.bf16 %v2927_v61, %v2923_v50  ;;  %v2931_v22 = vld [vmem:[%s5997_s13 + $0x318] sm:$0xff]  ;;  %v7499_v44 = vpack.c.bf16 %v2942_v32, %v2938_v29  ;;  %v2946_v50 = vld [vmem:[%s5997_s13 + $0x390] sm:$0xff] }
 0x72a   : > { %v2621_v15 = vmul.f32 %v5316_v11, %v7279_v5  ;;  %4788 = vmatpush1.bf16.msra.mxu0 %v7426_v41  ;;  %v2911_v5 = vld [vmem:[%s5997_s13 + $0x278] sm:$0xff]  ;;  %v7482_v11 = vpack.c.bf16 %v2935_v33, %v2931_v22  ;;  %v2950_v61 = vld [vmem:[%s5997_s13 + $0x3b0] sm:$0xff] }
 0x72b   : > { %4790 = vmatprep.subr.bf16.mxu0 %v7430_v18  ;;  %v7452_v28 = vpack.c.bf16 %v2911_v5, %v2907_v6  ;;  %v2943_v46 = vld [vmem:[%s5997_s13 + $0x378] sm:$0xff]  ;;  %v7509_v22 = vpack.c.bf16 %v2950_v61, %v2946_v50  ;;  %v2958_v29 = vld [vmem:[%s5997_s13 + $0x3f0] sm:$0xff] }
 0x72c   : > { %4182 = vmatprep.mubr.f32.mxu0 %v2621_v15  ;;  %v2930_v15 = vld [vmem:[%s5997_s13 + $0x310] sm:$0xff]  ;;  %v7492_v5 = vpack.c.bf16 %v2943_v46, %v2939_v37  ;;  %v2947_v49 = vld [vmem:[%s5997_s13 + $0x398] sm:$0xff] }
 0x72d   : > { %4183 = vmatmul.mubr.f32.gmra.mrb[78].mxu0 %v2622_v52  ;;  %v2934_v52 = vld [vmem:[%s5997_s13 + $0x330] sm:$0xff]  ;;  %v2951_v10 = vld [vmem:[%s5997_s13 + $0x3b8] sm:$0xff] }
 0x72e   : > { %4792 = vmatpush1.bf16.msra.mxu0 %v7438_v45  ;;  %v7489_v6 = vpack.c.bf16 %v2934_v52, %v2930_v15  ;;  %v7502_v53 = vpack.c.bf16 %v2951_v10, %v2947_v49  ;;  %v2955_v9 = vld [vmem:[%s5997_s13 + $0x3d8] sm:$0xff]  ;;  %v2952_v15 = vld [vmem:[%s5997_s13 + $0x3c0] sm:$0xff]  ;;  %v2954_v37 = vld [vmem:[%s5997_s13 + $0x3d0] sm:$0xff] }
 0x72f   : > { %4794 = vmatprep.subr.bf16.mxu0 %v7442_v35  ;;  %v2959_v39 = vld [vmem:[%s5997_s13 + $0x3f8] sm:$0xff]  ;;  %v2956_v52 = vld [vmem:[%s5997_s13 + $0x3e0] sm:$0xff]  ;;  %v7520_v32 = vpack.c.bf16 %v2958_v29, %v2954_v37  ;;  %v2783_v37 = vld [vmem:[#allocation2 + $0x78] sm:$0xff] }
 0x730   : > { %v7512_v33 = vpack.c.bf16 %v2959_v39, %v2955_v9  ;;  %v4759_v46 = vpack.c.bf16 %v2956_v52, %v2952_v15  ;;  %v2782_v15 = vld [vmem:[#allocation2 + $0x70] sm:$0xff]  ;;  %v2781_v52 = vld [vmem:[#allocation2 + $0x68] sm:$0xff] }
 0x732   : > { %4796 = vmatpush1.bf16.msra.mxu0 %v7449_v25  ;;  %4760 = vmatpush1.bf16.msra.mxu1 %v4759_v46 }
 0x733   : > { %4798 = vmatprep.subr.bf16.mxu0 %v7452_v28  ;;  %4825 = vmatprep.subr.bf16.mxu1 %v7289_v63 }
 0x736   : > { %4800 = vmatpush1.bf16.msra.mxu0 %v7459_v38 }
 0x737   : > { %4802 = vmatprep.subr.bf16.mxu0 %v7462_v56 }
 0x73a   : > { %4804 = vmatpush1.bf16.msra.mxu0 %v7469_v21 }
 0x73b   : > { %4806 = vmatprep.subr.bf16.mxu0 %v7472_v4 }
 0x73e   : > { %4808 = vmatpush1.bf16.msra.mxu0 %v7479_v40 }
 0x73f   : > { %4810 = vmatprep.subr.bf16.mxu0 %v7482_v11 }
 0x742   : > { %4812 = vmatpush1.bf16.msra.mxu0 %v7489_v6 }
 0x743   : > { %4814 = vmatprep.subr.bf16.mxu0 %v7492_v5 }
 0x746   : > { %4816 = vmatpush1.bf16.msra.mxu0 %v7499_v44 }
 0x747   : > { %4818 = vmatprep.subr.bf16.mxu0 %v7502_v53 }
 0x74a   : > { %4820 = vmatpush1.bf16.msra.mxu0 %v7509_v22 }
 0x74b   : > { %4822 = vmatprep.subr.bf16.mxu0 %v7512_v33 }
 0x74e   : > { %4824 = vmatpush1.bf16.msra.mxu0 %v7520_v32 }
 0x7e4   : > { %v4163_v49 = vpop.f32.mrb[64].mxu0 }
 0x7e5   : > { %v2689_v10 = vpop.f32.mrb[65].mxu0 }
 0x7e6   : > { %3024 = vmatprep.mubr.f32.mxu1 %v2689_v10  ;;  %3185 = vmatprep.mubr.f32.mxu0 %v2689_v10 }
 0x7e7   : > { %3025 = vmatmul.mubr.f32.vlgmr.msra.gmra.mrb[80].mxu1 %v7181_v62  ;;  %3186 = vmatmul.mubr.f32.vlgmr.msra.gmra.mrb[80].mxu0 %v7181_v62 }
 0x7e8   : > { %v4166_v50 = vpop.f32.mrb[66].mxu0  ;;  %3030 = vmatprep.mubr.f32.mxu1 %v4163_v49  ;;  %4841 = vmatpush1.bf16.msra.mxu1 %v7355_v30 }
 0x7e9   : > { %3191 = vmatprep.mubr.f32.mxu0 %v4163_v49  ;;  %v2699_v61 = vpop.f32.mrb[67].mxu0  ;;  %4826 = vmatprep.subr.bf16.mxu1 %v7358_v0 }
 0x7eb   : > { %3031 = vmatmul.mubr.f32.gmra.mrb[82].mxu1 %v7179_v16  ;;  %3192 = vmatmul.mubr.f32.gmra.mrb[82].mxu0 %v7179_v16 }
 0x7ec   : > { %v4169_v63 = vpop.f32.mrb[68].mxu0  ;;  %3036 = vmatprep.mubr.f32.mxu1 %v2699_v61  ;;  %4842 = vmatpush1.bf16.msra.mxu1 %v7366_v31 }
 0x7ed   : > { %3197 = vmatprep.mubr.f32.mxu0 %v2699_v61  ;;  %v2709_v9 = vpop.f32.mrb[69].mxu0  ;;  %4827 = vmatprep.subr.bf16.mxu1 %v7370_v43 }
 0x7ef   : > { %3037 = vmatmul.mubr.f32.gmra.mrb[84].mxu1 %v7185_v20  ;;  %3198 = vmatmul.mubr.f32.gmra.mrb[84].mxu0 %v7185_v20 }
 0x7f0   : > { %v4172_v62 = vpop.f32.mrb[70].mxu0  ;;  %3042 = vmatprep.mubr.f32.mxu1 %v4166_v50  ;;  %4843 = vmatpush1.bf16.msra.mxu1 %v7378_v55 }
 0x7f1   : > { %3203 = vmatprep.mubr.f32.mxu0 %v4166_v50  ;;  %v2719_v30 = vpop.f32.mrb[71].mxu0  ;;  %4828 = vmatprep.subr.bf16.mxu1 %v7382_v26 }
 0x7f3   : > { %3043 = vmatmul.mubr.f32.gmra.mrb[86].mxu1 %v7183_v7  ;;  %3204 = vmatmul.mubr.f32.gmra.mrb[86].mxu0 %v7183_v7 }
 0x7f4   : > { %v4175_v16 = vpop.f32.mrb[72].mxu0  ;;  %3048 = vmatprep.mubr.f32.mxu1 %v2709_v9  ;;  %4844 = vmatpush1.bf16.msra.mxu1 %v7390_v8 }
 0x7f5   : > { %3209 = vmatprep.mubr.f32.mxu0 %v2709_v9  ;;  %v2729_v0 = vpop.f32.mrb[73].mxu0  ;;  %4829 = vmatprep.subr.bf16.mxu1 %v7394_v19  ;;  %v2784_v9 = vld [vmem:[#allocation2 + $0x80] sm:$0xff] }
 0x7f7   : > { %3049 = vmatmul.mubr.f32.gmra.mrb[88].mxu1 %v7189_v42  ;;  %3210 = vmatmul.mubr.f32.gmra.mrb[88].mxu0 %v7189_v42 }
 0x7f8   : > { %v4178_v20 = vpop.f32.mrb[74].mxu0  ;;  %3054 = vmatprep.mubr.f32.mxu1 %v4169_v63  ;;  %4845 = vmatpush1.bf16.msra.mxu1 %v7402_v23 }
 0x7f9   : > { %3215 = vmatprep.mubr.f32.mxu0 %v4169_v63  ;;  %v2739_v31 = vpop.f32.mrb[75].mxu0  ;;  %4830 = vmatprep.subr.bf16.mxu1 %v7406_v17  ;;  %v2772_v17 = vld [vmem:[#allocation2 + $0x20] sm:$0xff] }
 0x7fb   : > { %3055 = vmatmul.mubr.f32.gmra.mrb[90].mxu1 %v7187_v13  ;;  %3216 = vmatmul.mubr.f32.gmra.mrb[90].mxu0 %v7187_v13  ;;  %v2768_v13 = vld [vmem:[#allocation2] sm:$0xff] }
 0x7fc   : > { %v4181_v7 = vpop.f32.mrb[76].mxu0  ;;  %3060 = vmatprep.mubr.f32.mxu1 %v2719_v30  ;;  %4846 = vmatpush1.bf16.msra.mxu1 %v7414_v59  ;;  %v2775_v59 = vld [vmem:[#allocation2 + $0x38] sm:$0xff] }
 0x7fd   : > { %3221 = vmatprep.mubr.f32.mxu0 %v2719_v30  ;;  %v2749_v43 = vpop.f32.mrb[77].mxu0  ;;  %4831 = vmatprep.subr.bf16.mxu1 %v7418_v1  ;;  %v2785_v30 = vld [vmem:[#allocation2 + $0x88] sm:$0xff] }
 0x7ff   : > { %3061 = vmatmul.mubr.f32.gmra.mrb[92].mxu1 %v7193_v3  ;;  %3222 = vmatmul.mubr.f32.gmra.mrb[92].mxu0 %v7193_v3  ;;  %v2769_v3 = vld [vmem:[#allocation2 + $0x8] sm:$0xff] }
 0x800   : > { %v4184_v42 = vpop.f32.mrb[78].mxu0  ;;  %3066 = vmatprep.mubr.f32.mxu1 %v4172_v62  ;;  %4847 = vmatpush1.bf16.msra.mxu1 %v7426_v41 }
 0x801   : > { %3227 = vmatprep.mubr.f32.mxu0 %v4172_v62  ;;  %v2759_v55 = vpop.f32.mrb[79].mxu0  ;;  %4832 = vmatprep.subr.bf16.mxu1 %v7430_v18  ;;  %v2786_v62 = vld [vmem:[#allocation2 + $0x90] sm:$0xff] }
 0x803   : > { %3067 = vmatmul.mubr.f32.gmra.mrb[94].mxu1 %v7191_v36  ;;  %3228 = vmatmul.mubr.f32.gmra.mrb[94].mxu0 %v7191_v36  ;;  %v2770_v36 = vld [vmem:[#allocation2 + $0x10] sm:$0xff] }
 0x804   : > { %3072 = vmatprep.mubr.f32.mxu1 %v2729_v0  ;;  %4848 = vmatpush1.bf16.msra.mxu1 %v7438_v45 }
 0x805   : > { %3233 = vmatprep.mubr.f32.mxu0 %v2729_v0  ;;  %4833 = vmatprep.subr.bf16.mxu1 %v7442_v35 }
 0x807   : > { %3073 = vmatmul.mubr.f32.gmra.mrb[96].mxu1 %v7197_v14  ;;  %3234 = vmatmul.mubr.f32.gmra.mrb[96].mxu0 %v7197_v14 }
 0x808   : > { %3078 = vmatprep.mubr.f32.mxu1 %v4175_v16  ;;  %4849 = vmatpush1.bf16.msra.mxu1 %v7449_v25 }
 0x809   : > { %3239 = vmatprep.mubr.f32.mxu0 %v4175_v16  ;;  %4834 = vmatprep.subr.bf16.mxu1 %v7452_v28  ;;  %v2787_v16 = vld [vmem:[#allocation2 + $0x98] sm:$0xff] }
 0x80b   : > { %3079 = vmatmul.mubr.f32.gmra.mrb[98].mxu1 %v7195_v2  ;;  %3240 = vmatmul.mubr.f32.gmra.mrb[98].mxu0 %v7195_v2  ;;  %v2771_v2 = vld [vmem:[#allocation2 + $0x18] sm:$0xff] }
 0x80c   : > { %3084 = vmatprep.mubr.f32.mxu1 %v2739_v31  ;;  %4850 = vmatpush1.bf16.msra.mxu1 %v7459_v38  ;;  %v2776_v38 = vld [vmem:[#allocation2 + $0x40] sm:$0xff] }
 0x80d   : > { %3245 = vmatprep.mubr.f32.mxu0 %v2739_v31  ;;  %4835 = vmatprep.subr.bf16.mxu1 %v7462_v56  ;;  %v2778_v56 = vld [vmem:[#allocation2 + $0x50] sm:$0xff] }
 0x80f   : > { %3085 = vmatmul.mubr.f32.gmra.mrb[100].mxu1 %v7201_v12  ;;  %3246 = vmatmul.mubr.f32.gmra.mrb[100].mxu0 %v7201_v12 }
 0x810   : > { %3090 = vmatprep.mubr.f32.mxu1 %v4178_v20  ;;  %4851 = vmatpush1.bf16.msra.mxu1 %v7469_v21  ;;  %v2777_v21 = vld [vmem:[#allocation2 + $0x48] sm:$0xff] }
 0x811   : > { %3251 = vmatprep.mubr.f32.mxu0 %v4178_v20  ;;  %4836 = vmatprep.subr.bf16.mxu1 %v7472_v4  ;;  %v2779_v4 = vld [vmem:[#allocation2 + $0x58] sm:$0xff] }
 0x813   : > { %3091 = vmatmul.mubr.f32.gmra.mrb[102].mxu1 %v7199_v54  ;;  %3252 = vmatmul.mubr.f32.gmra.mrb[102].mxu0 %v7199_v54 }
 0x814   : > { %3096 = vmatprep.mubr.f32.mxu1 %v2749_v43  ;;  %4852 = vmatpush1.bf16.msra.mxu1 %v7479_v40 }
 0x815   : > { %4837 = vmatprep.subr.bf16.mxu1 %v7482_v11 }
 0x817   : > { %3097 = vmatmul.mubr.f32.gmra.mrb[104].mxu1 %v7205_v48 }
 0x818   : > { %3102 = vmatprep.mubr.f32.mxu1 %v4181_v7  ;;  %4853 = vmatpush1.bf16.msra.mxu1 %v7489_v6 }
 0x819   : > { %4838 = vmatprep.subr.bf16.mxu1 %v7492_v5 }
 0x81b   : > { %3103 = vmatmul.mubr.f32.gmra.mrb[106].mxu1 %v7203_v27 }
 0x81c   : > { %3108 = vmatprep.mubr.f32.mxu1 %v2759_v55  ;;  %4854 = vmatpush1.bf16.msra.mxu1 %v7499_v44 }
 0x81d   : > { %4839 = vmatprep.subr.bf16.mxu1 %v7502_v53 }
 0x81f   : > { %3109 = vmatmul.mubr.f32.gmra.mrb[108].mxu1 %v7209_v58 }
 0x820   : > { %3114 = vmatprep.mubr.f32.mxu1 %v4184_v42  ;;  %4855 = vmatpush1.bf16.msra.mxu1 %v7509_v22 }
 0x821   : > { %4840 = vmatprep.subr.bf16.mxu1 %v7512_v33  ;;  %v2780_v33 = vld [vmem:[#allocation2 + $0x60] sm:$0xff] }
 0x823   : > { %3115 = vmatmul.mubr.f32.gmra.mrb[110].mxu1 %v7207_v24 }
 0x824   : > { %4856 = vmatpush1.bf16.msra.mxu1 %v7520_v32  ;;  %3257 = vmatprep.mubr.f32.mxu1 %v2749_v43 }
 0x827   : > { %3258 = vmatmul.mubr.f32.vlgmr.msra.gmra.mrb[112].mxu1 %v7205_v48 }
 0x828   : > { %3263 = vmatprep.mubr.f32.mxu1 %v4181_v7 }
 0x82b   : > { %3264 = vmatmul.mubr.f32.gmra.mrb[114].mxu1 %v7203_v27  ;;  %v2774_v27 = vld [vmem:[#allocation2 + $0x30] sm:$0xff] }
 0x82c   : > { %3269 = vmatprep.mubr.f32.mxu1 %v2759_v55 }
 0x82f   : > { %3270 = vmatmul.mubr.f32.gmra.mrb[116].mxu1 %v7209_v58  ;;  %v2773_v58 = vld [vmem:[#allocation2 + $0x28] sm:$0xff] }
 0x830   : > { %3275 = vmatprep.mubr.f32.mxu1 %v4184_v42 }
 0x833   : > { %3276 = vmatmul.mubr.f32.gmra.mrb[118].mxu1 %v7207_v24 }
 0x8ba   : > { %v3026_v14 = vpop.f32.mrb[80].mxu1  ;;  %v3187_v54 = vpop.f32.mrb[80].mxu0 }
 0x8bb   : > { %v3282_v12 = vadd.f32 %v3026_v14, %v2768_v13  ;;  %v3284_v26 = vadd.f32 %v3187_v54, %v2770_v36  ;;  %v3028_v8 = vpop.f32.mrb[81].mxu1  ;;  %v3189_v19 = vpop.f32.mrb[81].mxu0  ;;  %v2788_v36 = vld [vmem:[#allocation2 + $0xa0] sm:$0xff]  ;;  %v2791_v14 = vld [vmem:[#allocation2 + $0xb8] sm:$0xff] }
 0x8bc   : > { %v3283_v48 = vadd.f32 %v3028_v8, %v2769_v3  ;;  %v3285_v23 = vadd.f32 %v3189_v19, %v2771_v2  ;;  %v2790_v3 = vld [vmem:[#allocation2 + $0xb0] sm:$0xff]  ;;  %v2789_v2 = vld [vmem:[#allocation2 + $0xa8] sm:$0xff] }
 0x8bd   : > { %3346 = vst [vmem:[#allocation2] sm:$0xff] %v3282_v12  ;;  %3348 = vst [vmem:[#allocation2 + $0x10] sm:$0xff] %v3284_v26 }
 0x8be   : > { %3347 = vst [vmem:[#allocation2 + $0x8] sm:$0xff] %v3283_v48  ;;  %3349 = vst [vmem:[#allocation2 + $0x18] sm:$0xff] %v3285_v23  ;;  %v3032_v24 = vpop.f32.mrb[82].mxu1  ;;  %v3193_v1 = vpop.f32.mrb[82].mxu0 }
 0x8bf   : > { %v3286_v41 = vadd.f32 %v3032_v24, %v2772_v17  ;;  %v3288_v18 = vadd.f32 %v3193_v1, %v2774_v27  ;;  %v3034_v45 = vpop.f32.mrb[83].mxu1  ;;  %v3195_v35 = vpop.f32.mrb[83].mxu0  ;;  %v2792_v27 = vld [vmem:[#allocation2 + $0xc0] sm:$0xff]  ;;  %v2795_v24 = vld [vmem:[#allocation2 + $0xd8] sm:$0xff] }
 0x8c0   : > { %v3287_v25 = vadd.f32 %v3034_v45, %v2773_v58  ;;  %v3289_v28 = vadd.f32 %v3195_v35, %v2775_v59  ;;  %v2794_v58 = vld [vmem:[#allocation2 + $0xd0] sm:$0xff]  ;;  %v2793_v59 = vld [vmem:[#allocation2 + $0xc8] sm:$0xff] }
 0x8c1   : > { %3350 = vst [vmem:[#allocation2 + $0x20] sm:$0xff] %v3286_v41  ;;  %3352 = vst [vmem:[#allocation2 + $0x30] sm:$0xff] %v3288_v18 }
 0x8c2   : > { %3351 = vst [vmem:[#allocation2 + $0x28] sm:$0xff] %v3287_v25  ;;  %3353 = vst [vmem:[#allocation2 + $0x38] sm:$0xff] %v3289_v28  ;;  %v3038_v40 = vpop.f32.mrb[84].mxu1  ;;  %v3199_v11 = vpop.f32.mrb[84].mxu0 }
 0x8c3   : > { %v3290_v6 = vadd.f32 %v3038_v40, %v2776_v38  ;;  %v3292_v5 = vadd.f32 %v3199_v11, %v2778_v56  ;;  %v3040_v44 = vpop.f32.mrb[85].mxu1  ;;  %v3201_v53 = vpop.f32.mrb[85].mxu0  ;;  %v2796_v56 = vld [vmem:[#allocation2 + $0xe0] sm:$0xff]  ;;  %v2799_v40 = vld [vmem:[#allocation2 + $0xf8] sm:$0xff] }
 0x8c4   : > { %v3291_v39 = vadd.f32 %v3040_v44, %v2777_v21  ;;  %v3293_v22 = vadd.f32 %v3201_v53, %v2779_v4  ;;  %v2798_v21 = vld [vmem:[#allocation2 + $0xf0] sm:$0xff]  ;;  %v2797_v4 = vld [vmem:[#allocation2 + $0xe8] sm:$0xff] }
 0x8c5   : > { %3354 = vst [vmem:[#allocation2 + $0x40] sm:$0xff] %v3290_v6  ;;  %3356 = vst [vmem:[#allocation2 + $0x50] sm:$0xff] %v3292_v5 }
 0x8c6   : > { %3355 = vst [vmem:[#allocation2 + $0x48] sm:$0xff] %v3291_v39  ;;  %3357 = vst [vmem:[#allocation2 + $0x58] sm:$0xff] %v3293_v22  ;;  %v3044_v46 = vpop.f32.mrb[86].mxu1  ;;  %v3205_v29 = vpop.f32.mrb[86].mxu0 }
 0x8c7   : > { %v3294_v32 = vadd.f32 %v3044_v46, %v2780_v33  ;;  %v3296_v49 = vadd.f32 %v3205_v29, %v2782_v15  ;;  %v3046_v10 = vpop.f32.mrb[87].mxu1  ;;  %v3207_v50 = vpop.f32.mrb[87].mxu0  ;;  %v2800_v15 = vld [vmem:[#allocation2 + $0x100] sm:$0xff]  ;;  %v2803_v46 = vld [vmem:[#allocation2 + $0x118] sm:$0xff] }
 0x8c8   : > { %v3295_v61 = vadd.f32 %v3046_v10, %v2781_v52  ;;  %v3297_v63 = vadd.f32 %v3207_v50, %v2783_v37  ;;  %v2802_v52 = vld [vmem:[#allocation2 + $0x110] sm:$0xff]  ;;  %v2801_v37 = vld [vmem:[#allocation2 + $0x108] sm:$0xff] }
 0x8c9   : > { %3358 = vst [vmem:[#allocation2 + $0x60] sm:$0xff] %v3294_v32  ;;  %3360 = vst [vmem:[#allocation2 + $0x70] sm:$0xff] %v3296_v49 }
 0x8ca   : > { %3359 = vst [vmem:[#allocation2 + $0x68] sm:$0xff] %v3295_v61  ;;  %3361 = vst [vmem:[#allocation2 + $0x78] sm:$0xff] %v3297_v63  ;;  %v3050_v0 = vpop.f32.mrb[88].mxu1  ;;  %v3211_v20 = vpop.f32.mrb[88].mxu0 }
 0x8cb   : > { %v3298_v31 = vadd.f32 %v3050_v0, %v2784_v9  ;;  %v3300_v7 = vadd.f32 %v3211_v20, %v2786_v62  ;;  %v3052_v43 = vpop.f32.mrb[89].mxu1  ;;  %v3213_v42 = vpop.f32.mrb[89].mxu0  ;;  %v2804_v62 = vld [vmem:[#allocation2 + $0x120] sm:$0xff]  ;;  %v2807_v0 = vld [vmem:[#allocation2 + $0x138] sm:$0xff] }
 0x8cc   : > { %v3299_v55 = vadd.f32 %v3052_v43, %v2785_v30  ;;  %v3301_v13 = vadd.f32 %v3213_v42, %v2787_v16  ;;  %v2806_v30 = vld [vmem:[#allocation2 + $0x130] sm:$0xff]  ;;  %v2805_v16 = vld [vmem:[#allocation2 + $0x128] sm:$0xff] }
 0x8cd   : > { %3362 = vst [vmem:[#allocation2 + $0x80] sm:$0xff] %v3298_v31  ;;  %3364 = vst [vmem:[#allocation2 + $0x90] sm:$0xff] %v3300_v7  ;;  %v3423_v57 = vld [vmem:[#allocation2 + $0x48] sm:$0xff] (!%p3821_p9) }
 0x8ce   : > { %3363 = vst [vmem:[#allocation2 + $0x88] sm:$0xff] %v3299_v55  ;;  %3365 = vst [vmem:[#allocation2 + $0x98] sm:$0xff] %v3301_v13  ;;  %v3056_v54 = vpop.f32.mrb[90].mxu1  ;;  %v3217_v12 = vpop.f32.mrb[90].mxu0 }
 0x8cf   : > { %v3302_v26 = vadd.f32 %v3056_v54, %v2788_v36  ;;  %v3304_v8 = vadd.f32 %v3217_v12, %v2790_v3  ;;  %v3058_v19 = vpop.f32.mrb[91].mxu1  ;;  %v3219_v48 = vpop.f32.mrb[91].mxu0  ;;  %v2808_v3 = vld [vmem:[#allocation2 + $0x140] sm:$0xff]  ;;  %v2811_v54 = vld [vmem:[#allocation2 + $0x158] sm:$0xff] }
 0x8d0   : > { %v3303_v23 = vadd.f32 %v3058_v19, %v2789_v2  ;;  %v3305_v17 = vadd.f32 %v3219_v48, %v2791_v14  ;;  %v2810_v2 = vld [vmem:[#allocation2 + $0x150] sm:$0xff]  ;;  %v2809_v14 = vld [vmem:[#allocation2 + $0x148] sm:$0xff] }
 0x8d1   : > { %3366 = vst [vmem:[#allocation2 + $0xa0] sm:$0xff] %v3302_v26  ;;  %3368 = vst [vmem:[#allocation2 + $0xb0] sm:$0xff] %v3304_v8 }
 0x8d2   : > { %3367 = vst [vmem:[#allocation2 + $0xa8] sm:$0xff] %v3303_v23  ;;  %3369 = vst [vmem:[#allocation2 + $0xb8] sm:$0xff] %v3305_v17  ;;  %v3062_v1 = vpop.f32.mrb[92].mxu1  ;;  %v3223_v41 = vpop.f32.mrb[92].mxu0 }
 0x8d3   : > { %v3306_v18 = vadd.f32 %v3062_v1, %v2792_v27  ;;  %v3308_v45 = vadd.f32 %v3223_v41, %v2794_v58  ;;  %v3064_v35 = vpop.f32.mrb[93].mxu1  ;;  %v3225_v25 = vpop.f32.mrb[93].mxu0  ;;  %v2812_v58 = vld [vmem:[#allocation2 + $0x160] sm:$0xff]  ;;  %v2815_v1 = vld [vmem:[#allocation2 + $0x178] sm:$0xff] }
 0x8d4   : > { %v3307_v28 = vadd.f32 %v3064_v35, %v2793_v59  ;;  %v3309_v38 = vadd.f32 %v3225_v25, %v2795_v24  ;;  %v2814_v59 = vld [vmem:[#allocation2 + $0x170] sm:$0xff]  ;;  %v2813_v24 = vld [vmem:[#allocation2 + $0x168] sm:$0xff] }
 0x8d5   : > { %3370 = vst [vmem:[#allocation2 + $0xc0] sm:$0xff] %v3306_v18  ;;  %3372 = vst [vmem:[#allocation2 + $0xd0] sm:$0xff] %v3308_v45 }
 0x8d6   : > { %3371 = vst [vmem:[#allocation2 + $0xc8] sm:$0xff] %v3307_v28  ;;  %3373 = vst [vmem:[#allocation2 + $0xd8] sm:$0xff] %v3309_v38  ;;  %v3068_v11 = vpop.f32.mrb[94].mxu1  ;;  %v3229_v6 = vpop.f32.mrb[94].mxu0 }
 0x8d7   : > { %v3310_v5 = vadd.f32 %v3068_v11, %v2796_v56  ;;  %v3312_v44 = vadd.f32 %v3229_v6, %v2798_v21  ;;  %v3070_v53 = vpop.f32.mrb[95].mxu1  ;;  %v3231_v39 = vpop.f32.mrb[95].mxu0  ;;  %v2816_v21 = vld [vmem:[#allocation2 + $0x180] sm:$0xff] }
 0x8d8   : > { %v3311_v22 = vadd.f32 %v3070_v53, %v2797_v4  ;;  %v3313_v33 = vadd.f32 %v3231_v39, %v2799_v40  ;;  %v2817_v4 = vld [vmem:[#allocation2 + $0x188] sm:$0xff] }
 0x8d9   : > { %3374 = vst [vmem:[#allocation2 + $0xe0] sm:$0xff] %v3310_v5  ;;  %3376 = vst [vmem:[#allocation2 + $0xf0] sm:$0xff] %v3312_v44  ;;  %v2820_v44 = vld [vmem:[#allocation2 + $0x1a0] sm:$0xff]  ;;  %v2821_v53 = vld [vmem:[#allocation2 + $0x1a8] sm:$0xff] }
 0x8da   : > { %3375 = vst [vmem:[#allocation2 + $0xe8] sm:$0xff] %v3311_v22  ;;  %3377 = vst [vmem:[#allocation2 + $0xf8] sm:$0xff] %v3313_v33  ;;  %v3074_v29 = vpop.f32.mrb[96].mxu1  ;;  %v3235_v32 = vpop.f32.mrb[96].mxu0 }
 0x8db   : > { %v3314_v49 = vadd.f32 %v3074_v29, %v2800_v15  ;;  %v3316_v10 = vadd.f32 %v3235_v32, %v2802_v52  ;;  %v3076_v50 = vpop.f32.mrb[97].mxu1  ;;  %v3237_v61 = vpop.f32.mrb[97].mxu0  ;;  %v2824_v52 = vld [vmem:[#allocation2 + $0x1c0] sm:$0xff] }
 0x8dc   : > { %v3315_v63 = vadd.f32 %v3076_v50, %v2801_v37  ;;  %v3317_v9 = vadd.f32 %v3237_v61, %v2803_v46  ;;  %v2825_v37 = vld [vmem:[#allocation2 + $0x1c8] sm:$0xff] }
 0x8dd   : > { %3378 = vst [vmem:[#allocation2 + $0x100] sm:$0xff] %v3314_v49  ;;  %3380 = vst [vmem:[#allocation2 + $0x110] sm:$0xff] %v3316_v10  ;;  %v2828_v10 = vld [vmem:[#allocation2 + $0x1e0] sm:$0xff]  ;;  %v2829_v50 = vld [vmem:[#allocation2 + $0x1e8] sm:$0xff] }
 0x8de   : > { %3379 = vst [vmem:[#allocation2 + $0x108] sm:$0xff] %v3315_v63  ;;  %3381 = vst [vmem:[#allocation2 + $0x118] sm:$0xff] %v3317_v9  ;;  %v3080_v20 = vpop.f32.mrb[98].mxu1  ;;  %v3241_v31 = vpop.f32.mrb[98].mxu0 }
 0x8df   : > { %v3318_v7 = vadd.f32 %v3080_v20, %v2804_v62  ;;  %v3320_v43 = vadd.f32 %v3241_v31, %v2806_v30  ;;  %v3082_v42 = vpop.f32.mrb[99].mxu1  ;;  %v3243_v55 = vpop.f32.mrb[99].mxu0  ;;  %v2818_v30 = vld [vmem:[#allocation2 + $0x190] sm:$0xff] }
 0x8e0   : > { %v3319_v13 = vadd.f32 %v3082_v42, %v2805_v16  ;;  %v3321_v36 = vadd.f32 %v3243_v55, %v2807_v0  ;;  %v2819_v16 = vld [vmem:[#allocation2 + $0x198] sm:$0xff] }
 0x8e1   : > { %3382 = vst [vmem:[#allocation2 + $0x120] sm:$0xff] %v3318_v7  ;;  %3384 = vst [vmem:[#allocation2 + $0x130] sm:$0xff] %v3320_v43  ;;  %v2822_v43 = vld [vmem:[#allocation2 + $0x1b0] sm:$0xff]  ;;  %v2823_v42 = vld [vmem:[#allocation2 + $0x1b8] sm:$0xff] }
 0x8e2   : > { %3383 = vst [vmem:[#allocation2 + $0x128] sm:$0xff] %v3319_v13  ;;  %3385 = vst [vmem:[#allocation2 + $0x138] sm:$0xff] %v3321_v36  ;;  %v3086_v12 = vpop.f32.mrb[100].mxu1  ;;  %v3247_v26 = vpop.f32.mrb[100].mxu0 }
 0x8e3   : > { %v3322_v8 = vadd.f32 %v3086_v12, %v2808_v3  ;;  %v3324_v19 = vadd.f32 %v3247_v26, %v2810_v2  ;;  %v3088_v48 = vpop.f32.mrb[101].mxu1  ;;  %v3249_v23 = vpop.f32.mrb[101].mxu0  ;;  %v2826_v2 = vld [vmem:[#allocation2 + $0x1d0] sm:$0xff] }
 0x8e4   : > { %v3323_v17 = vadd.f32 %v3088_v48, %v2809_v14  ;;  %v3325_v27 = vadd.f32 %v3249_v23, %v2811_v54  ;;  %v2827_v14 = vld [vmem:[#allocation2 + $0x1d8] sm:$0xff] }
 0x8e5   : > { %3386 = vst [vmem:[#allocation2 + $0x140] sm:$0xff] %v3322_v8  ;;  %3388 = vst [vmem:[#allocation2 + $0x150] sm:$0xff] %v3324_v19  ;;  %v2830_v19 = vld [vmem:[#allocation2 + $0x1f0] sm:$0xff]  ;;  %v2831_v48 = vld [vmem:[#allocation2 + $0x1f8] sm:$0xff] }
 0x8e6   : > { %3387 = vst [vmem:[#allocation2 + $0x148] sm:$0xff] %v3323_v17  ;;  %3389 = vst [vmem:[#allocation2 + $0x158] sm:$0xff] %v3325_v27  ;;  %v3092_v41 = vpop.f32.mrb[102].mxu1  ;;  %v3253_v18 = vpop.f32.mrb[102].mxu0 }
 0x8e7   : > { %v3326_v45 = vadd.f32 %v3092_v41, %v2812_v58  ;;  %v3328_v35 = vadd.f32 %v3253_v18, %v2814_v59  ;;  %v3094_v25 = vpop.f32.mrb[103].mxu1  ;;  %v3255_v28 = vpop.f32.mrb[103].mxu0  ;;  %v3414_v59 = vld [vmem:[#allocation2] sm:$0xff] (!%p3821_p9) }
 0x8e8   : > { %v3327_v38 = vadd.f32 %v3094_v25, %v2813_v24  ;;  %v3329_v56 = vadd.f32 %v3255_v28, %v2815_v1  ;;  %v3478_v24 = vld [vmem:[#allocation11] sm:$0xf] (!%p3821_p9)  ;;  %v3417_v25 = vld [vmem:[#allocation2 + $0x18] sm:$0xff] (!%p3821_p9) }
 0x8e9   : > { %3390 = vst [vmem:[#allocation2 + $0x160] sm:$0xff] %v3326_v45  ;;  %3392 = vst [vmem:[#allocation2 + $0x170] sm:$0xff] %v3328_v35  ;;  %v3415_v1 = vld [vmem:[#allocation2 + $0x8] sm:$0xff] (!%p3821_p9)  ;;  %v7590_v41 = vrot.slane (!%p3821_p9), %v3478_v24, %v906_v60  ;;  %v7594_v18 = vrot.slane (!%p3821_p9), %v3478_v24, %v910_v34  ;;  %v3416_v45 = vld [vmem:[#allocation2 + $0x10] sm:$0xff] (!%p3821_p9)  ;;  %v7598_v35 = vrot.slane (!%p3821_p9), %v3478_v24, %v914_v51 }
 0x8ea   : > { %3391 = vst [vmem:[#allocation2 + $0x168] sm:$0xff] %v3327_v38  ;;  %3393 = vst [vmem:[#allocation2 + $0x178] sm:$0xff] %v3329_v56  ;;  %v3098_v40 = vpop.f32.mrb[104].mxu1  ;;  %v7602_v28 = vrot.slane (!%p3821_p9), %v3478_v24, %v918_v47  ;;  %v3418_v38 = vld [vmem:[#allocation2 + $0x20] sm:$0xff] (!%p3821_p9)  ;;  %v3419_v56 = vld [vmem:[#allocation2 + $0x28] sm:$0xff] (!%p3821_p9) }
 0x8eb   : > { %v3330_v11 = vadd.f32 %v3098_v40, %v2816_v21  ;;  %v3100_v6 = vpop.f32.mrb[105].mxu1  ;;  %v3420_v21 = vld [vmem:[#allocation2 + $0x30] sm:$0xff] (!%p3821_p9)  ;;  %v3421_v60 = vld [vmem:[#allocation2 + $0x38] sm:$0xff] (!%p3821_p9)  ;;  %v3501_v34 = vadd.f32 (!%p3821_p9), %v7594_v18, %v3415_v1  ;;  %v3502_v51 = vadd.f32 (!%p3821_p9), %v7598_v35, %v3416_v45 }
 0x8ec   : > { %v3331_v5 = vadd.f32 %v3100_v6, %v2817_v4  ;;  %v3500_v4 = vadd.f32 (!%p3821_p9), %v7590_v41, %v3414_v59  ;;  %v3503_v40 = vadd.f32 (!%p3821_p9), %v7602_v28, %v3417_v25  ;;  %v3424_v47 = vld [vmem:[#allocation2 + $0x50] sm:$0xff] (!%p3821_p9)  ;;  %v3504_v6 = vadd.f32 (!%p3821_p9), %v7590_v41, %v3418_v38  ;;  %v3445_v24 = vld [vmem:[#allocation2 + $0xf8] sm:$0xff] (!%p3821_p9)  ;;  %v3446_v38 = vld [vmem:[#allocation2 + $0x100] sm:$0xff] (!%p3821_p9) }
 0x8ed   : > { %3394 = vst [vmem:[#allocation2 + $0x180] sm:$0xff] %v3330_v11  ;;  %v3422_v11 = vld [vmem:[#allocation2 + $0x40] sm:$0xff] (!%p3821_p9)  ;;  %3565 = vst [vmem:[%s6201_s29 + $0x8] sm:$0xff] (!%p3821_p9), %v3501_v34  ;;  %v3444_v59 = vld [vmem:[#allocation2 + $0xf0] sm:$0xff] (!%p3821_p9)  ;;  %v3531_v25 = vadd.f32 (!%p3821_p9), %v7602_v28, %v3445_v24 }
 0x8ee   : > { %3395 = vst [vmem:[#allocation2 + $0x188] sm:$0xff] %v3331_v5  ;;  %v3104_v39 = vpop.f32.mrb[106].mxu1  ;;  %v3505_v5 = vadd.f32 (!%p3821_p9), %v7594_v18, %v3419_v56  ;;  %3564 = vst [vmem:[%s6201_s29] sm:$0xff] (!%p3821_p9), %v3500_v4  ;;  %v3530_v45 = vadd.f32 (!%p3821_p9), %v7598_v35, %v3444_v59  ;;  %v3447_v56 = vld [vmem:[#allocation2 + $0x108] sm:$0xff] (!%p3821_p9) }
 0x8ef   : > { %v3334_v22 = vadd.f32 %v3104_v39, %v2820_v44  ;;  %v3106_v33 = vpop.f32.mrb[107].mxu1  ;;  %v3506_v44 = vadd.f32 (!%p3821_p9), %v7598_v35, %v3420_v21  ;;  %v3425_v39 = vld [vmem:[#allocation2 + $0x58] sm:$0xff] (!%p3821_p9)  ;;  %3566 = vst [vmem:[%s6201_s29 + $0x10] sm:$0xff] (!%p3821_p9), %v3502_v51  ;;  %3567 = vst [vmem:[%s6201_s29 + $0x18] sm:$0xff] (!%p3821_p9), %v3503_v40  ;;  %v3448_v21 = vld [vmem:[#allocation2 + $0x110] sm:$0xff] (!%p3821_p9)  ;;  %v3533_v4 = vadd.f32 (!%p3821_p9), %v7594_v18, %v3447_v56 }
 0x8f0   : > { %v3335_v15 = vadd.f32 %v3106_v33, %v2821_v53  ;;  %v3507_v53 = vadd.f32 (!%p3821_p9), %v7602_v28, %v3421_v60  ;;  %v3427_v33 = vld [vmem:[#allocation2 + $0x68] sm:$0xff] (!%p3821_p9)  ;;  %3568 = vst [vmem:[%s6201_s29 + $0x20] sm:$0xff] (!%p3821_p9), %v3504_v6  ;;  %3569 = vst [vmem:[%s6201_s29 + $0x28] sm:$0xff] (!%p3821_p9), %v3505_v5  ;;  %v3532_v60 = vadd.f32 (!%p3821_p9), %v7590_v41, %v3446_v38  ;;  %v3449_v51 = vld [vmem:[#allocation2 + $0x118] sm:$0xff] (!%p3821_p9) }
 0x8f1   : > { %3398 = vst [vmem:[#allocation2 + $0x1a0] sm:$0xff] %v3334_v22  ;;  %v3426_v22 = vld [vmem:[#allocation2 + $0x60] sm:$0xff] (!%p3821_p9)  ;;  %3570 = vst [vmem:[%s6201_s29 + $0x30] sm:$0xff] (!%p3821_p9), %v3506_v44  ;;  %v3534_v34 = vadd.f32 (!%p3821_p9), %v7598_v35, %v3448_v21  ;;  %v3452_v5 = vld [vmem:[#allocation2 + $0x130] sm:$0xff] (!%p3821_p9) }
 0x8f2   : > { %3399 = vst [vmem:[#allocation2 + $0x1a8] sm:$0xff] %v3335_v15  ;;  %v3110_v46 = vpop.f32.mrb[108].mxu1  ;;  %v3508_v15 = vadd.f32 (!%p3821_p9), %v7590_v41, %v3422_v11  ;;  %3571 = vst [vmem:[%s6201_s29 + $0x38] sm:$0xff] (!%p3821_p9), %v3507_v53  ;;  %v3450_v40 = vld [vmem:[#allocation2 + $0x120] sm:$0xff] (!%p3821_p9)  ;;  %v3451_v11 = vld [vmem:[#allocation2 + $0x128] sm:$0xff] (!%p3821_p9) }
 0x8f3   : > { %v3338_v29 = vadd.f32 %v3110_v46, %v2824_v52  ;;  %v3112_v32 = vpop.f32.mrb[109].mxu1  ;;  %v3509_v52 = vadd.f32 (!%p3821_p9), %v7594_v18, %v3423_v57  ;;  %v3511_v46 = vadd.f32 (!%p3821_p9), %v7602_v28, %v3425_v39  ;;  %3594 = vst [vmem:[%s6201_s29 + $0xf0] sm:$0xff] (!%p3821_p9), %v3530_v45  ;;  %3595 = vst [vmem:[%s6201_s29 + $0xf8] sm:$0xff] (!%p3821_p9), %v3531_v25  ;;  %v3453_v44 = vld [vmem:[#allocation2 + $0x138] sm:$0xff] (!%p3821_p9)  ;;  %v3454_v53 = vld [vmem:[#allocation2 + $0x140] sm:$0xff] (!%p3821_p9) }
 0x8f4   : > { %v3339_v49 = vadd.f32 %v3112_v32, %v2825_v37  ;;  %v3510_v37 = vadd.f32 (!%p3821_p9), %v7598_v35, %v3424_v47  ;;  %v3429_v32 = vld [vmem:[#allocation2 + $0x78] sm:$0xff] (!%p3821_p9)  ;;  %3572 = vst [vmem:[%s6201_s29 + $0x40] sm:$0xff] (!%p3821_p9), %v3508_v15  ;;  %v3535_v57 = vadd.f32 (!%p3821_p9), %v7602_v28, %v3449_v51  ;;  %v3536_v47 = vadd.f32 (!%p3821_p9), %v7590_v41, %v3450_v40  ;;  %v3455_v15 = vld [vmem:[#allocation2 + $0x148] sm:$0xff] (!%p3821_p9) }
 0x8f5   : > { %3402 = vst [vmem:[#allocation2 + $0x1c0] sm:$0xff] %v3338_v29  ;;  %v3428_v29 = vld [vmem:[#allocation2 + $0x70] sm:$0xff] (!%p3821_p9)  ;;  %3573 = vst [vmem:[%s6201_s29 + $0x48] sm:$0xff] (!%p3821_p9), %v3509_v52  ;;  %v3537_v6 = vadd.f32 (!%p3821_p9), %v7594_v18, %v3451_v11  ;;  %v3538_v39 = vadd.f32 (!%p3821_p9), %v7598_v35, %v3452_v5 }
 0x8f6   : > { %3403 = vst [vmem:[#allocation2 + $0x1c8] sm:$0xff] %v3339_v49  ;;  %v3116_v61 = vpop.f32.mrb[110].mxu1  ;;  %v3430_v49 = vld [vmem:[#allocation2 + $0x80] sm:$0xff] (!%p3821_p9)  ;;  %3574 = vst [vmem:[%s6201_s29 + $0x50] sm:$0xff] (!%p3821_p9), %v3510_v37  ;;  %v3456_v52 = vld [vmem:[#allocation2 + $0x150] sm:$0xff] (!%p3821_p9) }
 0x8f7   : > { %v3342_v63 = vadd.f32 %v3116_v61, %v2828_v10  ;;  %v3118_v9 = vpop.f32.mrb[111].mxu1  ;;  %v3512_v10 = vadd.f32 (!%p3821_p9), %v7590_v41, %v3426_v22  ;;  %v3514_v61 = vadd.f32 (!%p3821_p9), %v7598_v35, %v3428_v29  ;;  %3575 = vst [vmem:[%s6201_s29 + $0x58] sm:$0xff] (!%p3821_p9), %v3511_v46  ;;  %3596 = vst [vmem:[%s6201_s29 + $0x100] sm:$0xff] (!%p3821_p9), %v3532_v60  ;;  %v3457_v37 = vld [vmem:[#allocation2 + $0x158] sm:$0xff] (!%p3821_p9) }
 0x8f8   : > { %v3343_v62 = vadd.f32 %v3118_v9, %v2829_v50  ;;  %v3513_v50 = vadd.f32 (!%p3821_p9), %v7594_v18, %v3427_v33  ;;  %v3431_v9 = vld [vmem:[#allocation2 + $0x88] sm:$0xff] (!%p3821_p9)  ;;  %3597 = vst [vmem:[%s6201_s29 + $0x108] sm:$0xff] (!%p3821_p9), %v3533_v4  ;;  %3598 = vst [vmem:[%s6201_s29 + $0x110] sm:$0xff] (!%p3821_p9), %v3534_v34  ;;  %v3539_v22 = vadd.f32 (!%p3821_p9), %v7602_v28, %v3453_v44 }
 0x8f9   : > { %3406 = vst [vmem:[#allocation2 + $0x1e0] sm:$0xff] %v3342_v63  ;;  %v3515_v63 = vadd.f32 (!%p3821_p9), %v7602_v28, %v3429_v32  ;;  %3576 = vst [vmem:[%s6201_s29 + $0x60] sm:$0xff] (!%p3821_p9), %v3512_v10  ;;  %v3540_v33 = vadd.f32 (!%p3821_p9), %v7590_v41, %v3454_v53  ;;  %v3541_v46 = vadd.f32 (!%p3821_p9), %v7594_v18, %v3455_v15  ;;  %v3459_v10 = vld [vmem:[#allocation2 + $0x168] sm:$0xff] (!%p3821_p9) }
 0x8fa   : > { %3407 = vst [vmem:[#allocation2 + $0x1e8] sm:$0xff] %v3343_v62  ;;  %v3259_v0 = vpop.f32.mrb[112].mxu1  ;;  %v3432_v62 = vld [vmem:[#allocation2 + $0x90] sm:$0xff] (!%p3821_p9)  ;;  %3577 = vst [vmem:[%s6201_s29 + $0x68] sm:$0xff] (!%p3821_p9), %v3513_v50  ;;  %v3542_v29 = vadd.f32 (!%p3821_p9), %v7598_v35, %v3456_v52  ;;  %v3543_v32 = vadd.f32 (!%p3821_p9), %v7602_v28, %v3457_v37 }
 0x8fb   : > { %v3332_v20 = vadd.f32 %v3259_v0, %v2818_v30  ;;  %v3261_v31 = vpop.f32.mrb[113].mxu1  ;;  %v3433_v30 = vld [vmem:[#allocation2 + $0x98] sm:$0xff] (!%p3821_p9)  ;;  %v3517_v0 = vadd.f32 (!%p3821_p9), %v7594_v18, %v3431_v9  ;;  %3578 = vst [vmem:[%s6201_s29 + $0x70] sm:$0xff] (!%p3821_p9), %v3514_v61  ;;  %3579 = vst [vmem:[%s6201_s29 + $0x78] sm:$0xff] (!%p3821_p9), %v3515_v63  ;;  %v3460_v50 = vld [vmem:[#allocation2 + $0x170] sm:$0xff] (!%p3821_p9)  ;;  %v3545_v63 = vadd.f32 (!%p3821_p9), %v7594_v18, %v3459_v10 }
 0x8fc   : > { %v3333_v7 = vadd.f32 %v3261_v31, %v2819_v16  ;;  %v3516_v16 = vadd.f32 (!%p3821_p9), %v7590_v41, %v3430_v49  ;;  %v3519_v31 = vadd.f32 (!%p3821_p9), %v7602_v28, %v3433_v30  ;;  %3599 = vst [vmem:[%s6201_s29 + $0x118] sm:$0xff] (!%p3821_p9), %v3535_v57  ;;  %3600 = vst [vmem:[%s6201_s29 + $0x120] sm:$0xff] (!%p3821_p9), %v3536_v47  ;;  %v3458_v49 = vld [vmem:[#allocation2 + $0x160] sm:$0xff] (!%p3821_p9) }
 0x8fd   : > { %3396 = vst [vmem:[#allocation2 + $0x190] sm:$0xff] %v3332_v20  ;;  %v3518_v20 = vadd.f32 (!%p3821_p9), %v7598_v35, %v3432_v62  ;;  %3581 = vst [vmem:[%s6201_s29 + $0x88] sm:$0xff] (!%p3821_p9), %v3517_v0  ;;  %v3544_v61 = vadd.f32 (!%p3821_p9), %v7590_v41, %v3458_v49  ;;  %v3546_v9 = vadd.f32 (!%p3821_p9), %v7598_v35, %v3460_v50  ;;  %v3461_v62 = vld [vmem:[#allocation2 + $0x178] sm:$0xff] (!%p3821_p9)  ;;  %v3462_v30 = vld [vmem:[#allocation2 + $0x180] sm:$0xff] (!%p3821_p9) }
 0x8fe   : > { %3397 = vst [vmem:[#allocation2 + $0x198] sm:$0xff] %v3333_v7  ;;  %v3265_v55 = vpop.f32.mrb[114].mxu1  ;;  %v3434_v7 = vld [vmem:[#allocation2 + $0xa0] sm:$0xff] (!%p3821_p9)  ;;  %3580 = vst [vmem:[%s6201_s29 + $0x80] sm:$0xff] (!%p3821_p9), %v3516_v16  ;;  %v3463_v16 = vld [vmem:[#allocation2 + $0x188] sm:$0xff] (!%p3821_p9)  ;;  %v3547_v0 = vadd.f32 (!%p3821_p9), %v7602_v28, %v3461_v62 }
 0x8ff   : > { %v3336_v13 = vadd.f32 %v3265_v55, %v2822_v43  ;;  %v3267_v36 = vpop.f32.mrb[115].mxu1  ;;  %v3435_v43 = vld [vmem:[#allocation2 + $0xa8] sm:$0xff] (!%p3821_p9)  ;;  %v3520_v55 = vadd.f32 (!%p3821_p9), %v7590_v41, %v3434_v7  ;;  %3582 = vst [vmem:[%s6201_s29 + $0x90] sm:$0xff] (!%p3821_p9), %v3518_v20  ;;  %3583 = vst [vmem:[%s6201_s29 + $0x98] sm:$0xff] (!%p3821_p9), %v3519_v31  ;;  %v3548_v20 = vadd.f32 (!%p3821_p9), %v7590_v41, %v3462_v30 }
 0x900   : > { %v3337_v3 = vadd.f32 %v3267_v36, %v2823_v42  ;;  %v3436_v42 = vld [vmem:[#allocation2 + $0xb0] sm:$0xff] (!%p3821_p9)  ;;  %3601 = vst [vmem:[%s6201_s29 + $0x128] sm:$0xff] (!%p3821_p9), %v3537_v6  ;;  %3602 = vst [vmem:[%s6201_s29 + $0x130] sm:$0xff] (!%p3821_p9), %v3538_v39  ;;  %v3549_v31 = vadd.f32 (!%p3821_p9), %v7594_v18, %v3463_v16  ;;  %v3474_v59 = vld [vmem:[#allocation2 + $0x1e0] sm:$0xff] (!%p3821_p9) }
 0x901   : > { %3400 = vst [vmem:[#allocation2 + $0x1b0] sm:$0xff] %v3336_v13  ;;  %v3521_v13 = vadd.f32 (!%p3821_p9), %v7594_v18, %v3435_v43  ;;  %v3522_v36 = vadd.f32 (!%p3821_p9), %v7598_v35, %v3436_v42  ;;  %3584 = vst [vmem:[%s6201_s29 + $0xa0] sm:$0xff] (!%p3821_p9), %v3520_v55  ;;  %v3466_v42 = vld [vmem:[#allocation2 + $0x1a0] sm:$0xff] (!%p3821_p9)  ;;  %v3475_v24 = vld [vmem:[#allocation2 + $0x1e8] sm:$0xff] (!%p3821_p9)  ;;  %v3560_v45 = vadd.f32 (!%p3821_p9), %v7590_v41, %v3474_v59 }
 0x902   : > { %3401 = vst [vmem:[#allocation2 + $0x1b8] sm:$0xff] %v3337_v3  ;;  %v3271_v54 = vpop.f32.mrb[116].mxu1  ;;  %v3437_v3 = vld [vmem:[#allocation2 + $0xb8] sm:$0xff] (!%p3821_p9)  ;;  %3603 = vst [vmem:[%s6201_s29 + $0x138] sm:$0xff] (!%p3821_p9), %v3539_v22  ;;  %v3561_v25 = vadd.f32 (!%p3821_p9), %v7594_v18, %v3475_v24 }
 0x903   : > { %v3340_v12 = vadd.f32 %v3271_v54, %v2826_v2  ;;  %v3273_v26 = vpop.f32.mrb[117].mxu1  ;;  %v3438_v2 = vld [vmem:[#allocation2 + $0xc0] sm:$0xff] (!%p3821_p9)  ;;  %v3523_v54 = vadd.f32 (!%p3821_p9), %v7602_v28, %v3437_v3  ;;  %3585 = vst [vmem:[%s6201_s29 + $0xa8] sm:$0xff] (!%p3821_p9), %v3521_v13  ;;  %3586 = vst [vmem:[%s6201_s29 + $0xb0] sm:$0xff] (!%p3821_p9), %v3522_v36  ;;  %v3552_v36 = vadd.f32 (!%p3821_p9), %v7590_v41, %v3466_v42  ;;  %v3467_v3 = vld [vmem:[#allocation2 + $0x1a8] sm:$0xff] (!%p3821_p9) }
 0x904   : > { %v3341_v8 = vadd.f32 %v3273_v26, %v2827_v14  ;;  %3413 = sbr.rel (%p3821_p9) target bundleno = 2326 (0x916), region = 68  ;;  %v3439_v14 = vld [vmem:[#allocation2 + $0xc8] sm:$0xff] (!%p3821_p9)  ;;  %3604 = vst [vmem:[%s6201_s29 + $0x140] sm:$0xff] (!%p3821_p9), %v3540_v33  ;;  %3605 = vst [vmem:[%s6201_s29 + $0x148] sm:$0xff] (!%p3821_p9), %v3541_v46  ;;  %v3464_v7 = vld [vmem:[#allocation2 + $0x190] sm:$0xff] (!%p3821_p9) }
 0x905   : > { %3404 = vst [vmem:[#allocation2 + $0x1d0] sm:$0xff] %v3340_v12  ;;  %v3524_v12 = vadd.f32 (!%p3821_p9), %v7590_v41, %v3438_v2  ;;  %v3525_v26 = vadd.f32 (!%p3821_p9), %v7594_v18, %v3439_v14  ;;  %3587 = vst [vmem:[%s6201_s29 + $0xb8] sm:$0xff] (!%p3821_p9), %v3523_v54  ;;  %v3465_v43 = vld [vmem:[#allocation2 + $0x198] sm:$0xff] (!%p3821_p9)  ;;  %v3550_v55 = vadd.f32 (!%p3821_p9), %v7598_v35, %v3464_v7 }
 0x906   : > { %3405 = vst [vmem:[#allocation2 + $0x1d8] sm:$0xff] %v3341_v8  ;;  %v3277_v23 = vpop.f32.mrb[118].mxu1  ;;  %v3440_v8 = vld [vmem:[#allocation2 + $0xd0] sm:$0xff] (!%p3821_p9)  ;;  %3606 = vst [vmem:[%s6201_s29 + $0x150] sm:$0xff] (!%p3821_p9), %v3542_v29  ;;  %v3551_v13 = vadd.f32 (!%p3821_p9), %v7602_v28, %v3465_v43  ;;  %v3553_v54 = vadd.f32 (!%p3821_p9), %v7594_v18, %v3467_v3 }
 0x907   : > { %v3344_v17 = vadd.f32 %v3277_v23, %v2830_v19  ;;  %v3279_v27 = vpop.f32.mrb[119].mxu1  ;;  %v3441_v19 = vld [vmem:[#allocation2 + $0xd8] sm:$0xff] (!%p3821_p9)  ;;  %v3526_v23 = vadd.f32 (!%p3821_p9), %v7598_v35, %v3440_v8  ;;  %3588 = vst [vmem:[%s6201_s29 + $0xc0] sm:$0xff] (!%p3821_p9), %v3524_v12  ;;  %3589 = vst [vmem:[%s6201_s29 + $0xc8] sm:$0xff] (!%p3821_p9), %v3525_v26  ;;  %v3470_v8 = vld [vmem:[#allocation2 + $0x1c0] sm:$0xff] (!%p3821_p9) }
 0x908   : > { %v3345_v58 = vadd.f32 %v3279_v27, %v2831_v48  ;;  %v3442_v48 = vld [vmem:[#allocation2 + $0xe0] sm:$0xff] (!%p3821_p9)  ;;  %3607 = vst [vmem:[%s6201_s29 + $0x158] sm:$0xff] (!%p3821_p9), %v3543_v32  ;;  %3608 = vst [vmem:[%s6201_s29 + $0x160] sm:$0xff] (!%p3821_p9), %v3544_v61  ;;  %v3468_v2 = vld [vmem:[#allocation2 + $0x1b0] sm:$0xff] (!%p3821_p9) }
 0x909   : > { %3408 = vst [vmem:[#allocation2 + $0x1f0] sm:$0xff] %v3344_v17  ;;  %v3527_v17 = vadd.f32 (!%p3821_p9), %v7602_v28, %v3441_v19  ;;  %v3528_v27 = vadd.f32 (!%p3821_p9), %v7590_v41, %v3442_v48  ;;  %3590 = vst [vmem:[%s6201_s29 + $0xd0] sm:$0xff] (!%p3821_p9), %v3526_v23  ;;  %v3469_v14 = vld [vmem:[#allocation2 + $0x1b8] sm:$0xff] (!%p3821_p9)  ;;  %v3554_v12 = vadd.f32 (!%p3821_p9), %v7598_v35, %v3468_v2  ;;  %v3471_v19 = vld [vmem:[#allocation2 + $0x1c8] sm:$0xff] (!%p3821_p9) }
 0x90a   : > { %3409 = vst [vmem:[#allocation2 + $0x1f8] sm:$0xff] %v3345_v58  ;;  %v3443_v58 = vld [vmem:[#allocation2 + $0xe8] sm:$0xff] (!%p3821_p9)  ;;  %3609 = vst [vmem:[%s6201_s29 + $0x168] sm:$0xff] (!%p3821_p9), %v3545_v63  ;;  %v3555_v26 = vadd.f32 (!%p3821_p9), %v7602_v28, %v3469_v14  ;;  %v3556_v23 = vadd.f32 (!%p3821_p9), %v7590_v41, %v3470_v8 }
 0x90b   : > { %v3529_v1 = vadd.f32 %v7594_v18, %v3443_v58  ;;  %3591 = vst [vmem:[%s6201_s29 + $0xd8] sm:$0xff] %v3527_v17  ;;  %3592 = vst [vmem:[%s6201_s29 + $0xe0] sm:$0xff] %v3528_v27  ;;  %v3557_v17 = vadd.f32 %v7594_v18, %v3471_v19 }
 0x90c   : > { %3610 = vst [vmem:[%s6201_s29 + $0x170] sm:$0xff] %v3546_v9  ;;  %3611 = vst [vmem:[%s6201_s29 + $0x178] sm:$0xff] %v3547_v0  ;;  %v3472_v48 = vld [vmem:[#allocation2 + $0x1d0] sm:$0xff] }
 0x90d   : > { %3593 = vst [vmem:[%s6201_s29 + $0xe8] sm:$0xff] %v3529_v1  ;;  %3612 = vst [vmem:[%s6201_s29 + $0x180] sm:$0xff] %v3548_v20  ;;  %v3558_v27 = vadd.f32 %v7598_v35, %v3472_v48  ;;  %v3473_v58 = vld [vmem:[#allocation2 + $0x1d8] sm:$0xff] }
 0x90e   : > { %3613 = vst [vmem:[%s6201_s29 + $0x188] sm:$0xff] %v3549_v31  ;;  %3614 = vst [vmem:[%s6201_s29 + $0x190] sm:$0xff] %v3550_v55  ;;  %v3559_v1 = vadd.f32 %v7602_v28, %v3473_v58 }
 0x90f   : > { %3615 = vst [vmem:[%s6201_s29 + $0x198] sm:$0xff] %v3551_v13  ;;  %3616 = vst [vmem:[%s6201_s29 + $0x1a0] sm:$0xff] %v3552_v36 }
 0x910   : > { %3617 = vst [vmem:[%s6201_s29 + $0x1a8] sm:$0xff] %v3553_v54  ;;  %3618 = vst [vmem:[%s6201_s29 + $0x1b0] sm:$0xff] %v3554_v12  ;;  %v3476_v38 = vld [vmem:[#allocation2 + $0x1f0] sm:$0xff] }
 0x911   : > { %3619 = vst [vmem:[%s6201_s29 + $0x1b8] sm:$0xff] %v3555_v26  ;;  %v3477_v56 = vld [vmem:[#allocation2 + $0x1f8] sm:$0xff]  ;;  %3620 = vst [vmem:[%s6201_s29 + $0x1c0] sm:$0xff] %v3556_v23  ;;  %v3562_v21 = vadd.f32 %v7598_v35, %v3476_v38 }
 0x912   : > { %3621 = vst [vmem:[%s6201_s29 + $0x1c8] sm:$0xff] %v3557_v17  ;;  %3622 = vst [vmem:[%s6201_s29 + $0x1d0] sm:$0xff] %v3558_v27  ;;  %v3563_v60 = vadd.f32 %v7602_v28, %v3477_v56 }
 0x913   : > { %3623 = vst [vmem:[%s6201_s29 + $0x1d8] sm:$0xff] %v3559_v1  ;;  %3624 = vst [vmem:[%s6201_s29 + $0x1e0] sm:$0xff] %v3560_v45 }
 0x914   : > { %3625 = vst [vmem:[%s6201_s29 + $0x1e8] sm:$0xff] %v3561_v25  ;;  %3626 = vst [vmem:[%s6201_s29 + $0x1f0] sm:$0xff] %v3562_v21 }
 0x915   : > { %3627 = vst [vmem:[%s6201_s29 + $0x1f8] sm:$0xff] %v3563_v60 }
 0x916 PF: > { %s7962_s19 = sld [smem:[#allocation21_spill]]  ;;  %s7963_s27 = sld [smem:[#allocation24_spill]] }
 0x917   : > { %s7964_s30 = sld [smem:[#allocation53_spill]]  ;;  %s3642_s11 = sshll.u32 %s6201_s29, 4  ;;  %s7739_s11 = int_to_ptr.vmem [resolvable:$true] %s3642_s11 }
 0x918   : > { %s3629_s21 = scalar_lea.sflag [#allocation5], %s5975_s12  ;;  %s5465_s25 = scalar_lea.vmem %s7739_s11, 8192 }
 0x919   : > { %p5466_p4 = scmp.ne.s32.totalorder %s7739_s11, %s5465_s25  ;;  %s5612_s18 = smov [#allocation12]  }
 0x91a   : > { %s5469_s17 = sshll.u32 %s5612_s18, 4  ;;  %s5470_s17 = int_to_ptr.vmem [resolvable:$false] %s5469_s17 }
 0x91b   : > { %s5471_s8 = scalar_lea.vmem %s5470_s17, 16384  ;;  %p5472_p11 = scmp.lt.s32.totalorder %s7739_s11, %s5470_s17 }
 0x91c   : > { %s3832_s10 = sshll.u32 %s7962_s19, 13  ;;  %p7965_p0 = scmp.ne.s32.totalorder %s7963_s27, 0 }
 0x91d   : > { %s7736_s14 = scalar_lea.hbm %s7964_s30, %s3832_s10  ;;  %p5473_p5 = scmp.lt.s32.totalorder %s5471_s8, %s5465_s25 }
 0x91e   : > { %p5467_p1 = pnand %p5466_p4, %p7965_p0 }
 0x91f   : > { %p5474_p8 = por %p5473_p5, %p5472_p11 }
 0x920   : > { %p5468_p3 = pneg %p5467_p1 }
 0x922   : > { %p5475_p6 = pnand %p5474_p8, %p5468_p3 }
 0x924   : > { %5478 = shalt.err (!%p5475_p6)
}
 0x925   : > { %s5479_s16 = scalar_lea.hbm %s7736_s14, 8192  ;;  %s5483_s9 = scalar_lea.hbm %s7964_s30, 16384 }
 0x926   : > { %p5480_p13 = scmp.ne.s32.totalorder %s7736_s14, %s5479_s16  ;;  %p5484_p7 = scmp.lt.u32.totalorder %s7736_s14, %s7964_s30 }
 0x927   : > { %p5485_p12 = scmp.lt.u32.totalorder %s5483_s9, %s5479_s16  ;;  %p5487_p4 = scmp.lt.u32.totalorder %s5479_s16, %s7736_s14 }
 0x928   : > { %p5481_p2 = pnand %p5480_p13, %p7965_p0 }
 0x929   : > { %p5486_p9 = por %p5485_p12, %p5484_p7 }
 0x92a   : > { %p5482_p10 = pneg %p5481_p2 }
 0x92b   : > { %p5488_p1 = por %p5487_p4, %p5486_p9 }
 0x92d   : > { %p5489_p3 = pnand %p5488_p1, %p5482_p10 }
 0x92f   : > { %5492 = shalt.err (!%p5489_p3)
}
 0x930   : > { %s5613_s1 = smov 512   ;;  %s5614_s15 = smov 32  }
 0x931   : > { %5065 = dma.vmem_to_hbm [thread:$0]  (%p7965_p0), %s7739_s11, 8192, %s7736_s14, %s3629_s21, %s5613_s1, %s5613_s1, %s5614_s15  }
 0x932 PF: > { %s7966_s19 = sld [smem:[#allocation19_spill]]  ;;  %s7967_s10 = sld [smem:[#allocation25_spill]] }
 0x933   : > { %p5091_p11 = scmp.ge.s32.totalorder %s5599_s28, 2 }
 0x938   : > { %s3657_s24 = sand.u32 1, %s7966_s19   ;;  %p7968_p5 = scmp.ne.s32.totalorder %s7967_s10, 0 }
 0x939   : > { %s3658_s0 = scalar_lea.sflag [#allocation5], %s3657_s24 }
 0x93a   : > { %p5085_p8 = pnand %p5091_p11, %p7968_p5 }
 0x93c   : > { %5554 = dma.done.wait (!%p5085_p8), %s3658_s0, 8192  }
 0x93d   : > { %5556 = vsyncadd (!%p5085_p8), %s3658_s0, 4294959104  ;;  %s27_s28 = sadd.s32 1, %s5599_s28   ;;  %s7969_s18 = sld [smem:[#allocation18_spill]] }
 0x93e   : > { %p24_p6 = scmp.ge.s32.totalorder %s27_s28, 6   ;;  %s7970_s25 = sld [smem:[#allocation22_spill]] }
 0x93f   : > { %s7971_s12 = sld [smem:[#allocation26_spill]]  ;;  %s7972_s27 = sld [smem:[#allocation27_spill]] }
 0x940   : > { %s7973_s19 = smov %s5567_s20  ;;  %s7974_s20 = smov %s5852_s4 }
 0x941   : > { %s7975_s21 = smov %s5575_s22  ;;  %s7976_s22 = smov %s5579_s23 }
 0x942   : > { %s7977_s23 = smov %s5874_s5  ;;  %s7978_s24 = smov %s5591_s26 }
 0x943   :  { %26 = sbr.rel (!%p24_p6) target bundleno = 18 (0x12), region = 134 }
 0x945   : > { %s7979_s26 = smov %s7971_s12 }
 0x94a   :  { %3663 = vsyncpa [#allocation4], 1 }
 0x94b   :  { %3665 = vsyncpa [#allocation4 + $0x1], 1 }
 0x94c   :  { %3666 = vsyncpa [#allocation7], 1 }
 0x94d   :  { %3668 = vsyncpa [#allocation7 + $0x1], 1 }
 0x94e   :  { %3669 = vsyncpa [#allocation10], 1 }
 0x94f   :  { %3671 = vsyncpa [#allocation10 + $0x1], 1 }
 0x950   :  { %3672 = vsyncpa [#allocation5], 1 }
 0x951   :  { %3674 = vsyncpa [#allocation5 + $0x1], 1 }

</bundles_post_ra>
